<compile_context>
chip_gen: v7x
topology: tpu7x:2x2x1
jax: 0.10.0
libtpu: 0.0.40
codegen_flags: <defaults>
</compile_context>

<pallas_src>
import math
import jax
import jax.numpy as jnp
from jax.experimental import pallas as pl
from jax.experimental.pallas import tpu as pltpu

LN_EPS = 1e-5


def _vmem_limit_bytes():
    # Per-generation scoped-VMEM cap: 3/4 of physical VMEM, clipped at 96 MiB
    # (=> ~96 MiB on v5e/v6e's 128 MiB, 48 MiB on v7x's 64 MiB).
    try:
        cap = int(getattr(pltpu.get_tpu_info(), "vmem_capacity_bytes",
                          128 * 1024 * 1024))
    except Exception:
        cap = 128 * 1024 * 1024
    return min((cap * 3) // 4, 96 * 1024 * 1024)


# --------------------------------------------------------------------------
# Pallas kernels
# --------------------------------------------------------------------------
def _layernorm(v, w, b):
    # v: (rows, D) f32, w/b: (1, D) f32 -- statistics kept in f32
    mu = jnp.mean(v, axis=-1, keepdims=True)
    var = jnp.mean((v - mu) ** 2, axis=-1, keepdims=True)
    return (v - mu) * jax.lax.rsqrt(var + LN_EPS) * w + b


def _make_gpt_blocks_kernel(num_heads: int):
    def kernel(x_ref,
               ln1w, ln1b, wqkv, bqkv, wo, bo,
               ln2w, ln2b, w1, b1, w2, b2,
               out_ref, x_sc):
        l = pl.program_id(1)
        n_layer = pl.num_programs(1)
        Bt, S, D = x_sc.shape
        H = num_heads
        hd = D // H
        scale = 1.0 / math.sqrt(hd)

        # Load the residual stream into the VMEM scratch at the first layer.
        @pl.when(l == 0)
        def _():
            x_sc[...] = x_ref[...]

        x = x_sc[...].reshape(Bt * S, D)                  # (rows, D) f32

        # ---- pre-norm + fused QKV projection (one MXU pass, N = 3D) ----
        xn = _layernorm(x, ln1w[0], ln1b[0])
        qkv = jnp.dot(xn.astype(jnp.bfloat16), wqkv[0],
                      preferred_element_type=jnp.float32) + bqkv[0]     # (rows, 3D) f32
        # scale + bf16 cast while still in the merged (rows, D) layout
        q = (qkv[:, :D] * scale).astype(jnp.bfloat16)
        k = qkv[:, D:2 * D].astype(jnp.bfloat16)
        v = qkv[:, 2 * D:].astype(jnp.bfloat16)

        # ---- head split via reshape + swapaxes (no per-head slice loop) ----
        def split_heads(t):                                # (rows, D) -> (Bt*H, S, hd)
            t = t.reshape(Bt, S, H, hd)
            t = jnp.swapaxes(t, 1, 2)                      # (Bt, H, S, hd)
            return t.reshape(Bt * H, S, hd)

        q3, k3, v3 = split_heads(q), split_heads(k), split_heads(v)

        # causal mask built once, broadcast over (Bt*H)
        row = jax.lax.broadcasted_iota(jnp.int32, (S, S), 0)
        col = jax.lax.broadcasted_iota(jnp.int32, (S, S), 1)
        causal = (col <= row)[None, :, :]                  # (1, S, S)

        # batched scores / softmax (f32) / context -- two large MXU ops
        s = jnp.einsum('gqd,gkd->gqk', q3, k3,
                       preferred_element_type=jnp.float32)         # (Bt*H, S, S)
        s = jnp.where(causal, s, -1e30)
        s = s - jnp.max(s, axis=-1, keepdims=True)
        p = jnp.exp(s)
        denom = jnp.sum(p, axis=-1, keepdims=True)
        a = p * pl.reciprocal(denom, approx=True)                  # EUP reciprocal
        ctx = jnp.einsum('gqk,gkd->gqd', a.astype(jnp.bfloat16), v3,
                         preferred_element_type=jnp.float32).astype(jnp.bfloat16)

        # merge heads back to (rows, D) and apply output projection
        ctx = jnp.swapaxes(ctx.reshape(Bt, H, S, hd), 1, 2).reshape(Bt * S, D)
        attn_out = jnp.dot(ctx, wo[0],
                           preferred_element_type=jnp.float32) + bo[0]
        x = x + attn_out                                   # residual (f32)

        # ---- pre-norm + feed-forward MLP ----
        xn2 = _layernorm(x, ln2w[0], ln2b[0])
        h1 = jnp.dot(xn2.astype(jnp.bfloat16), w1[0],
                     preferred_element_type=jnp.float32) + b1[0]
        h1 = jnp.maximum(h1, 0.0)                          # ReLU
        ff = jnp.dot(h1.astype(jnp.bfloat16), w2[0],
                     preferred_element_type=jnp.float32) + b2[0]
        x = x + ff                                         # residual (f32)

        x_sc[...] = x.reshape(Bt, S, D)

        # Write the residual back to HBM only after the last layer.
        @pl.when(l == n_layer - 1)
        def _():
            out_ref[...] = x_sc[...]

    return kernel


def _lm_head_kernel(x_ref, w_ref, b_ref, out_ref):
    # x_ref: (1, S, D) bf16, w_ref: (D, tv) bf16, b_ref: (1, tv) f32
    out_ref[0] = jnp.dot(x_ref[0], w_ref[...],
                         preferred_element_type=jnp.float32) + b_ref[...]


# --------------------------------------------------------------------------
# Wrappers (pallas_call with BlockSpecs / grid)
# --------------------------------------------------------------------------
def _pick_bt(B):
    for bt in (8, 4, 2, 1):
        if B % bt == 0:
            return bt
    return 1


def _pick_tile_v(V, D, S, vmem_bytes):
    # keep (weight + bias + output) tile well under the scoped-VMEM cap,
    # leaving room for the double-buffered x tile and pipeline overhead.
    budget = vmem_bytes // 4
    for tv in (8192, 4096, 2048, 1024, 512, 256, 128):
        if V % tv == 0 and (2 * D * tv * 2 + 2 * S * tv * 4 + 2 * tv * 4) <= budget:
            return tv
    # TODO(synk): V not a multiple of 128 -> masked (non-lane-dense) stores.
    return V


def gpt_blocks_pallas(x, p, num_heads):
    B, S, D = x.shape
    L = p["wqkv"].shape[0]
    Bt = _pick_bt(B)
    vmem = _vmem_limit_bytes()

    names = ["ln1_w", "ln1_b", "wqkv", "bqkv", "wo", "bo",
             "ln2_w", "ln2_b", "w1", "b1", "w2", "b2"]
    weights = [p[n] for n in names]

    def layer_spec(arr):
        # per-layer stacked weight (L, r, c): block (1, r, c), indexed by l
        return pl.BlockSpec((1,) + arr.shape[1:], lambda b, l: (l, 0, 0))

    in_specs = [pl.BlockSpec((Bt, S, D), lambda b, l: (b, 0, 0))]
    in_specs += [layer_spec(a) for a in weights]

    return pl.pallas_call(
        _make_gpt_blocks_kernel(num_heads),
        out_shape=jax.ShapeDtypeStruct((B, S, D), jnp.float32),
        grid=(B // Bt, L),                       # batch outer (parallel), layers inner
        in_specs=in_specs,
        out_specs=pl.BlockSpec((Bt, S, D), lambda b, l: (b, 0, 0)),
        scratch_shapes=[pltpu.VMEM((Bt, S, D), jnp.float32)],
        compiler_params=pltpu.CompilerParams(
            dimension_semantics=("parallel", "arbitrary"),
            vmem_limit_bytes=vmem),
    )(x, *weights)


def lm_head_pallas(x, w, b):
    B, S, D = x.shape
    V = w.shape[1]
    vmem = _vmem_limit_bytes()
    tv = _pick_tile_v(V, D, S, vmem)
    x_bf16 = x.astype(jnp.bfloat16)              # cast once, halves x DMA bytes

    return pl.pallas_call(
        _lm_head_kernel,
        out_shape=jax.ShapeDtypeStruct((B, S, V), jnp.float32),
        grid=(V // tv, B),                       # weight-stationary: batch is inner
        in_specs=[pl.BlockSpec((1, S, D), lambda vi, bi: (bi, 0, 0)),
                  pl.BlockSpec((D, tv), lambda vi, bi: (0, vi)),
                  pl.BlockSpec((1, tv), lambda vi, bi: (0, vi))],
        out_specs=pl.BlockSpec((1, S, tv), lambda vi, bi: (bi, 0, vi)),
        compiler_params=pltpu.CompilerParams(
            dimension_semantics=("parallel", "parallel"),
            vmem_limit_bytes=vmem),
    )(x_bf16, w, b)


# --------------------------------------------------------------------------
# Parameter init (deterministic, synthetic) + full forward
# --------------------------------------------------------------------------
def init_gpt_params(key, vocab_size, context_size, n_layer, num_heads, embed_dim):
    D = embed_dim
    ff_dim = 4 * D

    def nrm(k, shape, scale=0.02, dtype=jnp.float32):
        return (scale * jax.random.normal(k, shape)).astype(dtype)

    keys = jax.random.split(key, 7)
    params = {
        "tok_emb": nrm(keys[0], (vocab_size, D), 1.0),
        "pos_emb": nrm(keys[1], (context_size, D), 1.0),
        "lm_w": nrm(keys[2], (D, vocab_size), dtype=jnp.bfloat16),
        "lm_b": jnp.zeros((1, vocab_size), jnp.float32),
        # per-layer weights stacked with a leading L axis (fused-layer kernel)
        "ln1_w": jnp.ones((n_layer, 1, D), jnp.float32),
        "ln1_b": jnp.zeros((n_layer, 1, D), jnp.float32),
        "wqkv": nrm(keys[3], (n_layer, D, 3 * D), dtype=jnp.bfloat16),
        "bqkv": jnp.zeros((n_layer, 1, 3 * D), jnp.float32),
        "wo": nrm(keys[4], (n_layer, D, D), dtype=jnp.bfloat16),
        "bo": jnp.zeros((n_layer, 1, D), jnp.float32),
        "ln2_w": jnp.ones((n_layer, 1, D), jnp.float32),
        "ln2_b": jnp.zeros((n_layer, 1, D), jnp.float32),
        "w1": nrm(keys[5], (n_layer, D, ff_dim), dtype=jnp.bfloat16),
        "b1": jnp.zeros((n_layer, 1, ff_dim), jnp.float32),
        "w2": nrm(keys[6], (n_layer, ff_dim, D), dtype=jnp.bfloat16),
        "b2": jnp.zeros((n_layer, 1, D), jnp.float32),
    }
    return params


def gpt_forward(input_ids, params, num_heads):
    # input_ids: (B, S) int32
    B, S = input_ids.shape
    tok = jnp.take(params["tok_emb"], input_ids, axis=0)     # (B, S, D) glue gather
    pos = params["pos_emb"][:S][None, :, :]                  # (1, S, D)
    x = (tok + pos).astype(jnp.float32)
    x = gpt_blocks_pallas(x, params, num_heads)               # all layers, one kernel
    # NOTE: reference GPT.forward never applies the final self.layer_norm.
    logits = lm_head_pallas(x, params["lm_w"], params["lm_b"])
    return logits                                            # (B, S, vocab) f32


# --------------------------------------------------------------------------
if __name__ == "__main__":
    # Small but hardware-friendly shapes (D multiple of 128, S multiple of 8).
    VOCAB = 256
    CONTEXT = 32
    N_LAYER = 2
    NUM_HEADS = 4
    EMBED = 128
    B, S = 2, 16

    key = jax.random.PRNGKey(0)
    pkey, ikey = jax.random.split(key)
    params = init_gpt_params(pkey, VOCAB, CONTEXT, N_LAYER, NUM_HEADS, EMBED)

    input_ids = jax.random.randint(ikey, (B, S), 0, VOCAB, dtype=jnp.int32)

    logits = gpt_forward(input_ids, params, NUM_HEADS)
    logits = jax.block_until_ready(logits)

    assert logits.shape == (B, S, VOCAB), logits.shape
    assert logits.dtype == jnp.float32
    assert bool(jnp.all(jnp.isfinite(logits)))
    print("KERNEL_OK")
</pallas_src>

<mosaic_0001>
module attributes {stable_mosaic.version = 11 : i64} {
  func.func @kernel(%arg0: i32, %arg1: i32, %arg2: memref<2x16x128xf32, #tpu.memory_space<vmem>>, %arg3: memref<1x1x128xf32, #tpu.memory_space<vmem>>, %arg4: memref<1x1x128xf32, #tpu.memory_space<vmem>>, %arg5: memref<1x128x384xbf16, #tpu.memory_space<vmem>>, %arg6: memref<1x1x384xf32, #tpu.memory_space<vmem>>, %arg7: memref<1x128x128xbf16, #tpu.memory_space<vmem>>, %arg8: memref<1x1x128xf32, #tpu.memory_space<vmem>>, %arg9: memref<1x1x128xf32, #tpu.memory_space<vmem>>, %arg10: memref<1x1x128xf32, #tpu.memory_space<vmem>>, %arg11: memref<1x128x512xbf16, #tpu.memory_space<vmem>>, %arg12: memref<1x1x512xf32, #tpu.memory_space<vmem>>, %arg13: memref<1x512x128xbf16, #tpu.memory_space<vmem>>, %arg14: memref<1x1x128xf32, #tpu.memory_space<vmem>>, %arg15: memref<2x16x128xf32, #tpu.memory_space<vmem>>, %arg16: memref<2x16x128xf32, #tpu.memory_space<vmem>>) attributes {dimension_semantics = [#tpu.dimension_semantics<parallel>, #tpu.dimension_semantics<arbitrary>], iteration_bounds = array<i64: 1, 2>, scalar_prefetch = 0 : i64, scratch_operands = 1 : i64, tpu.core_type = #tpu.core_type<tc>, window_params = [{transform_indices = @transform_0, window_bounds = array<i64: 2, 16, 128>}, {transform_indices = @transform_1, window_bounds = array<i64: 1, 1, 128>}, {transform_indices = @transform_2, window_bounds = array<i64: 1, 1, 128>}, {transform_indices = @transform_3, window_bounds = array<i64: 1, 128, 384>}, {transform_indices = @transform_4, window_bounds = array<i64: 1, 1, 384>}, {transform_indices = @transform_5, window_bounds = array<i64: 1, 128, 128>}, {transform_indices = @transform_6, window_bounds = array<i64: 1, 1, 128>}, {transform_indices = @transform_7, window_bounds = array<i64: 1, 1, 128>}, {transform_indices = @transform_8, window_bounds = array<i64: 1, 1, 128>}, {transform_indices = @transform_9, window_bounds = array<i64: 1, 128, 512>}, {transform_indices = @transform_10, window_bounds = array<i64: 1, 1, 512>}, {transform_indices = @transform_11, window_bounds = array<i64: 1, 512, 128>}, {transform_indices = @transform_12, window_bounds = array<i64: 1, 1, 128>}, {transform_indices = @transform_13, window_bounds = array<i64: 2, 16, 128>}]} {
    %c0_i32 = arith.constant 0 : i32
    %0 = arith.cmpi eq, %arg1, %c0_i32 : i32
    %1 = arith.extui %0 : i1 to i32
    %c0_i32_0 = arith.constant 0 : i32
    %2 = arith.cmpi ne, %1, %c0_i32_0 : i32
    scf.if %2 {
      %c0_63 = arith.constant 0 : index
      %c0_64 = arith.constant 0 : index
      %c0_65 = arith.constant 0 : index
      %139 = vector.load %arg2[%c0_63, %c0_64, %c0_65] : memref<2x16x128xf32, #tpu.memory_space<vmem>>, vector<2x16x128xf32>
      %c0_66 = arith.constant 0 : index
      %c0_67 = arith.constant 0 : index
      %c0_68 = arith.constant 0 : index
      %140 = vector.load %arg16[%c0_66, %c0_67, %c0_68] : memref<2x16x128xf32, #tpu.memory_space<vmem>>, vector<2x16x128xf32>
      tpu.vector_store %arg16[%c0_66, %c0_67, %c0_68], %139 {strides = array<i32>} : memref<2x16x128xf32, #tpu.memory_space<vmem>>, vector<2x16x128xf32>,
    } else {
    }
    %c0 = arith.constant 0 : index
    %c0_1 = arith.constant 0 : index
    %c0_2 = arith.constant 0 : index
    %3 = vector.load %arg16[%c0, %c0_1, %c0_2] : memref<2x16x128xf32, #tpu.memory_space<vmem>>, vector<2x16x128xf32>
    %4 = vector.shape_cast %3 : vector<2x16x128xf32> to vector<32x128xf32>
    %c0_3 = arith.constant 0 : index
    %c0_4 = arith.constant 0 : index
    %c0_5 = arith.constant 0 : index
    %5 = vector.load %arg3[%c0_3, %c0_4, %c0_5] : memref<1x1x128xf32, #tpu.memory_space<vmem>>, vector<1x1x128xf32>
    %6 = vector.shape_cast %5 : vector<1x1x128xf32> to vector<1x128xf32>
    %c0_6 = arith.constant 0 : index
    %c0_7 = arith.constant 0 : index
    %c0_8 = arith.constant 0 : index
    %7 = vector.load %arg4[%c0_6, %c0_7, %c0_8] : memref<1x1x128xf32, #tpu.memory_space<vmem>>, vector<1x1x128xf32>
    %8 = vector.shape_cast %7 : vector<1x1x128xf32> to vector<1x128xf32>
    %cst = arith.constant dense<0.000000e+00> : vector<32xf32>
    %9 = vector.multi_reduction <add>, %4, %cst [1] : vector<32x128xf32> to vector<32xf32>
    %10 = vector.shape_cast %9 : vector<32xf32> to vector<32x1xf32>
    %cst_9 = arith.constant 1.280000e+02 : f32
    %11 = vector.broadcast %cst_9 : f32 to vector<32x1xf32>
    %12 = arith.divf %10, %11 : vector<32x1xf32>
    %13 = vector.broadcast %12 : vector<32x1xf32> to vector<32x128xf32>
    %14 = arith.subf %4, %13 : vector<32x128xf32>
    %15 = arith.mulf %14, %14 : vector<32x128xf32>
    %cst_10 = arith.constant dense<0.000000e+00> : vector<32xf32>
    %16 = vector.multi_reduction <add>, %15, %cst_10 [1] : vector<32x128xf32> to vector<32xf32>
    %17 = vector.shape_cast %16 : vector<32xf32> to vector<32x1xf32>
    %cst_11 = arith.constant 1.280000e+02 : f32
    %18 = vector.broadcast %cst_11 : f32 to vector<32x1xf32>
    %19 = arith.divf %17, %18 : vector<32x1xf32>
    %20 = vector.broadcast %12 : vector<32x1xf32> to vector<32x128xf32>
    %21 = arith.subf %4, %20 : vector<32x128xf32>
    %cst_12 = arith.constant 9.99999974E-6 : f32
    %22 = vector.broadcast %cst_12 : f32 to vector<32x1xf32>
    %23 = arith.addf %19, %22 : vector<32x1xf32>
    %24 = math.rsqrt %23 : vector<32x1xf32>
    %25 = vector.broadcast %24 : vector<32x1xf32> to vector<32x128xf32>
    %26 = arith.mulf %21, %25 : vector<32x128xf32>
    %27 = vector.broadcast %6 : vector<1x128xf32> to vector<32x128xf32>
    %28 = arith.mulf %26, %27 : vector<32x128xf32>
    %29 = vector.broadcast %8 : vector<1x128xf32> to vector<32x128xf32>
    %30 = arith.addf %28, %29 : vector<32x128xf32>
    %31 = arith.truncf %30 : vector<32x128xf32> to vector<32x128xbf16>
    %c0_13 = arith.constant 0 : index
    %c0_14 = arith.constant 0 : index
    %c0_15 = arith.constant 0 : index
    %32 = vector.load %arg5[%c0_13, %c0_14, %c0_15] : memref<1x128x384xbf16, #tpu.memory_space<vmem>>, vector<1x128x384xbf16>
    %33 = vector.shape_cast %32 : vector<1x128x384xbf16> to vector<128x384xbf16>
    %cst_16 = arith.constant dense<0.000000e+00> : vector<32x384xf32>
    %34 = tpu.matmul %31, %33, %cst_16 {dimension_numbers = #tpu.dot_dimension_numbers<[1], [0], [0], [1], [0, 0, 1, 1], [], []>} : vector<32x128xbf16>, vector<128x384xbf16>, vector<32x384xf32> -> vector<32x384xf32>
    %c0_17 = arith.constant 0 : index
    %c0_18 = arith.constant 0 : index
    %c0_19 = arith.constant 0 : index
    %35 = vector.load %arg6[%c0_17, %c0_18, %c0_19] : memref<1x1x384xf32, #tpu.memory_space<vmem>>, vector<1x1x384xf32>
    %36 = vector.shape_cast %35 : vector<1x1x384xf32> to vector<1x384xf32>
    %37 = vector.broadcast %36 : vector<1x384xf32> to vector<32x384xf32>
    %38 = arith.addf %34, %37 : vector<32x384xf32>
    %39 = vector.extract_strided_slice %38 {offsets = [0, 0], sizes = [32, 128], strides = [1, 1]} : vector<32x384xf32> to vector<32x128xf32>
    %cst_20 = arith.constant 0.176776692 : f32
    %40 = vector.broadcast %cst_20 : f32 to vector<32x128xf32>
    %41 = arith.mulf %39, %40 : vector<32x128xf32>
    %42 = arith.truncf %41 : vector<32x128xf32> to vector<32x128xbf16>
    %43 = vector.extract_strided_slice %38 {offsets = [0, 128], sizes = [32, 128], strides = [1, 1]} : vector<32x384xf32> to vector<32x128xf32>
    %44 = arith.truncf %43 : vector<32x128xf32> to vector<32x128xbf16>
    %45 = vector.extract_strided_slice %38 {offsets = [0, 256], sizes = [32, 128], strides = [1, 1]} : vector<32x384xf32> to vector<32x128xf32>
    %46 = arith.truncf %45 : vector<32x128xf32> to vector<32x128xbf16>
    %47 = vector.shape_cast %42 : vector<32x128xbf16> to vector<2x16x4x32xbf16>
    %48 = tpu.transpose %47, [0, 2, 1, 3] : vector<2x16x4x32xbf16> -> vector<2x4x16x32xbf16>
    %49 = vector.shape_cast %48 : vector<2x4x16x32xbf16> to vector<8x16x32xbf16>
    %50 = vector.shape_cast %44 : vector<32x128xbf16> to vector<2x16x4x32xbf16>
    %51 = tpu.transpose %50, [0, 2, 1, 3] : vector<2x16x4x32xbf16> -> vector<2x4x16x32xbf16>
    %52 = vector.shape_cast %51 : vector<2x4x16x32xbf16> to vector<8x16x32xbf16>
    %53 = vector.shape_cast %46 : vector<32x128xbf16> to vector<2x16x4x32xbf16>
    %54 = tpu.transpose %53, [0, 2, 1, 3] : vector<2x16x4x32xbf16> -> vector<2x4x16x32xbf16>
    %55 = vector.shape_cast %54 : vector<2x4x16x32xbf16> to vector<8x16x32xbf16>
    %56 = tpu.iota {dimensions = array<i32: 0>} : vector<16x16xi32>
    %57 = tpu.iota {dimensions = array<i32: 1>} : vector<16x16xi32>
    %58 = arith.cmpi sle, %57, %56 : vector<16x16xi32>
    %59 = vector.shape_cast %58 : vector<16x16xi1> to vector<1x16x16xi1>
    "tpu.trace_start"() <{level = 10 : i32, message = "gqd,gkd->gqk"}> : () -> ()
    %cst_21 = arith.constant dense<0.000000e+00> : vector<8x16x16xf32>
    %60 = tpu.matmul %49, %52, %cst_21 {dimension_numbers = #tpu.dot_dimension_numbers<[2], [2], [1], [1], [0, 0, 0, 1, 1, 1], [0], [0]>} : vector<8x16x32xbf16>, vector<8x16x32xbf16>, vector<8x16x16xf32> -> vector<8x16x16xf32>
    %cst_22 = arith.constant -1.000000e+30 : f32
    "tpu.trace_stop"() : () -> ()
    %61 = vector.shape_cast %59 : vector<1x16x16xi1> to vector<1x16x16xi1>
    %62 = vector.broadcast %61 : vector<1x16x16xi1> to vector<8x16x16xi1>
    %63 = vector.broadcast %cst_22 : f32 to vector<8x16x16xf32>
    %64 = arith.select %62, %60, %63 : vector<8x16x16xi1>, vector<8x16x16xf32>
    %cst_23 = arith.constant dense<0xFF800000> : vector<8x16xf32>
    %65 = vector.multi_reduction <maximumf>, %64, %cst_23 [2] : vector<8x16x16xf32> to vector<8x16xf32>
    %66 = vector.shape_cast %65 : vector<8x16xf32> to vector<8x16x1xf32>
    %67 = vector.broadcast %66 : vector<8x16x1xf32> to vector<8x16x16xf32>
    %68 = arith.subf %64, %67 : vector<8x16x16xf32>
    %69 = math.exp %68 : vector<8x16x16xf32>
    %cst_24 = arith.constant dense<0.000000e+00> : vector<8x16xf32>
    %70 = vector.multi_reduction <add>, %69, %cst_24 [2] : vector<8x16x16xf32> to vector<8x16xf32>
    %71 = vector.shape_cast %70 : vector<8x16xf32> to vector<8x16x1xf32>
    %72 = tpu.reciprocal %71 {approx = true} : vector<8x16x1xf32> -> vector<8x16x1xf32>
    %73 = vector.broadcast %72 : vector<8x16x1xf32> to vector<8x16x16xf32>
    %74 = arith.mulf %69, %73 : vector<8x16x16xf32>
    %75 = arith.truncf %74 : vector<8x16x16xf32> to vector<8x16x16xbf16>
    "tpu.trace_start"() <{level = 10 : i32, message = "gqk,gkd->gqd"}> : () -> ()
    %cst_25 = arith.constant dense<0.000000e+00> : vector<8x16x32xf32>
    %76 = tpu.matmul %75, %55, %cst_25 {dimension_numbers = #tpu.dot_dimension_numbers<[2], [1], [1], [2], [0, 0, 0, 1, 1, 2], [0], [0]>} : vector<8x16x16xbf16>, vector<8x16x32xbf16>, vector<8x16x32xf32> -> vector<8x16x32xf32>
    "tpu.trace_stop"() : () -> ()
    %77 = arith.truncf %76 : vector<8x16x32xf32> to vector<8x16x32xbf16>
    %78 = vector.shape_cast %77 : vector<8x16x32xbf16> to vector<2x4x16x32xbf16>
    %79 = tpu.transpose %78, [0, 2, 1, 3] : vector<2x4x16x32xbf16> -> vector<2x16x4x32xbf16>
    %80 = vector.shape_cast %79 : vector<2x16x4x32xbf16> to vector<32x128xbf16>
    %c0_26 = arith.constant 0 : index
    %c0_27 = arith.constant 0 : index
    %c0_28 = arith.constant 0 : index
    %81 = vector.load %arg7[%c0_26, %c0_27, %c0_28] : memref<1x128x128xbf16, #tpu.memory_space<vmem>>, vector<1x128x128xbf16>
    %82 = vector.shape_cast %81 : vector<1x128x128xbf16> to vector<128x128xbf16>
    %cst_29 = arith.constant dense<0.000000e+00> : vector<32x128xf32>
    %83 = tpu.matmul %80, %82, %cst_29 {dimension_numbers = #tpu.dot_dimension_numbers<[1], [0], [0], [1], [0, 0, 1, 1], [], []>} : vector<32x128xbf16>, vector<128x128xbf16>, vector<32x128xf32> -> vector<32x128xf32>
    %c0_30 = arith.constant 0 : index
    %c0_31 = arith.constant 0 : index
    %c0_32 = arith.constant 0 : index
    %84 = vector.load %arg8[%c0_30, %c0_31, %c0_32] : memref<1x1x128xf32, #tpu.memory_space<vmem>>, vector<1x1x128xf32>
    %85 = vector.shape_cast %84 : vector<1x1x128xf32> to vector<1x128xf32>
    %86 = vector.broadcast %85 : vector<1x128xf32> to vector<32x128xf32>
    %87 = arith.addf %83, %86 : vector<32x128xf32>
    %88 = arith.addf %4, %87 : vector<32x128xf32>
    %c0_33 = arith.constant 0 : index
    %c0_34 = arith.constant 0 : index
    %c0_35 = arith.constant 0 : index
    %89 = vector.load %arg9[%c0_33, %c0_34, %c0_35] : memref<1x1x128xf32, #tpu.memory_space<vmem>>, vector<1x1x128xf32>
    %90 = vector.shape_cast %89 : vector<1x1x128xf32> to vector<1x128xf32>
    %c0_36 = arith.constant 0 : index
    %c0_37 = arith.constant 0 : index
    %c0_38 = arith.constant 0 : index
    %91 = vector.load %arg10[%c0_36, %c0_37, %c0_38] : memref<1x1x128xf32, #tpu.memory_space<vmem>>, vector<1x1x128xf32>
    %92 = vector.shape_cast %91 : vector<1x1x128xf32> to vector<1x128xf32>
    %cst_39 = arith.constant dense<0.000000e+00> : vector<32xf32>
    %93 = vector.multi_reduction <add>, %88, %cst_39 [1] : vector<32x128xf32> to vector<32xf32>
    %94 = vector.shape_cast %93 : vector<32xf32> to vector<32x1xf32>
    %cst_40 = arith.constant 1.280000e+02 : f32
    %95 = vector.broadcast %cst_40 : f32 to vector<32x1xf32>
    %96 = arith.divf %94, %95 : vector<32x1xf32>
    %97 = vector.broadcast %96 : vector<32x1xf32> to vector<32x128xf32>
    %98 = arith.subf %88, %97 : vector<32x128xf32>
    %99 = arith.mulf %98, %98 : vector<32x128xf32>
    %cst_41 = arith.constant dense<0.000000e+00> : vector<32xf32>
    %100 = vector.multi_reduction <add>, %99, %cst_41 [1] : vector<32x128xf32> to vector<32xf32>
    %101 = vector.shape_cast %100 : vector<32xf32> to vector<32x1xf32>
    %cst_42 = arith.constant 1.280000e+02 : f32
    %102 = vector.broadcast %cst_42 : f32 to vector<32x1xf32>
    %103 = arith.divf %101, %102 : vector<32x1xf32>
    %104 = vector.broadcast %96 : vector<32x1xf32> to vector<32x128xf32>
    %105 = arith.subf %88, %104 : vector<32x128xf32>
    %cst_43 = arith.constant 9.99999974E-6 : f32
    %106 = vector.broadcast %cst_43 : f32 to vector<32x1xf32>
    %107 = arith.addf %103, %106 : vector<32x1xf32>
    %108 = math.rsqrt %107 : vector<32x1xf32>
    %109 = vector.broadcast %108 : vector<32x1xf32> to vector<32x128xf32>
    %110 = arith.mulf %105, %109 : vector<32x128xf32>
    %111 = vector.broadcast %90 : vector<1x128xf32> to vector<32x128xf32>
    %112 = arith.mulf %110, %111 : vector<32x128xf32>
    %113 = vector.broadcast %92 : vector<1x128xf32> to vector<32x128xf32>
    %114 = arith.addf %112, %113 : vector<32x128xf32>
    %115 = arith.truncf %114 : vector<32x128xf32> to vector<32x128xbf16>
    %c0_44 = arith.constant 0 : index
    %c0_45 = arith.constant 0 : index
    %c0_46 = arith.constant 0 : index
    %116 = vector.load %arg11[%c0_44, %c0_45, %c0_46] : memref<1x128x512xbf16, #tpu.memory_space<vmem>>, vector<1x128x512xbf16>
    %117 = vector.shape_cast %116 : vector<1x128x512xbf16> to vector<128x512xbf16>
    %cst_47 = arith.constant dense<0.000000e+00> : vector<32x512xf32>
    %118 = tpu.matmul %115, %117, %cst_47 {dimension_numbers = #tpu.dot_dimension_numbers<[1], [0], [0], [1], [0, 0, 1, 1], [], []>} : vector<32x128xbf16>, vector<128x512xbf16>, vector<32x512xf32> -> vector<32x512xf32>
    %c0_48 = arith.constant 0 : index
    %c0_49 = arith.constant 0 : index
    %c0_50 = arith.constant 0 : index
    %119 = vector.load %arg12[%c0_48, %c0_49, %c0_50] : memref<1x1x512xf32, #tpu.memory_space<vmem>>, vector<1x1x512xf32>
    %120 = vector.shape_cast %119 : vector<1x1x512xf32> to vector<1x512xf32>
    %121 = vector.broadcast %120 : vector<1x512xf32> to vector<32x512xf32>
    %122 = arith.addf %118, %121 : vector<32x512xf32>
    %cst_51 = arith.constant 0.000000e+00 : f32
    %123 = vector.broadcast %cst_51 : f32 to vector<32x512xf32>
    %124 = arith.maximumf %122, %123 : vector<32x512xf32>
    %125 = arith.truncf %124 : vector<32x512xf32> to vector<32x512xbf16>
    %c0_52 = arith.constant 0 : index
    %c0_53 = arith.constant 0 : index
    %c0_54 = arith.constant 0 : index
    %126 = vector.load %arg13[%c0_52, %c0_53, %c0_54] : memref<1x512x128xbf16, #tpu.memory_space<vmem>>, vector<1x512x128xbf16>
    %127 = vector.shape_cast %126 : vector<1x512x128xbf16> to vector<512x128xbf16>
    %cst_55 = arith.constant dense<0.000000e+00> : vector<32x128xf32>
    %128 = tpu.matmul %125, %127, %cst_55 {dimension_numbers = #tpu.dot_dimension_numbers<[1], [0], [0], [1], [0, 0, 1, 1], [], []>} : vector<32x512xbf16>, vector<512x128xbf16>, vector<32x128xf32> -> vector<32x128xf32>
    %c0_56 = arith.constant 0 : index
    %c0_57 = arith.constant 0 : index
    %c0_58 = arith.constant 0 : index
    %129 = vector.load %arg14[%c0_56, %c0_57, %c0_58] : memref<1x1x128xf32, #tpu.memory_space<vmem>>, vector<1x1x128xf32>
    %130 = vector.shape_cast %129 : vector<1x1x128xf32> to vector<1x128xf32>
    %131 = vector.broadcast %130 : vector<1x128xf32> to vector<32x128xf32>
    %132 = arith.addf %128, %131 : vector<32x128xf32>
    %133 = arith.addf %88, %132 : vector<32x128xf32>
    %134 = vector.shape_cast %133 : vector<32x128xf32> to vector<2x16x128xf32>
    %c0_59 = arith.constant 0 : index
    %c0_60 = arith.constant 0 : index
    %c0_61 = arith.constant 0 : index
    %135 = vector.load %arg16[%c0_59, %c0_60, %c0_61] : memref<2x16x128xf32, #tpu.memory_space<vmem>>, vector<2x16x128xf32>
    tpu.vector_store %arg16[%c0_59, %c0_60, %c0_61], %134 {strides = array<i32>} : memref<2x16x128xf32, #tpu.memory_space<vmem>>, vector<2x16x128xf32>,
    %c1_i32 = arith.constant 1 : i32
    %136 = arith.cmpi eq, %arg1, %c1_i32 : i32
    %137 = arith.extui %136 : i1 to i32
    %c0_i32_62 = arith.constant 0 : i32
    %138 = arith.cmpi ne, %137, %c0_i32_62 : i32
    scf.if %138 {
      %c0_63 = arith.constant 0 : index
      %c0_64 = arith.constant 0 : index
      %c0_65 = arith.constant 0 : index
      %139 = vector.load %arg16[%c0_63, %c0_64, %c0_65] : memref<2x16x128xf32, #tpu.memory_space<vmem>>, vector<2x16x128xf32>
      %c0_66 = arith.constant 0 : index
      %c0_67 = arith.constant 0 : index
      %c0_68 = arith.constant 0 : index
      %140 = vector.load %arg15[%c0_66, %c0_67, %c0_68] : memref<2x16x128xf32, #tpu.memory_space<vmem>>, vector<2x16x128xf32>
      tpu.vector_store %arg15[%c0_66, %c0_67, %c0_68], %139 {strides = array<i32>} : memref<2x16x128xf32, #tpu.memory_space<vmem>>, vector<2x16x128xf32>,
    } else {
    }
    return
  }
  func.func @transform_0(%arg0: i32, %arg1: i32) -> (i32, i32, i32) {
    %c0_i32 = arith.constant 0 : i32
    %c0_i32_0 = arith.constant 0 : i32
    %c0_i32_1 = arith.constant 0 : i32
    return %arg0, %c0_i32, %c0_i32_0 : i32, i32, i32
  }
  func.func @transform_1(%arg0: i32, %arg1: i32) -> (i32, i32, i32) {
    %c0_i32 = arith.constant 0 : i32
    %c0_i32_0 = arith.constant 0 : i32
    %c0_i32_1 = arith.constant 0 : i32
    return %arg1, %c0_i32, %c0_i32_0 : i32, i32, i32
  }
  func.func @transform_2(%arg0: i32, %arg1: i32) -> (i32, i32, i32) {
    %c0_i32 = arith.constant 0 : i32
    %c0_i32_0 = arith.constant 0 : i32
    %c0_i32_1 = arith.constant 0 : i32
    return %arg1, %c0_i32, %c0_i32_0 : i32, i32, i32
  }
  func.func @transform_3(%arg0: i32, %arg1: i32) -> (i32, i32, i32) {
    %c0_i32 = arith.constant 0 : i32
    %c0_i32_0 = arith.constant 0 : i32
    %c0_i32_1 = arith.constant 0 : i32
    return %arg1, %c0_i32, %c0_i32_0 : i32, i32, i32
  }
  func.func @transform_4(%arg0: i32, %arg1: i32) -> (i32, i32, i32) {
    %c0_i32 = arith.constant 0 : i32
    %c0_i32_0 = arith.constant 0 : i32
    %c0_i32_1 = arith.constant 0 : i32
    return %arg1, %c0_i32, %c0_i32_0 : i32, i32, i32
  }
  func.func @transform_5(%arg0: i32, %arg1: i32) -> (i32, i32, i32) {
    %c0_i32 = arith.constant 0 : i32
    %c0_i32_0 = arith.constant 0 : i32
    %c0_i32_1 = arith.constant 0 : i32
    return %arg1, %c0_i32, %c0_i32_0 : i32, i32, i32
  }
  func.func @transform_6(%arg0: i32, %arg1: i32) -> (i32, i32, i32) {
    %c0_i32 = arith.constant 0 : i32
    %c0_i32_0 = arith.constant 0 : i32
    %c0_i32_1 = arith.constant 0 : i32
    return %arg1, %c0_i32, %c0_i32_0 : i32, i32, i32
  }
  func.func @transform_7(%arg0: i32, %arg1: i32) -> (i32, i32, i32) {
    %c0_i32 = arith.constant 0 : i32
    %c0_i32_0 = arith.constant 0 : i32
    %c0_i32_1 = arith.constant 0 : i32
    return %arg1, %c0_i32, %c0_i32_0 : i32, i32, i32
  }
  func.func @transform_8(%arg0: i32, %arg1: i32) -> (i32, i32, i32) {
    %c0_i32 = arith.constant 0 : i32
    %c0_i32_0 = arith.constant 0 : i32
    %c0_i32_1 = arith.constant 0 : i32
    return %arg1, %c0_i32, %c0_i32_0 : i32, i32, i32
  }
  func.func @transform_9(%arg0: i32, %arg1: i32) -> (i32, i32, i32) {
    %c0_i32 = arith.constant 0 : i32
    %c0_i32_0 = arith.constant 0 : i32
    %c0_i32_1 = arith.constant 0 : i32
    return %arg1, %c0_i32, %c0_i32_0 : i32, i32, i32
  }
  func.func @transform_10(%arg0: i32, %arg1: i32) -> (i32, i32, i32) {
    %c0_i32 = arith.constant 0 : i32
    %c0_i32_0 = arith.constant 0 : i32
    %c0_i32_1 = arith.constant 0 : i32
    return %arg1, %c0_i32, %c0_i32_0 : i32, i32, i32
  }
  func.func @transform_11(%arg0: i32, %arg1: i32) -> (i32, i32, i32) {
    %c0_i32 = arith.constant 0 : i32
    %c0_i32_0 = arith.constant 0 : i32
    %c0_i32_1 = arith.constant 0 : i32
    return %arg1, %c0_i32, %c0_i32_0 : i32, i32, i32
  }
  func.func @transform_12(%arg0: i32, %arg1: i32) -> (i32, i32, i32) {
    %c0_i32 = arith.constant 0 : i32
    %c0_i32_0 = arith.constant 0 : i32
    %c0_i32_1 = arith.constant 0 : i32
    return %arg1, %c0_i32, %c0_i32_0 : i32, i32, i32
  }
  func.func @transform_13(%arg0: i32, %arg1: i32) -> (i32, i32, i32) {
    %c0_i32 = arith.constant 0 : i32
    %c0_i32_0 = arith.constant 0 : i32
    %c0_i32_1 = arith.constant 0 : i32
    return %arg0, %c0_i32, %c0_i32_0 : i32, i32, i32
  }
}

</mosaic_0001>

<bundles_post_ra>
// kernel: tpu_custom_call.1
= control target key start
LH: loop header
LB: loop body
LE: loop exit
PB: predicated region body
PF: predicated region fallthrough
CT: control target
= control target key end

     0   :  { %s8494_s0 = inlined_call_operand.hbm [shape: f32[2,16,128], index: 0, kind: input, shape index: {}]   ;;  %s8495_s1 = inlined_call_operand.hbm [shape: f32[2,1,128], index: 1, kind: input, shape index: {}]   ;;  %s8496_s2 = inlined_call_operand.hbm [shape: f32[2,1,128], index: 2, kind: input, shape index: {}]   ;;  %s8497_s3 = inlined_call_operand.hbm [shape: bf16[2,128,384], index: 3, kind: input, shape index: {}]   ;;  %s8498_s4 = inlined_call_operand.hbm [shape: f32[2,1,384], index: 4, kind: input, shape index: {}]   ;;  %s8499_s5 = inlined_call_operand.hbm [shape: bf16[2,128,128], index: 5, kind: input, shape index: {}]   ;;  %s8500_s6 = inlined_call_operand.hbm [shape: f32[2,1,128], index: 6, kind: input, shape index: {}]   ;;  %s8501_s7 = inlined_call_operand.hbm [shape: f32[2,1,128], index: 7, kind: input, shape index: {}]   ;;  %s8502_s8 = inlined_call_operand.hbm [shape: f32[2,1,128], index: 8, kind: input, shape index: {}]   ;;  %s8503_s9 = inlined_call_operand.hbm [shape: bf16[2,128,512], index: 9, kind: input, shape index: {}]   ;;  %s8504_s10 = inlined_call_operand.hbm [shape: f32[2,1,512], index: 10, kind: input, shape index: {}]   ;;  %s8505_s11 = inlined_call_operand.hbm [shape: bf16[2,512,128], index: 11, kind: input, shape index: {}]   ;;  %s8506_s12 = inlined_call_operand.hbm [shape: f32[2,1,128], index: 12, kind: input, shape index: {}]   ;;  %s8507_s13 = inlined_call_operand.hbm [shape: f32[2,16,128], index: 13, kind: output, shape index: {}]  }
   0x1   :  { %8530 = sst [smem:[#allocation37_spill]] %s8494_s0 }
   0x2   :  { %8531 = sst [smem:[#allocation38_spill]] %s8495_s1 }
   0x3   :  { %8532 = sst [smem:[#allocation39_spill]] %s8497_s3 }
   0x4   :  { %8533 = sst [smem:[#allocation40_spill]] %s8499_s5 }
   0x5   :  { %8534 = sst [smem:[#allocation41_spill]] %s8501_s7 }
   0x6   :  { %8535 = sst [smem:[#allocation42_spill]] %s8502_s8 }
   0x7   :  { %8536 = sst [smem:[#allocation43_spill]] %s8504_s10 }
   0x8   :  { %8537 = sst [smem:[#allocation44_spill]] %s8506_s12 }
   0x9   :  { %8538 = sst [smem:[#allocation45_spill]] %s8507_s13 }
   0xa   :  { %18 = vsyncpa [#allocation4], 0 }
   0xb   :  { %19 = vsyncpa [#allocation7], 0 }
   0xc   :  { %21 = vsyncpa [#allocation7 + $0x1], 0 }
   0xd   :  { %22 = vsyncpa [#allocation10], 0 }
   0xe   :  { %24 = vsyncpa [#allocation10 + $0x1], 0 }
   0xf   :  { %25 = vsyncpa [#allocation13], 0 }
  0x10   :  { %27 = vsyncpa [#allocation13 + $0x1], 0 }
  0x11   :  { %28 = vsyncpa [#allocation16], 0 }
  0x12   :  { %30 = vsyncpa [#allocation16 + $0x1], 0 }
  0x13   :  { %31 = vsyncpa [#allocation19], 0 }
  0x14   :  { %33 = vsyncpa [#allocation19 + $0x1], 0 }
  0x15   :  { %34 = vsyncpa [#allocation22], 0 }
  0x16   :  { %36 = vsyncpa [#allocation22 + $0x1], 0 }
  0x17   :  { %37 = vsyncpa [#allocation5], 0  ;;  %s6970_s25 = smov 0   ;;  %s6972_s26 = smov 0  }
  0x18   :  { %s6974_s27 = smov 0   ;;  %s6976_s28 = smov 0  }
  0x19   :  { %s6978_s29 = smov 0   ;;  %s6980_s30 = smov 0  }
  0x1a LB: > { %8539 = sst [smem:[#allocation33_spill]] %s6854_s27  ;;  %s52_s14 = sadd.s32 1, %s6862_s29  ;;  %s6866_s30 = sphi %s6980_s30, %s43_s30   ;;  %s6862_s29 = sphi %s6978_s29, %s8593_s29   ;;  %s6858_s28 = sphi %s6976_s28, %s8592_s28   ;;  %s6854_s27 = sphi %s6974_s27, %s8588_s27   ;;  %s6850_s26 = sphi %s6972_s26, %s8591_s26   ;;  %s6846_s25 = sphi %s6970_s25, %s8590_s25  }
  0x1b   : > { %8540 = sst [smem:[#allocation34_spill]] %s6858_s28  ;;  %s88_s15 = sadd.s32 1, %s6854_s27 }
  0x1c   : > { %p53_p0 = scmp.ge.s32.totalorder %s52_s14, 2  ;;  %p95_p1 = scmp.ne.s32.totalorder %s6854_s27, %s6850_s26 }
  0x1d   : > { %p96_p2 = scmp.eq.s32.totalorder %s6866_s30, 0  ;;  %p6098_p4 = scmp.lt.s32.totalorder %s6866_s30, 2 }
  0x1e   : > { %s8595_s14 = smov (%p53_p0, %s52_s14), 0  ;;  %s7011_s17 = sand.u32 1, %s6866_s30  }
  0x1f   : > { %8541 = sst [smem:[#allocation35_spill]] %s8595_s14  ;;  %p97_p3 = por %p96_p2, %p95_p1 }
  0x20   : > { %s85_s16 = ssub.s32 %s6862_s29, %s8595_s14  ;;  %s7014_s18 = sand.u32 1, %s6854_s27  }
  0x21   : > { %p86_p5 = scmp.eq.s32.totalorder %s85_s16, 0  ;;  %s7017_s19 = sshll.u32 %s6862_s29, 4 }
  0x22   : > { %s8543_s1 = sld [smem:[#allocation38_spill]]  ;;  %s457_s24 = scalar_lea.vmem [#allocation6], %s7014_s18 }
  0x23   : > { %s7020_s20 = scalar_select %p86_p5, %s6854_s27, %s88_s15  }
  0x24   : > { %s464_s16 = sshll.u32 %s457_s24, 4  ;;  %p7029_p6 = pnand %p6098_p4, %p97_p3  ;;  %s7033_s16 = int_to_ptr.vmem [resolvable:$true] %s464_s16 }
  0x25   : > { %8542 = sst [smem:[#allocation36_spill]] %s7020_s20  ;;  %s8513_s20 = scalar_lea.sflag [#allocation7], %s7011_s17 }
  0x26   : > { %s8544_s14 = scalar_select %p7029_p6, 1, 0 }
  0x27   : > { %p7041_p8 = pneg %p7029_p6 }
  0x28   : > { %s7026_s23 = scalar_lea.hbm %s8543_s1, %s7017_s19  ;;  %s6379_s13 = scalar_lea.hbm %s8543_s1, 32 }
  0x29   : > { %s6374_s27 = scalar_lea.hbm %s7026_s23, 16  ;;  %p6380_p11 = scmp.lt.u32.totalorder %s7026_s23, %s8543_s1 }
  0x2a   : > { %p6375_p7 = scmp.ne.s32.totalorder %s7026_s23, %s6374_s27  ;;  %p6381_p12 = scmp.lt.u32.totalorder %s6379_s13, %s6374_s27 }
  0x2b   : > { %s8545_s21 = scalar_select %p7041_p8, 1, 0 }
  0x2c   : > { %p6377_p9 = pnand %p7041_p8, %p6375_p7  ;;  %p6382_p13 = por %p6381_p12, %p6380_p11 }
  0x2d   : > { %p6383_p0 = scmp.lt.u32.totalorder %s6374_s27, %s7026_s23 }
  0x2e   : > { %p6378_p10 = pneg %p6377_p9 }
  0x2f   : > { %p6384_p1 = por %p6383_p0, %p6382_p13 }
  0x31   : > { %p6385_p2 = pnand %p6384_p1, %p6378_p10 }
  0x33   : > { %6388 = shalt.err (!%p6385_p2)
}
  0x34   : > { %s6389_s15 = scalar_lea.vmem %s7033_s16, 16  ;;  %s6868_s22 = smov [#allocation6]  }
  0x35   : > { %p6390_p3 = scmp.ne.s32.totalorder %s7033_s16, %s6389_s15  ;;  %s6394_s24 = sshll.u32 %s6868_s22, 4  ;;  %s6395_s24 = int_to_ptr.vmem [resolvable:$false] %s6394_s24 }
  0x36   : > { %s6396_s12 = scalar_lea.vmem %s6395_s24, 32  ;;  %p6397_p7 = scmp.lt.s32.totalorder %s7033_s16, %s6395_s24 }
  0x37   : > { %p6392_p4 = pnand %p6390_p3, %p7041_p8  ;;  %p6398_p9 = scmp.lt.s32.totalorder %s6396_s12, %s6389_s15 }
  0x39   : > { %p6393_p5 = pneg %p6392_p4  ;;  %p6399_p11 = por %p6398_p9, %p6397_p7 }
  0x3b   : > { %p6400_p12 = pnand %p6399_p11, %p6393_p5 }
  0x3d   : > { %6403 = shalt.err (!%p6400_p12)
}
  0x3e   : > { %6063 = dma.hbm_to_vmem [thread:$0]  (!%p7029_p6), %s7026_s23, 16, %s7033_s16, %s8513_s20  }
  0x3f   : > { %s6019_s13 = smul.u32 3072, %s6862_s29  ;;  %s8547_s3 = sld [smem:[#allocation39_spill]] }
  0x40   : > { %s8546_s27 = smul.u32 192, %s7014_s18  ;;  %s8516_s1 = scalar_lea.sflag [#allocation10], %s7011_s17 }
  0x42   : > { %s492_s28 = scalar_lea.vmem [#allocation9], %s8546_s27 }
  0x43   : > { %s499_s22 = sshll.u32 %s492_s28, 4  ;;  %s7074_s22 = int_to_ptr.vmem [resolvable:$true] %s499_s22 }
  0x45   : > { %s7072_s12 = scalar_lea.hbm %s8547_s3, %s6019_s13  ;;  %s6409_s27 = scalar_lea.hbm %s8547_s3, 6144 }
  0x46   : > { %s6404_s10 = scalar_lea.hbm %s7072_s12, 3072  ;;  %p6410_p1 = scmp.lt.u32.totalorder %s7072_s12, %s8547_s3 }
  0x47   : > { %p6405_p10 = scmp.ne.s32.totalorder %s7072_s12, %s6404_s10  ;;  %p6411_p2 = scmp.lt.u32.totalorder %s6409_s27, %s6404_s10 }
  0x48   : > { %p6413_p4 = scmp.lt.u32.totalorder %s6404_s10, %s7072_s12 }
  0x49   : > { %p6407_p13 = pnand %p6405_p10, %p7041_p8  ;;  %p6412_p3 = por %p6411_p2, %p6410_p1 }
  0x4b   : > { %p6408_p0 = pneg %p6407_p13  ;;  %p6414_p5 = por %p6413_p4, %p6412_p3 }
  0x4d   : > { %p6415_p7 = pnand %p6414_p5, %p6408_p0 }
  0x4f   : > { %6418 = shalt.err (!%p6415_p7)
}
  0x50   : > { %s6419_s13 = scalar_lea.vmem %s7074_s22, 3072  ;;  %s6869_s15 = smov [#allocation9]  }
  0x51   : > { %p6420_p9 = scmp.ne.s32.totalorder %s7074_s22, %s6419_s13  ;;  %s6424_s23 = sshll.u32 %s6869_s15, 4  ;;  %s6425_s23 = int_to_ptr.vmem [resolvable:$false] %s6424_s23 }
  0x52   : > { %s6426_s16 = scalar_lea.vmem %s6425_s23, 6144  ;;  %p6427_p10 = scmp.lt.s32.totalorder %s7074_s22, %s6425_s23 }
  0x53   : > { %p6422_p11 = pnand %p6420_p9, %p7041_p8  ;;  %p6428_p13 = scmp.lt.s32.totalorder %s6426_s16, %s6419_s13 }
  0x55   : > { %p6423_p12 = pneg %p6422_p11  ;;  %p6429_p1 = por %p6428_p13, %p6427_p10 }
  0x57   : > { %p6430_p2 = pnand %p6429_p1, %p6423_p12 }
  0x59   : > { %6433 = shalt.err (!%p6430_p2)
}
  0x5a   : > { %s6870_s10 = smov 192   ;;  %s6871_s27 = smov 12  }
  0x5b   : > { %6069 = dma.hbm_to_vmem [thread:$0]  (!%p7029_p6), %s7072_s12, 3072, %s7074_s22, %s8516_s1, %s6870_s10, %s6870_s10, %s6871_s27  }
  0x5c   : > { %s5592_s28 = sshll.u32 %s7014_s18, 6  ;;  %s5770_s24 = sshll.u32 %s6862_s29, 10 }
  0x5d   : > { %s8548_s5 = sld [smem:[#allocation40_spill]]  ;;  %s532_s16 = scalar_lea.vmem [#allocation12], %s5592_s28 }
  0x5e   : > { %s539_s20 = sshll.u32 %s532_s16, 4  ;;  %s8515_s3 = scalar_lea.sflag [#allocation13], %s7011_s17  ;;  %s7107_s20 = int_to_ptr.vmem [resolvable:$true] %s539_s20 }
  0x63   : > { %s7105_s23 = scalar_lea.hbm %s8548_s5, %s5770_s24  ;;  %s6439_s10 = scalar_lea.hbm %s8548_s5, 2048 }
  0x64   : > { %s6434_s8 = scalar_lea.hbm %s7105_s23, 1024  ;;  %p6440_p5 = scmp.lt.u32.totalorder %s7105_s23, %s8548_s5 }
  0x65   : > { %p6435_p0 = scmp.ne.s32.totalorder %s7105_s23, %s6434_s8  ;;  %p6441_p7 = scmp.lt.u32.totalorder %s6439_s10, %s6434_s8 }
  0x66   : > { %p6443_p11 = scmp.lt.u32.totalorder %s6434_s8, %s7105_s23 }
  0x67   : > { %p6437_p3 = pnand %p6435_p0, %p7041_p8  ;;  %p6442_p9 = por %p6441_p7, %p6440_p5 }
  0x69   : > { %p6438_p4 = pneg %p6437_p3  ;;  %p6444_p12 = por %p6443_p11, %p6442_p9 }
  0x6b   : > { %p6445_p10 = pnand %p6444_p12, %p6438_p4 }
  0x6d   : > { %6448 = shalt.err (!%p6445_p10)
}
  0x6e   : > { %s6449_s28 = scalar_lea.vmem %s7107_s20, 1024  ;;  %s6872_s15 = smov [#allocation12]  }
  0x6f   : > { %p6450_p13 = scmp.ne.s32.totalorder %s7107_s20, %s6449_s28  ;;  %s6454_s13 = sshll.u32 %s6872_s15, 4  ;;  %s6455_s13 = int_to_ptr.vmem [resolvable:$false] %s6454_s13 }
  0x70   : > { %s6456_s16 = scalar_lea.vmem %s6455_s13, 2048  ;;  %p6457_p0 = scmp.lt.s32.totalorder %s7107_s20, %s6455_s13 }
  0x71   : > { %p6452_p1 = pnand %p6450_p13, %p7041_p8  ;;  %p6458_p3 = scmp.lt.s32.totalorder %s6456_s16, %s6449_s28 }
  0x73   : > { %p6453_p2 = pneg %p6452_p1  ;;  %p6459_p5 = por %p6458_p3, %p6457_p0 }
  0x75   : > { %p6460_p7 = pnand %p6459_p5, %p6453_p2 }
  0x77   : > { %6463 = shalt.err (!%p6460_p7)
}
  0x78   : > { %s8520_s8 = smov 64   ;;  %s8521_s22 = smov 4  }
  0x79   : > { %6075 = dma.hbm_to_vmem [thread:$0]  (!%p7029_p6), %s7105_s23, 1024, %s7107_s20, %s8515_s3, %s8520_s8, %s8520_s8, %s8521_s22  }
  0x7a   : > { %s8549_s7 = sld [smem:[#allocation41_spill]]  ;;  %s569_s24 = scalar_lea.vmem [#allocation15], %s7014_s18 }
  0x7b   : > { %s576_s28 = sshll.u32 %s569_s24, 4  ;;  %s8519_s15 = scalar_lea.sflag [#allocation16], %s7011_s17  ;;  %s577_s28 = int_to_ptr.vmem [resolvable:$true] %s576_s28 }
  0x80   : > { %s7140_s27 = scalar_lea.hbm %s8549_s7, %s7017_s19  ;;  %s6469_s23 = scalar_lea.hbm %s8549_s7, 32 }
  0x81   : > { %s6464_s13 = scalar_lea.hbm %s7140_s27, 16  ;;  %p6470_p12 = scmp.lt.u32.totalorder %s7140_s27, %s8549_s7 }
  0x82   : > { %p6465_p4 = scmp.ne.s32.totalorder %s7140_s27, %s6464_s13  ;;  %p6471_p10 = scmp.lt.u32.totalorder %s6469_s23, %s6464_s13 }
  0x83   : > { %p6473_p1 = scmp.lt.u32.totalorder %s6464_s13, %s7140_s27 }
  0x84   : > { %p6467_p9 = pnand %p6465_p4, %p7041_p8  ;;  %p6472_p13 = por %p6471_p10, %p6470_p12 }
  0x86   : > { %p6468_p11 = pneg %p6467_p9  ;;  %p6474_p2 = por %p6473_p1, %p6472_p13 }
  0x88   : > { %p6475_p0 = pnand %p6474_p2, %p6468_p11 }
  0x8a   : > { %6478 = shalt.err (!%p6475_p0)
}
  0x8b   : > { %s6479_s24 = scalar_lea.vmem %s577_s28, 16  ;;  %s6875_s3 = smov [#allocation15]  }
  0x8c   : > { %p6480_p3 = scmp.ne.s32.totalorder %s577_s28, %s6479_s24  ;;  %s6484_s1 = sshll.u32 %s6875_s3, 4  ;;  %s6485_s1 = int_to_ptr.vmem [resolvable:$false] %s6484_s1 }
  0x8d   : > { %s6486_s16 = scalar_lea.vmem %s6485_s1, 32  ;;  %p6487_p4 = scmp.lt.s32.totalorder %s577_s28, %s6485_s1 }
  0x8e   : > { %p6482_p5 = pnand %p6480_p3, %p7041_p8  ;;  %p6488_p9 = scmp.lt.s32.totalorder %s6486_s16, %s6479_s24 }
  0x90   : > { %p6483_p7 = pneg %p6482_p5  ;;  %p6489_p6 = por %p6488_p9, %p6487_p4 }
  0x92   : > { %p6490_p10 = pnand %p6489_p6, %p6483_p7 }
  0x94   : > { %6493 = shalt.err (!%p6490_p10)
}
  0x95   : > { %p8550_p12 = scmp.ne.s32.totalorder %s8544_s14, 0  ;;  %s5598_s3 = sshll.u32 %s7014_s18, 8 }
  0x96   : > { %s5771_s13 = sshll.u32 %s6862_s29, 12  ;;  %s604_s12 = scalar_lea.vmem [#allocation18], %s5598_s3 }
  0x97   : > { %6081 = dma.hbm_to_vmem [thread:$0]  (!%p8550_p12), %s7140_s27, 16, %s577_s28, %s8519_s15  }
  0x98   : > { %s7170_s23 = scalar_lea.hbm %s8503_s9, %s5771_s13  ;;  %s611_s10 = sshll.u32 %s604_s12, 4  ;;  %s7174_s10 = int_to_ptr.vmem [resolvable:$true] %s611_s10 }
  0x99   : > { %s8523_s24 = scalar_lea.sflag [#allocation19], %s7011_s17  ;;  %s6494_s16 = scalar_lea.hbm %s7170_s23, 4096 }
  0x9a   : > { %p6495_p6 = scmp.ne.s32.totalorder %s7170_s23, %s6494_s16  ;;  %s6499_s1 = scalar_lea.hbm %s8503_s9, 8192 }
  0x9b   : > { %p6500_p1 = scmp.lt.u32.totalorder %s7170_s23, %s8503_s9  ;;  %p6501_p2 = scmp.lt.u32.totalorder %s6499_s1, %s6494_s16 }
  0x9c   : > { %p6497_p11 = pnand %p6495_p6, %p7041_p8  ;;  %p6503_p3 = scmp.lt.u32.totalorder %s6494_s16, %s7170_s23 }
  0x9d   : > { %p6502_p0 = por %p6501_p2, %p6500_p1 }
  0x9e   : > { %p6498_p13 = pneg %p6497_p11 }
  0x9f   : > { %p6504_p5 = por %p6503_p3, %p6502_p0 }
  0xa1   : > { %p6505_p7 = pnand %p6504_p5, %p6498_p13 }
  0xa3   : > { %6508 = shalt.err (!%p6505_p7)
}
  0xa4   : > { %s6509_s12 = scalar_lea.vmem %s7174_s10, 4096  ;;  %s6876_s27 = smov [#allocation18]  }
  0xa5   : > { %p6510_p4 = scmp.ne.s32.totalorder %s7174_s10, %s6509_s12  ;;  %s6514_s28 = sshll.u32 %s6876_s27, 4  ;;  %s6515_s28 = int_to_ptr.vmem [resolvable:$false] %s6514_s28 }
  0xa6   : > { %s6516_s15 = scalar_lea.vmem %s6515_s28, 8192  ;;  %p6517_p6 = scmp.lt.s32.totalorder %s7174_s10, %s6515_s28 }
  0xa7   : > { %p6512_p9 = pnand %p6510_p4, %p7041_p8  ;;  %p6518_p11 = scmp.lt.s32.totalorder %s6516_s15, %s6509_s12 }
  0xa9   : > { %p6513_p10 = pneg %p6512_p9  ;;  %p6519_p1 = por %p6518_p11, %p6517_p6 }
  0xab   : > { %p6520_p2 = pnand %p6519_p1, %p6513_p10 }
  0xad   : > { %6523 = shalt.err (!%p6520_p2)
}
  0xae   : > { %s6877_s16 = smov 256   ;;  %s6878_s1 = smov 16  }
  0xaf   : > { %6087 = dma.hbm_to_vmem [thread:$0]  (!%p8550_p12), %s7170_s23, 4096, %s7174_s10, %s8523_s24, %s6877_s16, %s6877_s16, %s6878_s1  }
  0xb0   : > { %s7205_s12 = scalar_lea.hbm %s8505_s11, %s5771_s13  ;;  %s644_s28 = scalar_lea.vmem [#allocation21], %s5598_s3 }
  0xb1   : > { %s651_s15 = sshll.u32 %s644_s28, 4  ;;  %s8522_s8 = scalar_lea.sflag [#allocation22], %s7011_s17  ;;  %s7209_s15 = int_to_ptr.vmem [resolvable:$true] %s651_s15 }
  0xb2   : > { %s6524_s22 = scalar_lea.hbm %s7205_s12, 4096  ;;  %s6529_s13 = scalar_lea.hbm %s8505_s11, 8192 }
  0xb3   : > { %p6525_p13 = scmp.ne.s32.totalorder %s7205_s12, %s6524_s22  ;;  %p6530_p5 = scmp.lt.u32.totalorder %s7205_s12, %s8505_s11 }
  0xb4   : > { %p6531_p7 = scmp.lt.u32.totalorder %s6529_s13, %s6524_s22  ;;  %p6533_p9 = scmp.lt.u32.totalorder %s6524_s22, %s7205_s12 }
  0xb5   : > { %p6527_p0 = pnand %p6525_p13, %p7041_p8 }
  0xb6   : > { %p6532_p4 = por %p6531_p7, %p6530_p5 }
  0xb7   : > { %p6528_p3 = pneg %p6527_p0 }
  0xb8   : > { %p6534_p10 = por %p6533_p9, %p6532_p4 }
  0xba   : > { %p6535_p6 = pnand %p6534_p10, %p6528_p3 }
  0xbc   : > { %6538 = shalt.err (!%p6535_p6)
}
  0xbd   : > { %s6539_s3 = scalar_lea.vmem %s7209_s15, 4096  ;;  %s6879_s20 = smov [#allocation21]  }
  0xbe   : > { %p6540_p11 = scmp.ne.s32.totalorder %s7209_s15, %s6539_s3  ;;  %s6544_s27 = sshll.u32 %s6879_s20, 4  ;;  %s6545_s27 = int_to_ptr.vmem [resolvable:$false] %s6544_s27 }
  0xbf   : > { %s6546_s28 = scalar_lea.vmem %s6545_s27, 8192  ;;  %p6547_p13 = scmp.lt.s32.totalorder %s7209_s15, %s6545_s27 }
  0xc0   : > { %p6542_p1 = pnand %p6540_p11, %p7041_p8  ;;  %p6548_p0 = scmp.lt.s32.totalorder %s6546_s28, %s6539_s3 }
  0xc2   : > { %p6543_p2 = pneg %p6542_p1  ;;  %p6549_p5 = por %p6548_p0, %p6547_p13 }
  0xc4   : > { %p6550_p7 = pnand %p6549_p5, %p6543_p2 }
  0xc6   : > { %6553 = shalt.err (!%p6550_p7)
}
  0xc7   : > { %s8551_s22 = smov 4   ;;  %s8552_s23 = smov 64  }
  0xc8   : > { %6093 = dma.hbm_to_vmem [thread:$0]  (!%p8550_p12), %s7205_s12, 4096, %s7209_s15, %s8522_s8, %s8552_s23, %s8552_s23, %s8551_s22  }
  0xc9   : > { %s7239_s10 = sadd.s32 4294967295, %s6866_s30   ;;  %p101_p3 = scmp.ne.s32.totalorder %s6850_s26, %s6846_s25 }
  0xca   : > { %p8524_p4 = scmp.eq.s32.totalorder %s7239_s10, 0  ;;  %p5585_p9 = scmp.ge.s32.totalorder %s6866_s30, 1 }
  0xcb   : > { %p424_p10 = scmp.lt.s32.totalorder %s6866_s30, 3  ;;  %s6880_s12 = smov [#allocation3]  }
  0xcc   : > { %p7248_p6 = por %p8524_p4, %p101_p3  ;;  %s440_s15 = sshll.u32 %s6880_s12, 4  ;;  %s7258_s15 = int_to_ptr.vmem [resolvable:$true] %s440_s15 }
  0xcd   : > { %p7252_p11 = pnand %p5585_p9, %p424_p10  ;;  %s7270_s20 = scalar_lea.hbm %s8496_s2, %s7017_s19 }
  0xce   : > { %s8553_s13 = scalar_select %p7248_p6, 1, 0 }
  0xcf   : > { %s8554_s16 = scalar_select %p7252_p11, 1, 0 }
  0xd0   : > { %p6056_p1 = pneg %p7252_p11  ;;  %s474_s27 = scalar_lea.vmem [#allocation8], %s7014_s18 }
  0xd1   : > { %s481_s28 = sshll.u32 %s474_s27, 4  ;;  %s8556_s0 = sld [smem:[#allocation37_spill]]  ;;  %s7274_s28 = int_to_ptr.vmem [resolvable:$true] %s481_s28 }
  0xd2   : > { %p7262_p2 = pnand %p6056_p1, %p8524_p4 }
  0xd4   : > { %p6556_p0 = pneg %p7262_p2 }
  0xd7   : > { %s6554_s8 = scalar_lea.hbm %s8556_s0, 512 }
  0xd8   : > { %p6555_p13 = scmp.ne.s32.totalorder %s8556_s0, %s6554_s8  ;;  %p6561_p3 = scmp.lt.u32.totalorder %s6554_s8, %s8556_s0 }
  0xda   : > { %p6557_p5 = pnand %p6556_p0, %p6555_p13 }
  0xdc   : > { %p6558_p7 = pneg %p6557_p5 }
  0xde   : > { %p6563_p9 = pnand %p6561_p3, %p6558_p7 }
  0xe0   : > { %6566 = shalt.err (!%p6563_p9)
}
  0xe1   : > { %s6567_s27 = scalar_lea.vmem %s7258_s15, 512  ;;  %p6575_p6 = scmp.lt.s32.totalorder %s7258_s15, %s7258_s15 }
  0xe2   : > { %p6568_p10 = scmp.ne.s32.totalorder %s7258_s15, %s6567_s27  ;;  %p6576_p11 = scmp.lt.s32.totalorder %s6567_s27, %s6567_s27 }
  0xe4   : > { %p6570_p1 = pnand %p6568_p10, %p6556_p0  ;;  %p6577_p12 = por %p6576_p11, %p6575_p6 }
  0xe6   : > { %p6571_p4 = pneg %p6570_p1 }
  0xe8   : > { %p6578_p8 = pnand %p6577_p12, %p6571_p4 }
  0xea   : > { %6581 = shalt.err (!%p6578_p8)
}
  0xeb   : > { %s6881_s5 = smov 128   ;;  %s6882_s8 = smov 8  }
  0xec   : > { %6059 = dma.hbm_to_vmem [thread:$0]  (!%p7262_p2), %s8556_s0, 512, %s7258_s15, [#allocation4], %s6881_s5, %s6881_s5, %s6882_s8  }
  0xed   : > { %s6582_s12 = scalar_lea.hbm %s7270_s20, 16  ;;  %p8557_p0 = scmp.ne.s32.totalorder %s8545_s21, 0 }
  0xee   : > { %p6583_p13 = scmp.ne.s32.totalorder %s7270_s20, %s6582_s12  ;;  %s6587_s27 = scalar_lea.hbm %s8496_s2, 32 }
  0xef   : > { %p6588_p8 = scmp.lt.u32.totalorder %s7270_s20, %s8496_s2  ;;  %p6589_p4 = scmp.lt.u32.totalorder %s6587_s27, %s6582_s12 }
  0xf0   : > { %p6585_p6 = pnand %p6583_p13, %p8557_p0  ;;  %p6591_p5 = scmp.lt.u32.totalorder %s6582_s12, %s7270_s20 }
  0xf1   : > { %p6590_p11 = por %p6589_p4, %p6588_p8 }
  0xf2   : > { %p6586_p12 = pneg %p6585_p6 }
  0xf3   : > { %p6592_p7 = por %p6591_p5, %p6590_p11 }
  0xf5   : > { %p6593_p3 = pnand %p6592_p7, %p6586_p12 }
  0xf7   : > { %6596 = shalt.err (!%p6593_p3)
}
  0xf8   : > { %s6597_s15 = scalar_lea.vmem %s7274_s28, 16  ;;  %s6883_s25 = smov [#allocation8]  }
  0xf9   : > { %p6598_p2 = scmp.ne.s32.totalorder %s7274_s28, %s6597_s15  ;;  %s6602_s5 = sshll.u32 %s6883_s25, 4  ;;  %s6603_s5 = int_to_ptr.vmem [resolvable:$false] %s6602_s5 }
  0xfa   : > { %s6604_s7 = scalar_lea.vmem %s6603_s5, 32  ;;  %p6605_p1 = scmp.lt.s32.totalorder %s7274_s28, %s6603_s5 }
  0xfb   : > { %p6600_p9 = pnand %p6598_p2, %p8557_p0  ;;  %p6606_p13 = scmp.lt.s32.totalorder %s6604_s7, %s6597_s15 }
  0xfd   : > { %p6601_p10 = pneg %p6600_p9  ;;  %p6607_p6 = por %p6606_p13, %p6605_p1 }
  0xff   : > { %p6608_p8 = pnand %p6607_p6, %p6601_p10 }
 0x101   : > { %6611 = shalt.err (!%p6608_p8)
}
 0x102   : > { %p8558_p12 = scmp.ne.s32.totalorder %s8544_s14, 0  ;;  %s8559_s22 = scalar_lea.sflag [#allocation7], %s7011_s17 }
 0x103   : > { %s6021_s8 = smul.u32 48, %s6862_s29  ;;  %s6617_s7 = scalar_lea.hbm %s8498_s4, 96 }
 0x104   : > { %6066 = dma.hbm_to_vmem [thread:$0]  (!%p8558_p12), %s7270_s20, 16, %s7274_s28, %s8559_s22  }
 0x105   : > { %s8560_s24 = smul.u32 3, %s7014_s18  ;;  %s519_s27 = scalar_lea.hbm %s8498_s4, %s6021_s8 }
 0x106   : > { %s6612_s15 = scalar_lea.hbm %s519_s27, 48  ;;  %p6618_p7 = scmp.lt.u32.totalorder %s519_s27, %s8498_s4 }
 0x107   : > { %s513_s23 = scalar_lea.vmem [#allocation11], %s8560_s24  ;;  %p6613_p4 = scmp.ne.s32.totalorder %s519_s27, %s6612_s15 }
 0x108   : > { %s521_s12 = sshll.u32 %s513_s23, 4  ;;  %p6619_p3 = scmp.lt.u32.totalorder %s6617_s7, %s6612_s15  ;;  %s522_s12 = int_to_ptr.vmem [resolvable:$true] %s521_s12 }
 0x109   : > { %p6615_p11 = pnand %p6613_p4, %p8557_p0  ;;  %p6621_p9 = scmp.lt.u32.totalorder %s6612_s15, %s519_s27 }
 0x10a   : > { %p6620_p2 = por %p6619_p3, %p6618_p7 }
 0x10b   : > { %p6616_p5 = pneg %p6615_p11 }
 0x10c   : > { %p6622_p10 = por %p6621_p9, %p6620_p2 }
 0x10e   : > { %p6623_p1 = pnand %p6622_p10, %p6616_p5 }
 0x110   : > { %6626 = shalt.err (!%p6623_p1)
}
 0x111   : > { %s6627_s28 = scalar_lea.vmem %s522_s12, 48  ;;  %s6884_s22 = smov [#allocation11]  }
 0x112   : > { %p6628_p13 = scmp.ne.s32.totalorder %s522_s12, %s6627_s28  ;;  %s6632_s8 = sshll.u32 %s6884_s22, 4  ;;  %s6633_s8 = int_to_ptr.vmem [resolvable:$false] %s6632_s8 }
 0x113   : > { %s6634_s24 = scalar_lea.vmem %s6633_s8, 96  ;;  %p6635_p4 = scmp.lt.s32.totalorder %s522_s12, %s6633_s8 }
 0x114   : > { %p6630_p6 = pnand %p6628_p13, %p8557_p0  ;;  %p6636_p11 = scmp.lt.s32.totalorder %s6634_s24, %s6627_s28 }
 0x116   : > { %p6631_p8 = pneg %p6630_p6  ;;  %p6637_p12 = por %p6636_p11, %p6635_p4 }
 0x118   : > { %p6638_p3 = pnand %p6637_p12, %p6631_p8 }
 0x11a   : > { %6641 = shalt.err (!%p6638_p3)
}
 0x11b   : > { %p8561_p7 = scmp.ne.s32.totalorder %s8544_s14, 0  ;;  %s8562_s0 = scalar_lea.sflag [#allocation10], %s7011_s17 }
 0x11c   : > { %s7344_s3 = scalar_lea.hbm %s8500_s6, %s7017_s19  ;;  %s552_s15 = scalar_lea.vmem [#allocation14], %s7014_s18 }
 0x11d   : > { %6072 = dma.hbm_to_vmem [thread:$0]  (!%p8561_p7), %s519_s27, 48, %s522_s12, %s8562_s0  }
 0x11e   : > { %s559_s25 = sshll.u32 %s552_s15, 4  ;;  %s6642_s5 = scalar_lea.hbm %s7344_s3, 16  ;;  %s560_s25 = int_to_ptr.vmem [resolvable:$true] %s559_s25 }
 0x11f   : > { %p6643_p12 = scmp.ne.s32.totalorder %s7344_s3, %s6642_s5  ;;  %s6647_s12 = scalar_lea.hbm %s8500_s6, 32 }
 0x120   : > { %p6648_p9 = scmp.lt.u32.totalorder %s7344_s3, %s8500_s6  ;;  %p6649_p10 = scmp.lt.u32.totalorder %s6647_s12, %s6642_s5 }
 0x121   : > { %p6645_p5 = pnand %p6643_p12, %p8557_p0  ;;  %p6651_p13 = scmp.lt.u32.totalorder %s6642_s5, %s7344_s3 }
 0x122   : > { %p6650_p1 = por %p6649_p10, %p6648_p9 }
 0x123   : > { %p6646_p2 = pneg %p6645_p5 }
 0x124   : > { %p6652_p6 = por %p6651_p13, %p6650_p1 }
 0x126   : > { %p6653_p8 = pnand %p6652_p6, %p6646_p2 }
 0x128   : > { %6656 = shalt.err (!%p6653_p8)
}
 0x129   : > { %s6657_s22 = scalar_lea.vmem %s560_s25, 16  ;;  %s6885_s8 = smov [#allocation14]  }
 0x12a   : > { %p6658_p4 = scmp.ne.s32.totalorder %s560_s25, %s6657_s22  ;;  %s6662_s24 = sshll.u32 %s6885_s8, 4  ;;  %s6663_s24 = int_to_ptr.vmem [resolvable:$false] %s6662_s24 }
 0x12b   : > { %s6664_s0 = scalar_lea.vmem %s6663_s24, 32  ;;  %p6665_p12 = scmp.lt.s32.totalorder %s560_s25, %s6663_s24 }
 0x12c   : > { %p6660_p11 = pnand %p6658_p4, %p8557_p0  ;;  %p6666_p5 = scmp.lt.s32.totalorder %s6664_s0, %s6657_s22 }
 0x12e   : > { %p6661_p3 = pneg %p6660_p11  ;;  %p6667_p7 = por %p6666_p5, %p6665_p12 }
 0x130   : > { %p6668_p9 = pnand %p6667_p7, %p6661_p3 }
 0x132   : > { %6671 = shalt.err (!%p6668_p9)
}
 0x133   : > { %p8563_p10 = scmp.ne.s32.totalorder %s8544_s14, 0  ;;  %s8564_s23 = scalar_lea.sflag [#allocation13], %s7011_s17 }
 0x134   : > { %s8565_s5 = sld [smem:[#allocation42_spill]]  ;;  %s586_s20 = scalar_lea.vmem [#allocation17], %s7014_s18 }
 0x135   : > { %6078 = dma.hbm_to_vmem [thread:$0]  (!%p8563_p10), %s7344_s3, 16, %s560_s25, %s8564_s23  }
 0x136   : > { %s593_s12 = sshll.u32 %s586_s20, 4  ;;  %s5601_s27 = sshll.u32 %s7014_s18, 2  ;;  %s594_s12 = int_to_ptr.vmem [resolvable:$true] %s593_s12 }
 0x13a   : > { %s7370_s7 = scalar_lea.hbm %s8565_s5, %s7017_s19  ;;  %s6677_s25 = scalar_lea.hbm %s8565_s5, 32 }
 0x13b   : > { %s6672_s28 = scalar_lea.hbm %s7370_s7, 16  ;;  %p6678_p13 = scmp.lt.u32.totalorder %s7370_s7, %s8565_s5 }
 0x13c   : > { %p6673_p7 = scmp.ne.s32.totalorder %s7370_s7, %s6672_s28  ;;  %p6679_p6 = scmp.lt.u32.totalorder %s6677_s25, %s6672_s28 }
 0x13d   : > { %p6681_p4 = scmp.lt.u32.totalorder %s6672_s28, %s7370_s7 }
 0x13e   : > { %p6675_p2 = pnand %p6673_p7, %p8557_p0  ;;  %p6680_p8 = por %p6679_p6, %p6678_p13 }
 0x140   : > { %p6676_p1 = pneg %p6675_p2  ;;  %p6682_p11 = por %p6681_p4, %p6680_p8 }
 0x142   : > { %p6683_p3 = pnand %p6682_p11, %p6676_p1 }
 0x144   : > { %6686 = shalt.err (!%p6683_p3)
}
 0x145   : > { %s6687_s0 = scalar_lea.vmem %s594_s12, 16  ;;  %s6886_s23 = smov [#allocation17]  }
 0x146   : > { %p6688_p12 = scmp.ne.s32.totalorder %s594_s12, %s6687_s0  ;;  %s6692_s1 = sshll.u32 %s6886_s23, 4  ;;  %s6693_s1 = int_to_ptr.vmem [resolvable:$false] %s6692_s1 }
 0x147   : > { %s6694_s15 = scalar_lea.vmem %s6693_s1, 32  ;;  %p6695_p7 = scmp.lt.s32.totalorder %s594_s12, %s6693_s1 }
 0x148   : > { %p6690_p5 = pnand %p6688_p12, %p8557_p0  ;;  %p6696_p2 = scmp.lt.s32.totalorder %s6694_s15, %s6687_s0 }
 0x14a   : > { %p6691_p9 = pneg %p6690_p5  ;;  %p6697_p10 = por %p6696_p2, %p6695_p7 }
 0x14c   : > { %p6698_p6 = pnand %p6697_p10, %p6691_p9 }
 0x14e   : > { %6701 = shalt.err (!%p6698_p6)
}
 0x14f   : > { %p8566_p13 = scmp.ne.s32.totalorder %s8544_s14, 0  ;;  %s8567_s20 = scalar_lea.sflag [#allocation16], %s7011_s17 }
 0x150   : > { %s5772_s28 = sshll.u32 %s6862_s29, 6  ;;  %s8568_s25 = sld [smem:[#allocation43_spill]] }
 0x151   : > { %6084 = dma.hbm_to_vmem [thread:$0]  (!%p8566_p13), %s7370_s7, 16, %s594_s12, %s8567_s20  }
 0x152   : > { %s625_s0 = scalar_lea.vmem [#allocation20], %s5601_s27 }
 0x153   : > { %s633_s23 = sshll.u32 %s625_s0, 4  ;;  %s634_s23 = int_to_ptr.vmem [resolvable:$true] %s633_s23 }
 0x156   : > { %s8569_s8 = smov %s8568_s25  ;;  %s7397_s24 = scalar_lea.hbm %s8568_s25, %s5772_s28 }
 0x157   : > { %s6702_s1 = scalar_lea.hbm %s7397_s24, 64  ;;  %s6707_s15 = scalar_lea.hbm %s8569_s8, 128 }
 0x158   : > { %p6703_p10 = scmp.ne.s32.totalorder %s7397_s24, %s6702_s1  ;;  %p6708_p4 = scmp.lt.u32.totalorder %s7397_s24, %s8569_s8 }
 0x159   : > { %p6709_p11 = scmp.lt.u32.totalorder %s6707_s15, %s6702_s1  ;;  %p6711_p12 = scmp.lt.u32.totalorder %s6702_s1, %s7397_s24 }
 0x15a   : > { %p6705_p1 = pnand %p6703_p10, %p8557_p0 }
 0x15b   : > { %p6710_p3 = por %p6709_p11, %p6708_p4 }
 0x15c   : > { %p6706_p8 = pneg %p6705_p1 }
 0x15d   : > { %p6712_p5 = por %p6711_p12, %p6710_p3 }
 0x15f   : > { %p6713_p9 = pnand %p6712_p5, %p6706_p8 }
 0x161   : > { %6716 = shalt.err (!%p6713_p9)
}
 0x162   : > { %s6717_s27 = scalar_lea.vmem %s634_s23, 64  ;;  %s6887_s22 = smov [#allocation20]  }
 0x163   : > { %p6718_p7 = scmp.ne.s32.totalorder %s634_s23, %s6717_s27  ;;  %s6722_s3 = sshll.u32 %s6887_s22, 4  ;;  %s6723_s3 = int_to_ptr.vmem [resolvable:$false] %s6722_s3 }
 0x164   : > { %s6724_s25 = scalar_lea.vmem %s6723_s3, 128  ;;  %p6725_p10 = scmp.lt.s32.totalorder %s634_s23, %s6723_s3 }
 0x165   : > { %p6720_p2 = pnand %p6718_p7, %p8557_p0  ;;  %p6726_p1 = scmp.lt.s32.totalorder %s6724_s25, %s6717_s27 }
 0x167   : > { %p6721_p6 = pneg %p6720_p2  ;;  %p6727_p13 = por %p6726_p1, %p6725_p10 }
 0x169   : > { %p6728_p4 = pnand %p6727_p13, %p6721_p6 }
 0x16b   : > { %6731 = shalt.err (!%p6728_p4)
}
 0x16c   : > { %p8570_p11 = scmp.ne.s32.totalorder %s8544_s14, 0  ;;  %s8571_s0 = scalar_lea.sflag [#allocation19], %s7011_s17 }
 0x16d   : > { %s8572_s12 = sld [smem:[#allocation44_spill]]  ;;  %s664_s20 = scalar_lea.vmem [#allocation23], %s7014_s18 }
 0x16e   : > { %6090 = dma.hbm_to_vmem [thread:$0]  (!%p8570_p11), %s7397_s24, 64, %s634_s23, %s8571_s0  }
 0x16f   : > { %s671_s28 = sshll.u32 %s664_s20, 4  ;;  %s672_s28 = int_to_ptr.vmem [resolvable:$true] %s671_s28 }
 0x173   : > { %s7424_s15 = scalar_lea.hbm %s8572_s12, %s7017_s19  ;;  %s6737_s24 = scalar_lea.hbm %s8572_s12, 32 }
 0x174   : > { %s6732_s27 = scalar_lea.hbm %s7424_s15, 16  ;;  %p6738_p12 = scmp.lt.u32.totalorder %s7424_s15, %s8572_s12 }
 0x175   : > { %p6733_p13 = scmp.ne.s32.totalorder %s7424_s15, %s6732_s27  ;;  %p6739_p5 = scmp.lt.u32.totalorder %s6737_s24, %s6732_s27 }
 0x176   : > { %p6741_p7 = scmp.lt.u32.totalorder %s6732_s27, %s7424_s15 }
 0x177   : > { %p6735_p8 = pnand %p6733_p13, %p8557_p0  ;;  %p6740_p9 = por %p6739_p5, %p6738_p12 }
 0x179   : > { %p6736_p3 = pneg %p6735_p8  ;;  %p6742_p2 = por %p6741_p7, %p6740_p9 }
 0x17b   : > { %p6743_p6 = pnand %p6742_p2, %p6736_p3 }
 0x17d   : > { %6746 = shalt.err (!%p6743_p6)
}
 0x17e   : > { %s6747_s18 = scalar_lea.vmem %s672_s28, 16  ;;  %s6888_s19 = smov [#allocation23]  }
 0x17f   : > { %p6748_p10 = scmp.ne.s32.totalorder %s672_s28, %s6747_s18  ;;  %s6752_s0 = sshll.u32 %s6888_s19, 4  ;;  %s6753_s0 = int_to_ptr.vmem [resolvable:$false] %s6752_s0 }
 0x180   : > { %s6754_s1 = scalar_lea.vmem %s6753_s0, 32  ;;  %p6755_p13 = scmp.lt.s32.totalorder %s672_s28, %s6753_s0 }
 0x181   : > { %p6750_p1 = pnand %p6748_p10, %p8557_p0  ;;  %p6756_p8 = scmp.lt.s32.totalorder %s6754_s1, %s6747_s18 }
 0x183   : > { %p6751_p4 = pneg %p6750_p1  ;;  %p6757_p11 = por %p6756_p8, %p6755_p13 }
 0x185   : > { %p6758_p5 = pnand %p6757_p11, %p6751_p4 }
 0x187   : > { %6761 = shalt.err (!%p6758_p5)
}
 0x188   : > { %p8573_p12 = scmp.ne.s32.totalorder %s8544_s14, 0  ;;  %s8574_s7 = scalar_lea.sflag [#allocation22], %s7011_s17 }
 0x189   : > { %p8575_p3 = scmp.ne.s32.totalorder %s8554_s16, 0 }
 0x18a   : > { %6096 = dma.hbm_to_vmem [thread:$0]  (!%p8573_p12), %s7424_s15, 16, %s672_s28, %s8574_s7  }
 0x18b   : > { %680 = sbr.rel (%p8575_p3) target bundleno = 3170 (0xc62), region = 72  ;;  %p8576_p0 = scmp.eq.s32.totalorder (!%p8575_p3), %s7239_s10, 0 }
 0x192   : > { %6813 = dma.done.wait (%p8576_p0), [#allocation4], 512   ;;  %p8577_p9 = pmov %p8576_p0 }
 0x193   : > { %s7453_s21 = sand.u32 1, %s7239_s10   ;;  %s7456_s14 = sand.u32 1, %s6850_s26  }
 0x194   : > { %6815 = vsyncadd (%p8577_p9), [#allocation4], 4294966784  ;;  %s687_s17 = scalar_lea.sflag [#allocation7], %s7453_s21  ;;  %s689_s15 = scalar_lea.vmem [#allocation6], %s7456_s14 }
 0x195   : > { %p8578_p11 = scmp.ne.s32.totalorder %s8553_s13, 0 }
 0x197   : > { %6817 = dma.done.wait (%p8578_p11), %s687_s17, 32  }
 0x198   : > { %6819 = vsyncadd (%p8578_p11), %s687_s17, 4294967264  ;;  %s6022_s16 = smul.u32 192, %s7456_s14  ;;  %s697_s20 = scalar_lea.vmem [#allocation8], %s7456_s14 }
 0x199   : > { %s703_s28 = scalar_lea.sflag [#allocation10], %s7453_s21 }
 0x19a   : > { %s7467_s27 = scalar_lea.vmem [#allocation9], %s6022_s16 }
 0x19b   : > { %6821 = dma.done.wait (%p8578_p11), %s703_s28, 3120  }
 0x19c   : > { %6823 = vsyncadd (%p8578_p11), %s703_s28, 4294964176  ;;  %s6023_s22 = smul.u32 3, %s7456_s14  ;;  %s5610_s3 = sshll.u32 %s7456_s14, 6 }
 0x19d   : > { %s721_s23 = scalar_lea.sflag [#allocation13], %s7453_s21  ;;  %s7478_s25 = scalar_lea.vmem [#allocation12], %s5610_s3 }
 0x19e   : > { %s7475_s24 = scalar_lea.vmem [#allocation11], %s6023_s22 }
 0x19f   : > { %6825 = dma.done.wait (%p8578_p11), %s721_s23, 1040  }
 0x1a0   : > { %6827 = vsyncadd (%p8578_p11), %s721_s23, 4294966256  ;;  %s732_s18 = scalar_lea.vmem [#allocation14], %s7456_s14  ;;  %s738_s19 = scalar_lea.sflag [#allocation16], %s7453_s21 }
 0x1a1   : > { %s740_s0 = scalar_lea.vmem [#allocation15], %s7456_s14 }
 0x1a2   : > { %6829 = dma.done.wait (%p8578_p11), %s738_s19, 32  }
 0x1a3   : > { %6831 = vsyncadd (%p8578_p11), %s738_s19, 4294967264  ;;  %s5611_s1 = sshll.u32 %s7456_s14, 8  ;;  %s754_s17 = scalar_lea.sflag [#allocation19], %s7453_s21 }
 0x1a4   : > { %s7494_s16 = scalar_lea.vmem [#allocation18], %s5611_s1 }
 0x1a5   : > { %6833 = dma.done.wait (%p8578_p11), %s754_s17, 4160  }
 0x1a6   : > { %6835 = vsyncadd (%p8578_p11), %s754_s17, 4294963136  ;;  %s5612_s28 = sshll.u32 %s7456_s14, 2  ;;  %s772_s3 = scalar_lea.sflag [#allocation22], %s7453_s21 }
 0x1a7   : > { %s7501_s22 = scalar_lea.vmem [#allocation20], %s5612_s28  ;;  %s7504_s23 = scalar_lea.vmem [#allocation21], %s5611_s1 }
 0x1a8   : > { %6837 = dma.done.wait (%p8578_p11), %s772_s3, 4112  }
 0x1a9   : > { %6839 = vsyncadd (%p8578_p11), %s772_s3, 4294963184  ;;  %s783_s19 = scalar_lea.vmem [#allocation23], %s7456_s14  ;;  %s8579_s7 = sld [smem:[#allocation34_spill]] }
 0x1af   : > { %p5614_p7 = scmp.ne.s32.totalorder %s8579_s7, 0 }
 0x1b0   : > { %v877_v0 = vld [vmem:[#allocation3] sm:$0xff] (!%p5614_p7)  ;;  %v878_v1 = vld [vmem:[#allocation3 + $0x8] sm:$0xff] (!%p5614_p7)  ;;  %v879_v2 = vld [vmem:[#allocation3 + $0x10] sm:$0xff] (!%p5614_p7) }
 0x1b1   : > { %876 = sbr.rel (%p5614_p7) target bundleno = 440 (0x1b8), region = 128  ;;  %881 = vst [vmem:[#allocation2] sm:$0xff] (!%p5614_p7), %v877_v0  ;;  %882 = vst [vmem:[#allocation2 + $0x8] sm:$0xff] (!%p5614_p7), %v878_v1  ;;  %v880_v3 = vld [vmem:[#allocation3 + $0x18] sm:$0xff] (!%p5614_p7) }
 0x1b2   : > { %883 = vst [vmem:[#allocation2 + $0x10] sm:$0xff] (!%p5614_p7), %v879_v2  ;;  %884 = vst [vmem:[#allocation2 + $0x18] sm:$0xff] (!%p5614_p7), %v880_v3 }
 0x1b8 PF: > { %v885_v4 = vld [vmem:[#allocation2] sm:$0xff]  ;;  %v886_v6 = vld [vmem:[#allocation2 + $0x8] sm:$0xff]  ;;  %v6181_v32 = vld [vmem:[%s7467_s27 + $0x4c] ss:$12 sps:$4 sm:$0xff]   ;;  %v6889_v43 = vmov 0   ;;  %s6890_s13 = smov 64  }
 0x1b9   : > { %v887_v5 = vld [vmem:[#allocation2 + $0x10] sm:$0xff]  ;;  %891 = vadd.xlane.f32.xlu0 %v885_v4  ;;  %v888_v7 = vld [vmem:[#allocation2 + $0x18] sm:$0xff]  ;;  %v6173_v10 = vld [vmem:[%s7467_s27 + $0x1c] ss:$12 sps:$4 sm:$0xff]   ;;  %1167 = vmatprep.mubr.bf16.mxu0 %v6889_v43  ;;  %s6891_s21 = smov 96   ;;  %vm6894_vm0 = vmmov 0  }
 0x1ba   : > { %895 = vadd.xlane.f32.xlu1 %v887_v5  ;;  %v6170_v8 = vld [vmem:[%s7467_s27 + $0x4] ss:$12 sps:$4 sm:$0xff]   ;;  %v6172_v9 = vld [vmem:[%s7467_s27] ss:$12 sps:$4 sm:$0xff]   ;;  %v6175_v11 = vld [vmem:[%s7467_s27 + $0x8] ss:$12 sps:$4 sm:$0xff]  }
 0x1bb   : > { %1135 = vmatprep.subr.bf16.mxu0 %v6170_v8  ;;  %5882 = vmatprep.subr.bf16.mxu1 %v6175_v11  ;;  %v6176_v28 = vld [vmem:[%s7467_s27 + $0x18] ss:$12 sps:$4 sm:$0xff]   ;;  %v6177_v29 = vld [vmem:[%s7467_s27 + $0x34] ss:$12 sps:$4 sm:$0xff]   ;;  %v6180_v31 = vld [vmem:[%s7467_s27 + $0x30] ss:$12 sps:$4 sm:$0xff]  }
 0x1bc   : > { %1136 = vmatpush1.bf16.msra.mxu0 %v6172_v9  ;;  %5883 = vmatpush3.bf16.msra.mxu1 %v6175_v11  ;;  %v6179_v30 = vld [vmem:[%s7467_s27 + $0x20] ss:$12 sps:$4 sm:$0xff]   ;;  %v6183_v33 = vld [vmem:[%s7467_s27 + $0x38] ss:$12 sps:$4 sm:$0xff]   ;;  %v6184_v34 = vld [vmem:[%s7467_s27 + $0x48] ss:$12 sps:$4 sm:$0xff]  }
 0x1bd   : > { %893 = vadd.xlane.f32.xlu0 %v886_v6  ;;  %1137 = vmatprep.subr.bf16.mxu0 %v6173_v10  ;;  %v6185_v35 = vld [vmem:[%s7467_s27 + $0x64] ss:$12 sps:$4 sm:$0xff]   ;;  %v6188_v37 = vld [vmem:[%s7467_s27 + $0x60] ss:$12 sps:$4 sm:$0xff]   ;;  %v6189_v38 = vld [vmem:[%s7467_s27 + $0x7c] ss:$12 sps:$4 sm:$0xff]  }
 0x1be   : > { %897 = vadd.xlane.f32.xlu1 %v888_v7  ;;  %5884 = vmatprep.subr.bf16.mxu1 %v6179_v30  ;;  %v6187_v36 = vld [vmem:[%s7467_s27 + $0x50] ss:$12 sps:$4 sm:$0xff]   ;;  %v6191_v39 = vld [vmem:[%s7467_s27 + $0x68] ss:$12 sps:$4 sm:$0xff]   ;;  %v6192_v40 = vld [vmem:[%s7467_s27 + $0x78] ss:$12 sps:$4 sm:$0xff]  }
 0x1bf   : > { %v6193_v41 = vld [vmem:[%s7467_s27 + $0x94] ss:$12 sps:$4 sm:$0xff]   ;;  %v6196_v44 = vld [vmem:[%s7467_s27 + $0x90] ss:$12 sps:$4 sm:$0xff]   ;;  %v6197_v45 = vld [vmem:[%s7467_s27 + $0xac] ss:$12 sps:$4 sm:$0xff]  }
 0x1c0   : > { %1138 = vmatpush1.bf16.msra.mxu0 %v6176_v28  ;;  %5885 = vmatpush3.bf16.msra.mxu1 %v6179_v30  ;;  %v6195_v42 = vld [vmem:[%s7467_s27 + $0x80] ss:$12 sps:$4 sm:$0xff]   ;;  %v6199_v46 = vld [vmem:[%s7467_s27 + $0x98] ss:$12 sps:$4 sm:$0xff]   ;;  %v6200_v47 = vld [vmem:[%s7467_s27 + $0xa8] ss:$12 sps:$4 sm:$0xff]  }
 0x1c1   : > { %1139 = vmatprep.subr.bf16.mxu0 %v6177_v29  ;;  %5886 = vmatprep.subr.bf16.mxu1 %v6183_v33  ;;  %v6201_v48 = vld [vmem:[%s7467_s27 + $0xb0] ss:$12 sps:$4 sm:$0xff]   ;;  %vm2870_vm1 = vcmask 261120   ;;  %vm3267_vm3 = vcmask 130048   ;;  %vm4350_vm5 = vcmask 523264   ;;  %vm4355_vm6 = vcmask 785408  }
 0x1c2   : > { %v5615_v63 = vld [vmem:[%s689_s15] ss:$0 sm:$0xff]  ;;  %s6892_s15 = smov 32  }
 0x1c4   : > { %1140 = vmatpush1.bf16.msra.mxu0 %v6180_v31  ;;  %5887 = vmatpush3.bf16.msra.mxu1 %v6183_v33 }
 0x1c5   : > { %1141 = vmatprep.subr.bf16.mxu0 %v6181_v32  ;;  %5888 = vmatprep.subr.bf16.mxu1 %v6187_v36 }
 0x1c8   : > { %1142 = vmatpush1.bf16.msra.mxu0 %v6184_v34  ;;  %5889 = vmatpush3.bf16.msra.mxu1 %v6187_v36 }
 0x1c9   : > { %1143 = vmatprep.subr.bf16.mxu0 %v6185_v35  ;;  %5890 = vmatprep.subr.bf16.mxu1 %v6191_v39 }
 0x1cc   : > { %1144 = vmatpush1.bf16.msra.mxu0 %v6188_v37  ;;  %5891 = vmatpush3.bf16.msra.mxu1 %v6191_v39 }
 0x1cd   : > { %1145 = vmatprep.subr.bf16.mxu0 %v6189_v38  ;;  %5892 = vmatprep.subr.bf16.mxu1 %v6195_v42 }
 0x1d0   : > { %1146 = vmatpush1.bf16.msra.mxu0 %v6192_v40  ;;  %5893 = vmatpush3.bf16.msra.mxu1 %v6195_v42 }
 0x1d1   : > { %1147 = vmatprep.subr.bf16.mxu0 %v6193_v41  ;;  %5894 = vmatprep.subr.bf16.mxu1 %v6199_v46 }
 0x1d4   : > { %1148 = vmatpush1.bf16.msra.mxu0 %v6196_v44  ;;  %5895 = vmatpush3.bf16.msra.mxu1 %v6199_v46 }
 0x1d5   : > { %1149 = vmatprep.subr.bf16.mxu0 %v6197_v45  ;;  %5896 = vmatprep.subr.bf16.mxu1 %v6201_v48 }
 0x1d8   : > { %1150 = vmatpush1.bf16.msra.mxu0 %v6200_v47  ;;  %5897 = vmatpush3.bf16.msra.mxu1 %v6201_v48 }
 0x246   : > { %v892_v12 = vpop.xlane.xlu0 %891 }
 0x247   : > { %v896_v13 = vpop.xlane.xlu1 %895  ;;  %v900_v14 = vmul.f32 0.0078125, %v892_v12 }
 0x248   : > { %v902_v15 = vmul.f32 0.0078125, %v896_v13 }
 0x249   : > { %v7516_v16 = vsub.f32 %v885_v4, %v900_v14  ;;  %v5616_v4 = vld [vmem:[%s697_s20] ss:$0 sm:$0xff]  ;;  %s8584_s20 = scalar_lea.vmem [#allocation17], %s7456_s14  ;;  %s8585_s14 = sld [smem:[#allocation34_spill]] }
 0x24a   : > { %v7518_v17 = vsub.f32 %v887_v5, %v902_v15  ;;  %v894_v18 = vpop.xlane.xlu0 %893 }
 0x24b   : > { %v898_v19 = vpop.xlane.xlu1 %897  ;;  %v901_v20 = vmul.f32 0.0078125, %v894_v18  ;;  %v908_v21 = vmul.f32 %v7516_v16, %v7516_v16 }
 0x24c   : > { %v903_v22 = vmul.f32 0.0078125, %v898_v19  ;;  %v910_v25 = vmul.f32 %v7518_v17, %v7518_v17 }
 0x24d   : > { %v7522_v23 = vsub.f32 %v886_v6, %v901_v20  ;;  %912 = vadd.xlane.f32.xlu0 %v908_v21  ;;  %v990_v20 = vld [vmem:[%s7475_s24] sm:$0x7] }
 0x24e   : > { %v7524_v24 = vsub.f32 %v888_v7, %v903_v22 }
 0x24f   : > { %v909_v26 = vmul.f32 %v7522_v23, %v7522_v23  ;;  %p5765_p2 = scmp.ne.s32.totalorder %s8585_s14, 1 }
 0x250   : > { %v911_v27 = vmul.f32 %v7524_v24, %v7524_v24 }
 0x251   : > { %916 = vadd.xlane.f32.xlu0 %v910_v25  ;;  %914 = vadd.xlane.f32.xlu1 %v909_v26 }
 0x255   : > { %918 = vadd.xlane.f32.xlu1 %v911_v27 }
 0x2da   : > { %v913_v49 = vpop.xlane.xlu0 %912 }
 0x2db   : > { %v920_v50 = vmul.f32 0.0078125, %v913_v49 }
 0x2dd   : > { %v924_v51 = vadd.f32 1e-05, %v920_v50 }
 0x2de   : > { %v915_v52 = vpop.xlane.xlu1 %914  ;;  %v917_v53 = vpop.xlane.xlu0 %916 }
 0x2df   : > { %6290 = vrsqrt.f32 %v924_v51  ;;  %v921_v54 = vmul.f32 0.0078125, %v915_v52  ;;  %v922_v55 = vmul.f32 0.0078125, %v917_v53 }
 0x2e1   : > { %v925_v56 = vadd.f32 1e-05, %v921_v54  ;;  %v926_v57 = vadd.f32 1e-05, %v922_v55 }
 0x2e2   : > { %v919_v58 = vpop.xlane.xlu1 %918 }
 0x2e3   : > { %6292 = vrsqrt.f32 %v925_v56  ;;  %v923_v59 = vmul.f32 0.0078125, %v919_v58 }
 0x2e4   : > { %6294 = vrsqrt.f32 %v926_v57 }
 0x2e5   : > { %v927_v60 = vadd.f32 1e-05, %v923_v59 }
 0x2e7   : > { %6296 = vrsqrt.f32 %v927_v60 }
 0x2e9   : > { %v6291_v61 = vpop.eup %6290 }
 0x2ea   : > { %v932_v62 = vmul.f32 %v6291_v61, %v7516_v16  ;;  %v6893_v61 = vmov 0.0  }
 0x2eb   : > { %5902 = vmatprep.subr.bf16.mxu0 %v6893_v61  ;;  %5914 = vmatprep.subr.bf16.mxu1 %v6893_v61 }
 0x2ec   : > { %v942_v3 = vmul.f32 %v5615_v63, %v932_v62  ;;  %v6895_v62 = vmov 1983009808  }
 0x2ed   : > { %v6293_v0 = vpop.eup %6292 }
 0x2ee   : > { %v6295_v1 = vpop.eup %6294  ;;  %v933_v2 = vmul.f32 %v6293_v0, %v7522_v23  ;;  %v952_v8 = vadd.f32 %v5616_v4, %v942_v3  ;;  %v6896_v0 = vmov 1934713408  }
 0x2ef   : > { %v934_v5 = vmul.f32 %v6295_v1, %v7518_v17  ;;  %v992_v17 = vlaneseq  ;;  %v1332_v1 = vunpack.c.l.s4 %v6896_v0 }
 0x2f0   : > { %v943_v6 = vmul.f32 %v5615_v63, %v933_v2 }
 0x2f1   : > { %v6297_v7 = vpop.eup %6296  ;;  %v944_v11 = vmul.f32 %v5615_v63, %v934_v5  ;;  %v7563_v18 = vshrl.u32 %v992_v17, 7  ;;  %v7619_v5 = vpack.i.b16 %v6889_v43, %v6889_v43 }
 0x2f2   : > { %v953_v9 = vadd.f32 %v5616_v4, %v943_v6  ;;  %v935_v10 = vmul.f32 %v6297_v7, %v7524_v24  ;;  %v1333_v6 = vunpack.c.0.s8 %v1332_v1 }
 0x2f3   : > { %v954_v14 = vadd.f32 %v5616_v4, %v944_v11  ;;  %v994_v19 = vsub.s32 0, %v7563_v18  ;;  %v998_v21 = vsub.s32 1, %v7563_v18  ;;  %v1002_v23 = vsub.s32 2, %v7563_v18 }
 0x2f4   : > { %v956_v12 = vpack.c.bf16 %v953_v9, %v952_v8  ;;  %v945_v13 = vmul.f32 %v5615_v63, %v935_v10  ;;  %v1301_v63 = vunpack.c.l.s4 %v6895_v62 }
 0x2f5   : > { %v995_v22 = vrot.slane %v990_v20, %v994_v19  ;;  %v999_v25 = vrot.slane %v990_v20, %v998_v21  ;;  %v1003_v31 = vrot.slane %v990_v20, %v1002_v23 }
 0x2f6   : > { %1168 = vmatmul.mubr.bf16.vlgmr.msra.gmra.mrb[0].mxu0 %v956_v12  ;;  %5898 = vmatprep.mubr.bf16.mxu1 %v956_v12  ;;  %v955_v15 = vadd.f32 %v5616_v4, %v945_v13  ;;  %v1302_v2 = vunpack.c.0.s8 %v1301_v63  ;;  %v7627_v13 = vsub.s32 %v1333_v6, %v7563_v18 }
 0x2f7   : > { %1177 = vmatprep.mubr.bf16.mxu0 %v6889_v43 }
 0x2f8   : > { %v957_v16 = vpack.c.bf16 %v955_v15, %v954_v14  ;;  %v7623_v8 = vsub.s32 %v1302_v2, %v7563_v18 }
 0x2fa   : > { %5899 = vmatmul.mubr.bf16.vlgmr.msra.gmra.mrb[0].mxu1 %v957_v16 }
 0x2fb   : > { %5916 = vmatprep.mubr.msk.bf16.mxu1 %vm6894_vm0, %v6893_v61 }
 0x2fe   : > { %1178 = vmatmul.mubr.bf16.gmra.mrb[4].mxu0 %v957_v16 }
 0x2ff   : > { %5904 = vmatprep.mubr.msk.bf16.mxu0 %vm6894_vm0, %v6893_v61 }
 0x3c9   : > { %v1169_v24 = vpop.f32.mrb[0].mxu0 }
 0x3ca   : > { %v1170_v26 = vadd.f32 %v1169_v24, %v995_v22  ;;  %v1171_v27 = vpop.f32.mrb[1].mxu0 }
 0x3cb   : > { %v1173_v28 = vpop.f32.mrb[2].mxu0  ;;  %v1172_v32 = vadd.f32 %v1171_v27, %v999_v25 }
 0x3cc   : > { %v1174_v29 = vadd.f32 %v1173_v28, %v995_v22  ;;  %v1175_v30 = vpop.f32.mrb[3].mxu0  ;;  %v1237_v35 = vmul.f32 0.17677669, %v1170_v26 }
 0x3cd   : > { %v1176_v33 = vadd.f32 %v1175_v30, %v999_v25  ;;  %v5900_v34 = vpop.f32.mrb[0].mxu1 }
 0x3ce   : > { %v1238_v36 = vmul.f32 0.17677669, %v1174_v29  ;;  %v1222_v37 = vpop.f32.mrb[1].mxu1  ;;  %v1231_v41 = vadd.f32 %v5900_v34, %v1003_v31 }
 0x3cf   : > { %v7575_v38 = vpack.c.bf16 %v1176_v33, %v1172_v32  ;;  %v5901_v39 = vpop.f32.mrb[2].mxu1  ;;  %v1223_v45 = vadd.f32 %v1222_v37, %v1003_v31 }
 0x3d0   : > { %v7577_v40 = vpack.c.bf16 %v1238_v36, %v1237_v35  ;;  %v1234_v42 = vadd.f32 %v5901_v39, %v1003_v31  ;;  %v1225_v44 = vpop.f32.mrb[3].mxu1 }
 0x3d1   : > { %v1226_v46 = vadd.f32 %v1225_v44, %v1003_v31  ;;  %1793 = vrot.lane.b32.xlu1 %v7575_v38, %s6890_s13  ;;  %1789 = vrot.lane.b32.xlu0 %v7575_v38, %s6891_s21  ;;  %v1179_v47 = vpop.f32.mrb[4].mxu0  ;;  %v1805_v11 = vshrl.u32 %v7575_v38, 16 }
 0x3d2   : > { %v7583_v48 = vpack.c.bf16 %v1234_v42, %v1231_v41  ;;  %v1180_v49 = vadd.f32 %v1179_v47, %v995_v22  ;;  %v1181_v50 = vpop.f32.mrb[5].mxu0  ;;  %v1265_v47 = vshrl.u32 %v7577_v40, 16 }
 0x3d3   : > { %v7585_v51 = vpack.c.bf16 %v1226_v46, %v1223_v45  ;;  %v1183_v52 = vpop.f32.mrb[6].mxu0  ;;  %v1182_v55 = vadd.f32 %v1181_v50, %v999_v25 }
 0x3d4   : > { %v1184_v53 = vadd.f32 %v1183_v52, %v995_v22  ;;  %v1185_v54 = vpop.f32.mrb[7].mxu0  ;;  %v1239_v57 = vmul.f32 0.17677669, %v1180_v49 }
 0x3d5   : > { %v1186_v56 = vadd.f32 %v1185_v54, %v999_v25  ;;  %1797 = vrot.lane.b32.xlu1 %v7575_v38, %s6892_s15  ;;  %1253 = vrot.lane.b32.xlu0 %v7577_v40, %s6890_s13 }
 0x3d6   : > { %v1240_v58 = vmul.f32 0.17677669, %v1184_v53 }
 0x3d7   : > { %v7591_v59 = vpack.c.bf16 %v1186_v56, %v1182_v55 }
 0x3d8   : > { %v7593_v60 = vpack.c.bf16 %v1240_v58, %v1239_v57 }
 0x3d9   : > { %1249 = vrot.lane.b32.xlu1 %v7577_v40, %s6891_s21  ;;  %1791 = vrot.lane.b32.xlu0 %v7591_v59, %s6891_s21  ;;  %v1821_v0 = vshrl.u32 %v7591_v59, 16 }
 0x3da   : > { %v1287_v1 = vshrl.u32 %v7593_v60, 16 }
 0x3dd   : > { %1257 = vrot.lane.b32.xlu1 %v7577_v40, %s6892_s15  ;;  %1799 = vrot.lane.b32.xlu0 %v7591_v59, %s6892_s15 }
 0x3e1   : > { %1795 = vrot.lane.b32.xlu1 %v7591_v59, %s6890_s13  ;;  %1255 = vrot.lane.b32.xlu0 %v7593_v60, %s6890_s13 }
 0x3e5   : > { %1251 = vrot.lane.b32.xlu1 %v7593_v60, %s6891_s21 }
 0x3e9   : > { %1259 = vrot.lane.b32.xlu1 %v7593_v60, %s6892_s15 }
 0x443   : > { %v1794_v3 = vpop.permute.xlu1 %1793  ;;  %v1790_v4 = vpop.permute.xlu0 %1789 }
 0x444   : > { %v1803_v7 = vpack.i.b16 %v1790_v4, %v7575_v38  ;;  %v1806_v9 = vshrl.u32 %v1790_v4, 16  ;;  %v1813_v14 = vshrl.u32 %v1794_v3, 16 }
 0x446   : > { %v1833_v15 = vcombine.high %v1803_v7, %v7619_v5  ;;  %v1807_v20 = vpack.i.b16 %v1806_v9, %v1805_v11  ;;  %v1840_v22 = vrot.slane %v1803_v7, %v7623_v8 }
 0x447   : > { %v1798_v10 = vpop.permute.xlu1 %1797  ;;  %v1254_v30 = vpop.permute.xlu0 %1253 }
 0x448   : > { %v1811_v12 = vpack.i.b16 %v1798_v10, %v1794_v3  ;;  %v1814_v16 = vshrl.u32 %v1798_v10, 16  ;;  %v1847_v32 = vrot.slane %v1833_v15, %v7623_v8  ;;  %v1899_v35 = vcombine.high %v1807_v20, %v7619_v5 }
 0x449   : > { %v1906_v38 = vrot.slane %v1807_v20, %v7623_v8  ;;  %v1273_v63 = vshrl.u32 %v1254_v30, 16 }
 0x44a   : > { %v1848_v24 = vcombine.high %v1811_v12, %v7619_v5  ;;  %v1855_v25 = vrot.slane %v1811_v12, %v7623_v8  ;;  %v1815_v26 = vpack.i.b16 %v1814_v16, %v1813_v14  ;;  %v1913_v49 = vrot.slane %v1899_v35, %v7623_v8 }
 0x44b   : > { %v1250_v31 = vpop.permute.xlu1 %1249  ;;  %v7645_v54 = vpop.permute.xlu0 %1791 }
 0x44c   : > { %v1862_v27 = vrot.slane %v1848_v24, %v7623_v8  ;;  %v1863_v28 = vcombine.low %v1840_v22, %v1855_v25  ;;  %v1864_v29 = vcombine.high %v1840_v22, %v1855_v25  ;;  %v1914_v33 = vcombine.high %v1815_v26, %v7619_v5 }
 0x44d   : > { %v1921_v34 = vrot.slane %v1815_v26, %v7623_v8  ;;  %v1266_v42 = vshrl.u32 %v1250_v31, 16  ;;  %v1263_v53 = vpack.i.b16 %v1250_v31, %v7577_v40  ;;  %v7663_v4 = vpack.i.b16 %v7645_v54, %v7591_v59 }
 0x44e   : > { %v1871_v36 = vrot.slane %v1863_v28, %v7627_v13  ;;  %v1878_v37 = vrot.slane %v1864_v29, %v7627_v13  ;;  %v1879_v39 = vcombine.low %v1847_v32, %v1862_v27  ;;  %v1880_v41 = vcombine.high %v1847_v32, %v1862_v27 }
 0x44f   : > { %v1928_v44 = vrot.slane %v1914_v33, %v7623_v8  ;;  %v1929_v45 = vcombine.low %v1906_v38, %v1921_v34  ;;  %v1930_v46 = vcombine.high %v1906_v38, %v1921_v34  ;;  %v1258_v55 = vpop.permute.xlu1 %1257  ;;  %v1267_v58 = vpack.i.b16 %v1266_v42, %v1265_v47  ;;  %v1800_v33 = vpop.permute.xlu0 %1799 }
 0x450   : > { %v2097_v50 = vcombine.low %v1871_v36, %v1878_v37  ;;  %v5649_v52 = vcombine.high %v1871_v36, %v1878_v37  ;;  %v7648_v56 = vrot.slane %v1879_v39, %v7627_v13  ;;  %v7651_v57 = vrot.slane %v1880_v41, %v7627_v13 }
 0x451   : > { %v1945_v62 = vcombine.low %v1913_v49, %v1928_v44  ;;  %v7656_v2 = vrot.slane %v1929_v45, %v7627_v13  ;;  %v7659_v40 = vrot.slane %v1930_v46, %v7627_v13  ;;  %v1946_v3 = vcombine.high %v1913_v49, %v1928_v44 }
 0x452   : > { %v7666_v6 = vrot.slane %v2097_v50, %v7623_v8  ;;  %v7669_v7 = vrot.slane %v5649_v52, %v7623_v8  ;;  %v1299_v9 = vcombine.high %v1263_v53, %v7619_v5  ;;  %v1271_v10 = vpack.i.b16 %v1258_v55, %v1254_v30 }
 0x453   : > { %v2113_v11 = vcombine.low %v7648_v56, %v7651_v57  ;;  %v5650_v12 = vcombine.high %v7648_v56, %v7651_v57  ;;  %v1365_v14 = vcombine.high %v1267_v58, %v7619_v5  ;;  %v1274_v15 = vshrl.u32 %v1258_v55, 16  ;;  %v1796_v24 = vpop.permute.xlu1 %1795 }
 0x454   : > { %v7678_v59 = vrot.slane %v1945_v62, %v7627_v13  ;;  %v1306_v16 = vrot.slane %v1263_v53, %v7623_v8  ;;  %v1314_v20 = vcombine.high %v1271_v10, %v7619_v5  ;;  %v1321_v22 = vrot.slane %v1271_v10, %v7623_v8 }
 0x455   : > { %v7684_v25 = vrot.slane %v1946_v3, %v7627_v13  ;;  %v1372_v26 = vrot.slane %v1267_v58, %v7623_v8  ;;  %v1822_v27 = vshrl.u32 %v7645_v54, 16  ;;  %v1275_v28 = vpack.i.b16 %v1274_v15, %v1273_v63 }
 0x456   : > { %v1313_v29 = vrot.slane %v1299_v9, %v7623_v8  ;;  %v1328_v30 = vrot.slane %v1314_v20, %v7623_v8  ;;  %v1329_v31 = vcombine.low %v1306_v16, %v1321_v22  ;;  %v1330_v32 = vcombine.high %v1306_v16, %v1321_v22 }
 0x457   : > { %v1379_v34 = vrot.slane %v1365_v14, %v7623_v8  ;;  %v1380_v35 = vcombine.high %v1275_v28, %v7619_v5  ;;  %v1387_v36 = vrot.slane %v1275_v28, %v7623_v8  ;;  %v1827_v37 = vpack.i.b16 %v1800_v33, %v1796_v24 }
 0x458   : > { %v1337_v38 = vrot.slane %v1329_v31, %v7627_v13  ;;  %v1344_v39 = vrot.slane %v1330_v32, %v7627_v13  ;;  %v1345_v41 = vcombine.low %v1313_v29, %v1328_v30  ;;  %v1346_v42 = vcombine.high %v1313_v29, %v1328_v30 }
 0x459   : > { %v1394_v44 = vrot.slane %v1380_v35, %v7623_v8  ;;  %v1395_v45 = vcombine.low %v1372_v26, %v1387_v36  ;;  %v1396_v46 = vcombine.high %v1372_v26, %v1387_v36  ;;  %v1829_v47 = vshrl.u32 %v1796_v24, 16 }
 0x45a   : > { %v1353_v49 = vrot.slane %v1345_v41, %v7627_v13  ;;  %v1360_v50 = vrot.slane %v1346_v42, %v7627_v13  ;;  %v1563_v52 = vcombine.low %v1337_v38, %v1344_v39  ;;  %v5641_v53 = vcombine.high %v1337_v38, %v1344_v39  ;;  %v1252_v38 = vpop.permute.xlu1 %1251 }
 0x45b   : > { %v1403_v54 = vrot.slane %v1395_v45, %v7627_v13  ;;  %v1410_v55 = vrot.slane %v1396_v46, %v7627_v13  ;;  %v1411_v58 = vcombine.low %v1379_v34, %v1394_v44  ;;  %v1412_v62 = vcombine.high %v1379_v34, %v1394_v44 }
 0x45c   : > { %v1579_v63 = vcombine.low %v1353_v49, %v1360_v50  ;;  %v5642_v3 = vcombine.high %v1353_v49, %v1360_v50  ;;  %v1980_v9 = vcombine.high %v1827_v37, %v7619_v5  ;;  %v1987_v10 = vrot.slane %v1827_v37, %v7623_v8 }
 0x45d   : > { %v1419_v14 = vrot.slane %v1411_v58, %v7627_v13  ;;  %v1426_v15 = vrot.slane %v1412_v62, %v7627_v13  ;;  %v1613_v16 = vcombine.low %v1403_v54, %v1410_v55  ;;  %v5643_v20 = vcombine.high %v1403_v54, %v1410_v55  ;;  %v1256_v55 = vpop.permute.xlu0 %1255 }
 0x45e   : > { %v1823_v22 = vpack.i.b16 %v1822_v27, %v1821_v0  ;;  %v1965_v24 = vcombine.high %v7663_v4, %v7619_v5  ;;  %v1972_v26 = vrot.slane %v7663_v4, %v7623_v8  ;;  %v1830_v28 = vshrl.u32 %v1800_v33, 16 }
 0x45f   : > { %v1570_v29 = vrot.slane %v1563_v52, %v7623_v8  ;;  %v1578_v30 = vrot.slane %v5641_v53, %v7623_v8  ;;  %v1629_v31 = vcombine.low %v1419_v14, %v1426_v15  ;;  %v5644_v32 = vcombine.high %v1419_v14, %v1426_v15 }
 0x460   : > { %v1831_v34 = vpack.i.b16 %v1830_v28, %v1829_v47  ;;  %v1994_v35 = vrot.slane %v1980_v9, %v7623_v8  ;;  %v1995_v36 = vcombine.low %v1972_v26, %v1987_v10  ;;  %v1996_v37 = vcombine.high %v1972_v26, %v1987_v10 }
 0x461   : > { %v1586_v0 = vrot.slane %v1579_v63, %v7623_v8  ;;  %v1594_v27 = vrot.slane %v5642_v3, %v7623_v8  ;;  %v1620_v39 = vrot.slane %v1613_v16, %v7623_v8  ;;  %v1628_v4 = vrot.slane %v5643_v20, %v7623_v8  ;;  %v1260_v16 = vpop.permute.xlu1 %1259 }
 0x462   : > { %v2147_v33 = vcombine.low %v7656_v2, %v7659_v40  ;;  %v1979_v41 = vrot.slane %v1965_v24, %v7623_v8  ;;  %v1636_v42 = vrot.slane %v1629_v31, %v7623_v8  ;;  %v1644_v44 = vrot.slane %v5644_v32, %v7623_v8 }
 0x463   : > { %v2031_v45 = vcombine.high %v1823_v22, %v7619_v5  ;;  %v1595_v46 = vcombine.low %v1570_v29, %v1578_v30  ;;  %v2003_v47 = vrot.slane %v1995_v36, %v7627_v13  ;;  %v2010_v49 = vrot.slane %v1996_v37, %v7627_v13 }
 0x464   : > { %v5651_v50 = vcombine.high %v7656_v2, %v7659_v40  ;;  %v2011_v52 = vcombine.low %v1979_v41, %v1994_v35  ;;  %v2012_v53 = vcombine.high %v1979_v41, %v1994_v35  ;;  %v2046_v54 = vcombine.high %v1831_v34, %v7619_v5 }
 0x465   : > { %v2163_v58 = vcombine.low %v7678_v59, %v7684_v25  ;;  %v1603_v62 = vcombine.low %v1586_v0, %v1594_v27  ;;  %v1645_v63 = vcombine.low %v1620_v39, %v1628_v4  ;;  %v1285_v3 = vpack.i.b16 %v1252_v38, %v7593_v60 }
 0x466   : > { %v5652_v9 = vcombine.high %v7678_v59, %v7684_v25  ;;  %v2038_v10 = vrot.slane %v1823_v22, %v7623_v8  ;;  %v1653_v14 = vcombine.low %v1636_v42, %v1644_v44  ;;  %v2053_v15 = vrot.slane %v1831_v34, %v7623_v8 }
 0x467   : > { %v2045_v20 = vrot.slane %v2031_v45, %v7623_v8  ;;  %v7735_v24 = vrot.slane %v1595_v46, %v7627_v13  ;;  %v2197_v26 = vcombine.low %v2003_v47, %v2010_v49  ;;  %v1295_v28 = vshrl.u32 %v1256_v55, 16 }
 0x468   : > { %v7738_v29 = vrot.slane %v2011_v52, %v7627_v13  ;;  %v7741_v30 = vrot.slane %v2012_v53, %v7627_v13  ;;  %v2060_v31 = vrot.slane %v2046_v54, %v7623_v8  ;;  %v1288_v22 = vshrl.u32 %v1252_v38, 16 }
 0x469   : > { %v7745_v32 = vrot.slane %v1603_v62, %v7627_v13  ;;  %v7748_v34 = vrot.slane %v1645_v63, %v7627_v13  ;;  %v1431_v35 = vcombine.high %v1285_v3, %v7619_v5  ;;  %v1293_v36 = vpack.i.b16 %v1260_v16, %v1256_v55 }
 0x46a   : > { %v7752_v37 = vrot.slane %v1653_v14, %v7627_v13  ;;  %v2061_v0 = vcombine.low %v2038_v10, %v2053_v15  ;;  %v5653_v27 = vcombine.high %v2003_v47, %v2010_v49  ;;  %v1289_v39 = vpack.i.b16 %v1288_v22, %v1287_v1 }
 0x46b   : > { %v2062_v4 = vcombine.high %v2038_v10, %v2053_v15  ;;  %v7757_v38 = vrot.slane %v2197_v26, %v7623_v8  ;;  %v1296_v41 = vshrl.u32 %v1260_v16, 16  ;;  %v1446_v42 = vcombine.high %v1293_v36, %v7619_v5 }
 0x46c   : > { %v2077_v44 = vcombine.low %v2045_v20, %v2060_v31  ;;  %v2213_v45 = vcombine.low %v7738_v29, %v7741_v30  ;;  %v1438_v46 = vrot.slane %v1285_v3, %v7623_v8  ;;  %v1453_v52 = vrot.slane %v1293_v36, %v7623_v8 }
 0x46d   : > { %v1445_v47 = vrot.slane %v1431_v35, %v7623_v8  ;;  %v1497_v60 = vcombine.high %v1289_v39, %v7619_v5  ;;  %v1297_v1 = vpack.i.b16 %v1296_v41, %v1295_v28  ;;  %v1460_v49 = vrot.slane %v1446_v42, %v7623_v8 }
 0x46e   : > { %v1461_v53 = vcombine.low %v1438_v46, %v1453_v52  ;;  %v1462_v54 = vcombine.high %v1438_v46, %v1453_v52  ;;  %v2120_v55 = vrot.slane %v2113_v11, %v7623_v8  ;;  %v2128_v62 = vrot.slane %v5650_v12, %v7623_v8 }
 0x46f   : > { %v1477_v63 = vcombine.low %v1445_v47, %v1460_v49  ;;  %v1478_v3 = vcombine.high %v1445_v47, %v1460_v49  ;;  %v1512_v10 = vcombine.high %v1297_v1, %v7619_v5  ;;  %v1519_v14 = vrot.slane %v1297_v1, %v7623_v8 }
 0x470   : > { %v2069_v15 = vrot.slane %v2061_v0, %v7627_v13  ;;  %v2076_v16 = vrot.slane %v2062_v4, %v7627_v13  ;;  %v2078_v26 = vcombine.high %v2045_v20, %v2060_v31  ;;  %v7780_v28 = vrot.slane %v5653_v27, %v7623_v8 }
 0x471   : > { %v1504_v11 = vrot.slane %v1289_v39, %v7623_v8  ;;  %v1511_v22 = vrot.slane %v1497_v60, %v7623_v8  ;;  %v1469_v56 = vrot.slane %v1461_v53, %v7627_v13  ;;  %v1526_v57 = vrot.slane %v1512_v10, %v7623_v8 }
 0x472   : > { %v1476_v12 = vrot.slane %v1462_v54, %v7627_v13  ;;  %v1485_v35 = vrot.slane %v1477_v63, %v7627_v13  ;;  %v1492_v36 = vrot.slane %v1478_v3, %v7627_v13  ;;  %v2137_v0 = vcombine.low %v2120_v55, %v2128_v62 }
 0x473   : > { %v1527_v4 = vcombine.low %v1504_v11, %v1519_v14  ;;  %v1528_v20 = vcombine.high %v1504_v11, %v1519_v14  ;;  %v1543_v31 = vcombine.low %v1511_v22, %v1526_v57  ;;  %v1544_v27 = vcombine.high %v1511_v22, %v1526_v57 }
 0x474   : > { %v2085_v41 = vrot.slane %v2077_v44, %v7627_v13  ;;  %v2092_v39 = vrot.slane %v2078_v26, %v7627_v13  ;;  %v5654_v42 = vcombine.high %v7738_v29, %v7741_v30  ;;  %v2247_v46 = vcombine.low %v2069_v15, %v2076_v16 }
 0x475   : > { %v1551_v52 = vrot.slane %v1543_v31, %v7627_v13  ;;  %v1558_v47 = vrot.slane %v1544_v27, %v7627_v13  ;;  %v2129_v60 = vcombine.low %v7666_v6, %v7669_v7  ;;  %v2154_v1 = vrot.slane %v2147_v33, %v7623_v8 }
 0x476   : > { %v1663_v49 = vcombine.low %v1469_v56, %v1476_v12  ;;  %v5645_v44 = vcombine.high %v1469_v56, %v1476_v12  ;;  %v1679_v53 = vcombine.low %v1485_v35, %v1492_v36  ;;  %v2144_v54 = vrot.slane %v2137_v0, %v7627_v13 }
 0x477   : > { %v1535_v55 = vrot.slane %v1527_v4, %v7627_v13  ;;  %v1542_v62 = vrot.slane %v1528_v20, %v7627_v13  ;;  %v2162_v63 = vrot.slane %v5651_v50, %v7623_v8  ;;  %v2170_v6 = vrot.slane %v2163_v58, %v7623_v8 }
 0x478   : > { %v5655_v7 = vcombine.high %v2069_v15, %v2076_v16  ;;  %v2263_v33 = vcombine.low %v2085_v41, %v2092_v39  ;;  %v1729_v3 = vcombine.low %v1551_v52, %v1558_v47  ;;  %v5648_v10 = vcombine.high %v1551_v52, %v1558_v47 }
 0x479   : > { %v5656_v14 = vcombine.high %v2085_v41, %v2092_v39  ;;  %v2136_v26 = vrot.slane %v2129_v60, %v7627_v13  ;;  %v2178_v11 = vrot.slane %v5652_v9, %v7623_v8  ;;  %v2179_v2 = vcombine.low %v2154_v1, %v2162_v63 }
 0x47a   : > { %v1670_v40 = vrot.slane %v1663_v49, %v7623_v8  ;;  %v1678_v50 = vrot.slane %v5645_v44, %v7623_v8  ;;  %v1686_v58 = vrot.slane %v1679_v53, %v7623_v8  ;;  %v5646_v15 = vcombine.high %v1485_v35, %v1492_v36 }
 0x47b   : > { %v1713_v16 = vcombine.low %v1535_v55, %v1542_v62  ;;  %v5647_v22 = vcombine.high %v1535_v55, %v1542_v62  ;;  %v2145_v56 = vcombine.low %v2136_v26, %v2144_v54  ;;  %v2187_v57 = vcombine.low %v2170_v6, %v2178_v11 }
 0x47c   : > { %v1736_v12 = vrot.slane %v1729_v3, %v7623_v8  ;;  %v1744_v0 = vrot.slane %v5648_v10, %v7623_v8  ;;  %v2220_v59 = vrot.slane %v2213_v45, %v7623_v8  ;;  %v2228_v25 = vrot.slane %v5654_v42, %v7623_v8 }
 0x47d   : > { %v2186_v9 = vrot.slane %v2179_v2, %v7627_v13  ;;  %v2194_v4 = vrot.slane %v2187_v57, %v7627_v13  ;;  %v2229_v35 = vcombine.low %v7757_v38, %v7780_v28  ;;  %v2254_v36 = vrot.slane %v2247_v46, %v7623_v8 }
 0x47e   : > { %v2237_v20 = vcombine.low %v2220_v59, %v2228_v25  ;;  %v2262_v31 = vrot.slane %v5655_v7, %v7623_v8  ;;  %v2270_v27 = vrot.slane %v2263_v33, %v7623_v8  ;;  %v2278_v41 = vrot.slane %v5656_v14, %v7623_v8 }
 0x47f   : > { %v1694_v29 = vrot.slane %v5646_v15, %v7623_v8  ;;  %v2195_v30 = vcombine.low %v2186_v9, %v2194_v4  ;;  %v2146_v45 = vcombine.high %v2136_v26, %v2144_v54  ;;  %v2196_v39 = vcombine.high %v2186_v9, %v2194_v4 }
 0x480   : > { %v1720_v42 = vrot.slane %v1713_v16, %v7623_v8  ;;  %v2244_v52 = vrot.slane %v2237_v20, %v7627_v13  ;;  %v2279_v47 = vcombine.low %v2254_v36, %v2262_v31  ;;  %v2287_v38 = vcombine.low %v2270_v27, %v2278_v41 }
 0x481   : > { %v1728_v28 = vrot.slane %v5647_v22, %v7623_v8  ;;  %v2299_v46 = vpack.i.b16 %v2195_v30, %v2145_v56  ;;  %v2305_v60 = vpack.i.b16 %v2196_v39, %v2146_v45  ;;  %v1661_v1 = vcombine.low %v7748_v34, %v7752_v37 }
 0x482   : > { %v1753_v49 = vcombine.low %v1736_v12, %v1744_v0  ;;  %v2236_v44 = vrot.slane %v2229_v35, %v7627_v13  ;;  %v2286_v53 = vrot.slane %v2279_v47, %v7627_v13  ;;  %v2294_v54 = vrot.slane %v2287_v38, %v7627_v13 }
 0x483   : > { %v2875_v55 = vsel %vm2870_vm1, %v2299_v46, 0  ;;  %v2969_v62 = vsel %vm2870_vm1, %v2305_v60, 0  ;;  %v1662_v63 = vcombine.high %v7748_v34, %v7752_v37  ;;  %v2301_v6 = vshrl.u32 %v2195_v30, 16 }
 0x484   : > { %v1611_v7 = vcombine.low %v7735_v24, %v7745_v32  ;;  %5903 = vmatpush3.bf16.xpose.msra.mxu0 %v2875_v55  ;;  %5915 = vmatpush3.bf16.xpose.msra.mxu1 %v2969_v62  ;;  %v2245_v33 = vcombine.low %v2236_v44, %v2244_v52  ;;  %v2295_v3 = vcombine.low %v2286_v53, %v2294_v54  ;;  %v2300_v11 = vshrl.u32 %v2145_v56, 16 }
 0x485   : > { %v1703_v10 = vcombine.low %v1686_v58, %v1694_v29  ;;  %v1745_v14 = vcombine.low %v1720_v42, %v1728_v28  ;;  %5908 = vmatprep.subr.bf16.mxu0 %v6893_v61  ;;  %v1612_v26 = vcombine.high %v7735_v24, %v7745_v32  ;;  %5926 = vmatprep.subr.bf16.mxu1 %v6893_v61  ;;  %v2307_v32 = vshrl.u32 %v2196_v39, 16 }
 0x486   : > { %v1695_v2 = vcombine.low %v1670_v40, %v1678_v50  ;;  %v2311_v34 = vpack.i.b16 %v2295_v3, %v2245_v33  ;;  %v1765_v37 = vpack.i.b16 %v1661_v1, %v1611_v7  ;;  %v2302_v16 = vpack.i.b16 %v2301_v6, %v2300_v11 }
 0x487   : > { %v1771_v15 = vpack.i.b16 %v1662_v63, %v1612_v26  ;;  %v1760_v22 = vrot.slane %v1753_v49, %v7627_v13  ;;  %v1710_v58 = vrot.slane %v1703_v10, %v7627_v13  ;;  %v1752_v12 = vrot.slane %v1745_v14, %v7627_v13 }
 0x488   : > { %v3063_v57 = vsel %vm2870_vm1, %v2311_v34, 0  ;;  %v1702_v0 = vrot.slane %v1695_v2, %v7627_v13  ;;  %v2922_v24 = vsel %vm2870_vm1, %v2302_v16, 0  ;;  %v2296_v50 = vcombine.high %v2286_v53, %v2294_v54 }
 0x489   : > { %v1761_v40 = vcombine.low %v1752_v12, %v1760_v22  ;;  %v1767_v56 = vshrl.u32 %v1661_v1, 16  ;;  %v2306_v59 = vshrl.u32 %v2146_v45, 16  ;;  %v2246_v9 = vcombine.high %v2236_v44, %v2244_v52 }
 0x48a   : > { %v1711_v25 = vcombine.low %v1702_v0, %v1710_v58  ;;  %v1766_v4 = vshrl.u32 %v1611_v7, 16  ;;  %v2313_v29 = vshrl.u32 %v2295_v3, 16  ;;  %v1773_v30 = vshrl.u32 %v1662_v63, 16 }
 0x48b   : > { %5905 = vmatmul.mubr.msk.bf16.vlgmr.msra.gmra.mrb[8].mxu0 %vm2870_vm1, %v1765_v37  ;;  %5917 = vmatmul.mubr.msk.bf16.vlgmr.msra.gmra.mrb[4].mxu1 %vm2870_vm1, %v1771_v15  ;;  %v2308_v35 = vpack.i.b16 %v2307_v32, %v2306_v59  ;;  %v2317_v20 = vpack.i.b16 %v2296_v50, %v2246_v9  ;;  %v2312_v45 = vshrl.u32 %v2245_v33, 16  ;;  %v1762_v39 = vcombine.high %v1752_v12, %v1760_v22 }
 0x48c   : > { %5909 = vmatpush3.bf16.xpose.msra.mxu0 %v2922_v24  ;;  %5927 = vmatpush3.bf16.xpose.msra.mxu1 %v3063_v57  ;;  %v1777_v36 = vpack.i.b16 %v1761_v40, %v1711_v25  ;;  %v1768_v31 = vpack.i.b16 %v1767_v56, %v1766_v4  ;;  %v1772_v42 = vshrl.u32 %v1612_v26, 16  ;;  %v1712_v47 = vcombine.high %v1702_v0, %v1710_v58 }
 0x48d   : > { %5910 = vmatprep.mubr.msk.bf16.mxu0 %vm6894_vm0, %v6893_v61  ;;  %5920 = vmatprep.subr.bf16.mxu0 %v6893_v61  ;;  %v3016_v27 = vsel %vm2870_vm1, %v2308_v35, 0  ;;  %v3157_v41 = vsel %vm2870_vm1, %v2317_v20, 0  ;;  %v2314_v52 = vpack.i.b16 %v2313_v29, %v2312_v45  ;;  %v2319_v60 = vshrl.u32 %v2296_v50, 16 }
 0x48e   : > { %5928 = vmatprep.mubr.msk.bf16.mxu1 %vm6894_vm0, %v6893_v61  ;;  %5938 = vmatprep.subr.bf16.mxu1 %v6893_v61  ;;  %v1774_v38 = vpack.i.b16 %v1773_v30, %v1772_v42  ;;  %v1783_v28 = vpack.i.b16 %v1762_v39, %v1712_v47  ;;  %v1779_v1 = vshrl.u32 %v1761_v40, 16  ;;  %v2318_v49 = vshrl.u32 %v2246_v9, 16 }
 0x48f   : > { %v3110_v46 = vsel %vm2870_vm1, %v2314_v52, 0  ;;  %v1778_v44 = vshrl.u32 %v1711_v25, 16  ;;  %v1785_v62 = vshrl.u32 %v1762_v39, 16  ;;  %v1784_v63 = vshrl.u32 %v1712_v47, 16 }
 0x490   : > { %v2320_v53 = vpack.i.b16 %v2319_v60, %v2318_v49  ;;  %v2867_v7 = vand.u32 127, %v992_v17  ;;  %v2865_v33 = vadd.s32 8, %v7563_v18 }
 0x491   : > { %v1780_v54 = vpack.i.b16 %v1779_v1, %v1778_v44  ;;  %v1786_v6 = vpack.i.b16 %v1785_v62, %v1784_v63 }
 0x492   : > { %v3204_v55 = vsel %vm2870_vm1, %v2320_v53, 0  ;;  %vm7897_vm2 = vcmp.le.s32.totalorder %v2867_v7, %v7563_v18  ;;  %vm7901_vm4 = vcmp.le.s32.totalorder %v2867_v7, %v2865_v33 }
 0x493   : > { %5911 = vmatmul.mubr.msk.bf16.vlgmr.msra.gmra.mrb[12].mxu0 %vm2870_vm1, %v1768_v31  ;;  %5929 = vmatmul.mubr.msk.bf16.vlgmr.msra.gmra.mrb[8].mxu1 %vm2870_vm1, %v1777_v36 }
 0x494   : > { %5921 = vmatpush3.bf16.xpose.msra.mxu0 %v3016_v27  ;;  %5939 = vmatpush3.bf16.xpose.msra.mxu1 %v3157_v41 }
 0x495   : > { %5922 = vmatprep.mubr.msk.bf16.mxu0 %vm6894_vm0, %v6893_v61  ;;  %5932 = vmatprep.subr.bf16.mxu0 %v6893_v61 }
 0x496   : > { %5940 = vmatprep.mubr.msk.bf16.mxu1 %vm6894_vm0, %v6893_v61  ;;  %5950 = vmatprep.subr.bf16.mxu1 %v6893_v61 }
 0x49b   : > { %5923 = vmatmul.mubr.msk.bf16.vlgmr.msra.gmra.mrb[16].mxu0 %vm2870_vm1, %v1774_v38  ;;  %5941 = vmatmul.mubr.msk.bf16.vlgmr.msra.gmra.mrb[12].mxu1 %vm2870_vm1, %v1783_v28 }
 0x49c   : > { %5933 = vmatpush3.bf16.xpose.msra.mxu0 %v3110_v46  ;;  %5934 = vmatprep.mubr.msk.bf16.mxu0 %vm6894_vm0, %v6893_v61 }
 0x49d   : > { %5944 = vmatprep.subr.bf16.mxu0 %v6893_v61  ;;  %5952 = vmatprep.mubr.msk.bf16.mxu1 %vm6894_vm0, %v6893_v61 }
 0x4a3   : > { %5935 = vmatmul.mubr.msk.bf16.vlgmr.msra.gmra.mrb[20].mxu0 %vm2870_vm1, %v1780_v54 }
 0x4a4   : > { %5945 = vmatpush3.bf16.xpose.msra.mxu0 %v3204_v55  ;;  %5946 = vmatprep.mubr.msk.bf16.mxu0 %vm6894_vm0, %v6893_v61 }
 0x4a5   : > { %5956 = vmatprep.subr.bf16.mxu0 %v6893_v61 }
 0x4ab   : > { %5947 = vmatmul.mubr.msk.bf16.vlgmr.msra.gmra.mrb[24].mxu0 %vm2870_vm1, %v1786_v6 }
 0x4ac   : > { %5958 = vmatprep.mubr.msk.bf16.mxu0 %vm6894_vm0, %v6893_v61 }
 0x55e   : > { %v2911_v10 = vpop.f32.mrb[8].mxu0  ;;  %v3005_v14 = vpop.f32.mrb[4].mxu1 }
 0x55f   : > { %v7907_v11 = vsel %vm7897_vm2, %v2911_v10, -1e+30  ;;  %v5906_v2 = vpop.f32.mrb[9].mxu0  ;;  %v5918_v17 = vpop.f32.mrb[5].mxu1  ;;  %v7913_v16 = vsel %vm7897_vm2, %v3005_v14, -1e+30 }
 0x560   : > { %v2914_v34 = vpop.f32.mrb[10].mxu0  ;;  %v3008_v37 = vpop.f32.mrb[6].mxu1  ;;  %v3268_v15 = vsel %vm3267_vm3, %v7907_v11, -inf  ;;  %v3280_v24 = vsel %vm3267_vm3, %v7913_v16, -inf }
 0x561   : > { %v7917_v22 = vsel %vm7901_vm4, %v2914_v34, -1e+30  ;;  %v5919_v57 = vpop.f32.mrb[7].mxu1  ;;  %3269 = vmax.xlane.f32.xlu0 %v3268_v15  ;;  %v5907_v58 = vpop.f32.mrb[11].mxu0  ;;  %v7923_v0 = vsel %vm7901_vm4, %v3008_v37, -1e+30 }
 0x562   : > { %v3271_v12 = vsel %vm3267_vm3, %v7917_v22, -inf  ;;  %v3283_v40 = vsel %vm3267_vm3, %v7923_v0, -inf }
 0x563   : > { %3272 = vmax.xlane.f32.xlu1 %v3271_v12 }
 0x565   : > { %3281 = vmax.xlane.f32.xlu0 %v3280_v24 }
 0x566   : > { %v2958_v32 = vpop.f32.mrb[12].mxu0  ;;  %v3099_v50 = vpop.f32.mrb[8].mxu1 }
 0x567   : > { %v7931_v56 = vsel %vm7897_vm2, %v2958_v32, -1e+30  ;;  %3284 = vmax.xlane.f32.xlu1 %v3283_v40  ;;  %v5912_v59 = vpop.f32.mrb[13].mxu0  ;;  %v7935_v25 = vsel %vm7897_vm2, %v3099_v50, -1e+30  ;;  %v5930_v9 = vpop.f32.mrb[9].mxu1 }
 0x568   : > { %v2961_v4 = vpop.f32.mrb[14].mxu0  ;;  %v3274_v35 = vsel %vm3267_vm3, %v7931_v56, -inf  ;;  %v3102_v36 = vpop.f32.mrb[10].mxu1  ;;  %v3292_v41 = vsel %vm3267_vm3, %v7935_v25, -inf }
 0x569   : > { %3275 = vmax.xlane.f32.xlu0 %v3274_v35  ;;  %v5913_v20 = vpop.f32.mrb[15].mxu0  ;;  %v7941_v31 = vsel %vm7901_vm4, %v3102_v36, -1e+30  ;;  %v5931_v27 = vpop.f32.mrb[11].mxu1  ;;  %v7949_v30 = vsel %vm7901_vm4, %v2961_v4, -1e+30 }
 0x56a   : > { %v3295_v29 = vsel %vm3267_vm3, %v7941_v31, -inf  ;;  %v3277_v28 = vsel %vm3267_vm3, %v7949_v30, -inf }
 0x56b   : > { %3296 = vmax.xlane.f32.xlu1 %v3295_v29 }
 0x56d   : > { %3293 = vmax.xlane.f32.xlu0 %v3292_v41 }
 0x56e   : > { %v3052_v45 = vpop.f32.mrb[16].mxu0  ;;  %v3193_v39 = vpop.f32.mrb[12].mxu1 }
 0x56f   : > { %v5924_v42 = vpop.f32.mrb[17].mxu0  ;;  %v5942_v52 = vpop.f32.mrb[13].mxu1  ;;  %v7953_v47 = vsel %vm7897_vm2, %v3052_v45, -1e+30  ;;  %v7973_v62 = vsel %vm7897_vm2, %v3193_v39, -1e+30 }
 0x570   : > { %v3055_v38 = vpop.f32.mrb[18].mxu0  ;;  %v3196_v46 = vpop.f32.mrb[14].mxu1  ;;  %v3286_v54 = vsel %vm3267_vm3, %v7953_v47, -inf  ;;  %v3304_v33 = vsel %vm3267_vm3, %v7973_v62, -inf }
 0x571   : > { %v7959_v60 = vsel %vm7901_vm4, %v3055_v38, -1e+30  ;;  %v5925_v1 = vpop.f32.mrb[19].mxu0  ;;  %3278 = vmax.xlane.f32.xlu0 %v3277_v28  ;;  %v7963_v49 = vsel %vm7901_vm4, %v3196_v46, -1e+30  ;;  %v5943_v44 = vpop.f32.mrb[15].mxu1 }
 0x572   : > { %v3289_v53 = vsel %vm3267_vm3, %v7959_v60, -inf  ;;  %v3307_v55 = vsel %vm3267_vm3, %v7963_v49, -inf }
 0x573   : > { %3290 = vmax.xlane.f32.xlu1 %v3289_v53 }
 0x575   : > { %3287 = vmax.xlane.f32.xlu0 %v3286_v54 }
 0x576   : > { %v3146_v63 = vpop.f32.mrb[20].mxu0 }
 0x577   : > { %v5936_v6 = vpop.f32.mrb[21].mxu0  ;;  %3308 = vmax.xlane.f32.xlu1 %v3307_v55  ;;  %v7979_v10 = vsel %vm7897_vm2, %v3146_v63, -1e+30 }
 0x578   : > { %v3149_v7 = vpop.f32.mrb[22].mxu0  ;;  %v3298_v34 = vsel %vm3267_vm3, %v7979_v10, -inf }
 0x579   : > { %v7983_v14 = vsel %vm7901_vm4, %v3149_v7, -1e+30  ;;  %v5937_v2 = vpop.f32.mrb[23].mxu0  ;;  %3305 = vmax.xlane.f32.xlu0 %v3304_v33 }
 0x57a   : > { %v3301_v17 = vsel %vm3267_vm3, %v7983_v14, -inf }
 0x57b   : > { %3302 = vmax.xlane.f32.xlu1 %v3301_v17 }
 0x57d   : > { %3299 = vmax.xlane.f32.xlu0 %v3298_v34 }
 0x57e   : > { %v3240_v37 = vpop.f32.mrb[24].mxu0 }
 0x57f   : > { %v7991_v15 = vsel %vm7897_vm2, %v3240_v37, -1e+30  ;;  %v5948_v57 = vpop.f32.mrb[25].mxu0 }
 0x580   : > { %v3243_v58 = vpop.f32.mrb[26].mxu0  ;;  %v3310_v12 = vsel %vm3267_vm3, %v7991_v15, -inf }
 0x581   : > { %v7997_v24 = vsel %vm7901_vm4, %v3243_v58, -1e+30  ;;  %v5949_v32 = vpop.f32.mrb[27].mxu0  ;;  %3311 = vmax.xlane.f32.xlu0 %v3310_v12 }
 0x582   : > { %v3313_v3 = vsel %vm3267_vm3, %v7997_v24, -inf }
 0x58c   : > { %2327 = vrot.lane.b32.xlu1 %v7585_v51, %s6890_s13 }
 0x590   : > { %2331 = vrot.lane.b32.xlu1 %v7585_v51, %s6892_s15 }
 0x597   : > { %2323 = vrot.lane.b32.xlu0 %v7585_v51, %s6891_s21 }
 0x5b4   : > { %3314 = vmax.xlane.f32.xlu1 %v3313_v3 }
 0x5c5   : > { %2325 = vrot.lane.b32.xlu1 %v7583_v48, %s6891_s21 }
 0x5ee   : > { %v3270_v26 = vpop.xlane.xlu0 %3269 }
 0x5ef   : > { %v3316_v40 = vsub.f32 %v7907_v11, %v3270_v26 }
 0x5f0   : > { %v3273_v50 = vpop.xlane.xlu1 %3272 }
 0x5f1   : > { %v3332_v59 = vmul.f32 1.442695, %v3316_v40  ;;  %v3317_v9 = vsub.f32 %v7917_v22, %v3273_v50 }
 0x5f2   : > { %v3282_v4 = vpop.xlane.xlu0 %3281 }
 0x5f3   : > { %6298 = vpow2.f32 %v3332_v59  ;;  %v3334_v35 = vmul.f32 1.442695, %v3317_v9  ;;  %v3320_v36 = vsub.f32 %v7913_v16, %v3282_v4  ;;  %v2339_v9 = vshrl.u32 %v7585_v51, 16 }
 0x5f4   : > { %v3285_v20 = vpop.xlane.xlu1 %3284 }
 0x5f5   : > { %6300 = vpow2.f32 %v3334_v35  ;;  %v3340_v27 = vmul.f32 1.442695, %v3320_v36  ;;  %v3321_v41 = vsub.f32 %v7923_v0, %v3285_v20 }
 0x5f6   : > { %v3276_v29 = vpop.xlane.xlu0 %3275 }
 0x5f7   : > { %6302 = vpow2.f32 %v3340_v27  ;;  %v3342_v45 = vmul.f32 1.442695, %v3321_v41  ;;  %v3318_v39 = vsub.f32 %v7931_v56, %v3276_v29 }
 0x5f8   : > { %v8016_v22 = vpop.xlane.xlu1 %3296 }
 0x5f9   : > { %6304 = vpow2.f32 %v3342_v45  ;;  %v3336_v11 = vmul.f32 1.442695, %v3318_v39 }
 0x5fa   : > { %v8014_v42 = vpop.xlane.xlu0 %3293 }
 0x5fb   : > { %6306 = vpow2.f32 %v3336_v11 }
 0x5fd   : > { %v8018_v52 = vpop.eup %6298 }
 0x5fe   : > { %v3279_v16 = vpop.xlane.xlu0 %3278  ;;  %v3364_v38 = vsel %vm3267_vm3, %v8018_v52, 0.0 }
 0x5ff   : > { %v8022_v28 = vpop.eup %6300  ;;  %v3319_v0 = vsub.f32 %v7949_v30, %v3279_v16  ;;  %3365 = vadd.xlane.f32.xlu1 %v3364_v38 }
 0x600   : > { %v8025_v46 = vpop.xlane.xlu1 %3290  ;;  %v3367_v56 = vsel %vm3267_vm3, %v8022_v28, 0.0 }
 0x601   : > { %v8029_v1 = vpop.eup %6302  ;;  %v3338_v44 = vmul.f32 1.442695, %v3319_v0  ;;  %3368 = vadd.xlane.f32.xlu0 %v3367_v56 }
 0x602   : > { %v8031_v53 = vpop.xlane.xlu0 %3287  ;;  %v3376_v54 = vsel %vm3267_vm3, %v8029_v1, 0.0 }
 0x603   : > { %v8035_v55 = vpop.eup %6304  ;;  %6308 = vpow2.f32 %v3338_v44  ;;  %3377 = vadd.xlane.f32.xlu1 %v3376_v54 }
 0x604   : > { %v8037_v30 = vpop.xlane.xlu1 %3308  ;;  %v3379_v63 = vsel %vm3267_vm3, %v8035_v55, 0.0 }
 0x605   : > { %v8041_v6 = vpop.eup %6306  ;;  %3380 = vadd.xlane.f32.xlu0 %v3379_v63 }
 0x606   : > { %v8043_v7 = vpop.xlane.xlu0 %3305  ;;  %v3370_v2 = vsel %vm3267_vm3, %v8041_v6, 0.0 }
 0x608   : > { %v8045_v33 = vpop.xlane.xlu1 %3302 }
 0x609   : > { %3371 = vadd.xlane.f32.xlu0 %v3370_v2 }
 0x60a   : > { %v8049_v17 = vpop.xlane.xlu0 %3299 }
 0x60c   : > { %v2328_v34 = vpop.permute.xlu1 %2327 }
 0x60d   : > { %v8051_v37 = vpop.eup %6308  ;;  %v2347_v32 = vshrl.u32 %v2328_v34, 16 }
 0x60e   : > { %v8053_v57 = vpop.xlane.xlu0 %3311  ;;  %v3373_v58 = vsel %vm3267_vm3, %v8051_v37, 0.0 }
 0x60f   : > { %3374 = vadd.xlane.f32.xlu0 %v3373_v58 }
 0x610   : > { %v2332_v12 = vpop.permute.xlu1 %2331 }
 0x611   : > { %v2345_v3 = vpack.i.b16 %v2332_v12, %v2328_v34  ;;  %v2348_v26 = vshrl.u32 %v2332_v12, 16 }
 0x612   : > { %v2324_v40 = vpop.permute.xlu0 %2323 }
 0x613   : > { %v2349_v50 = vpack.i.b16 %v2348_v26, %v2347_v32  ;;  %v2382_v59 = vcombine.high %v2345_v3, %v7619_v5  ;;  %v2337_v4 = vpack.i.b16 %v2324_v40, %v7585_v51  ;;  %v2340_v35 = vshrl.u32 %v2324_v40, 16 }
 0x614   : > { %2333 = vrot.lane.b32.xlu1 %v7583_v48, %s6892_s15  ;;  %v2389_v36 = vrot.slane %v2345_v3, %v7623_v8 }
 0x615   : > { %v2341_v20 = vpack.i.b16 %v2340_v35, %v2339_v9  ;;  %v2367_v27 = vcombine.high %v2337_v4, %v7619_v5  ;;  %v2374_v41 = vrot.slane %v2337_v4, %v7623_v8  ;;  %v2396_v29 = vrot.slane %v2382_v59, %v7623_v8 }
 0x616   : > { %v2448_v45 = vcombine.high %v2349_v50, %v7619_v5  ;;  %v2455_v38 = vrot.slane %v2349_v50, %v7623_v8 }
 0x617   : > { %v2381_v39 = vrot.slane %v2367_v27, %v7623_v8  ;;  %v2397_v11 = vcombine.low %v2374_v41, %v2389_v36  ;;  %v2398_v16 = vcombine.high %v2374_v41, %v2389_v36  ;;  %v2433_v51 = vcombine.high %v2341_v20, %v7619_v5 }
 0x618   : > { %v2440_v0 = vrot.slane %v2341_v20, %v7623_v8  ;;  %v2462_v2 = vrot.slane %v2448_v45, %v7623_v8 }
 0x619   : > { %v2405_v56 = vrot.slane %v2397_v11, %v7627_v13  ;;  %v2412_v44 = vrot.slane %v2398_v16, %v7627_v13  ;;  %v2413_v54 = vcombine.low %v2381_v39, %v2396_v29  ;;  %v2414_v63 = vcombine.high %v2381_v39, %v2396_v29 }
 0x61a   : > { %v2447_v34 = vrot.slane %v2433_v51, %v7623_v8  ;;  %v2463_v58 = vcombine.low %v2440_v0, %v2455_v38  ;;  %v2464_v12 = vcombine.high %v2440_v0, %v2455_v38 }
 0x61b   : > { %v2421_v32 = vrot.slane %v2413_v54, %v7627_v13  ;;  %v2428_v3 = vrot.slane %v2414_v63, %v7627_v13  ;;  %v2631_v26 = vcombine.low %v2405_v56, %v2412_v44  ;;  %v5657_v40 = vcombine.high %v2405_v56, %v2412_v44 }
 0x61c   : > { %v2471_v50 = vrot.slane %v2463_v58, %v7627_v13  ;;  %v2478_v59 = vrot.slane %v2464_v12, %v7627_v13  ;;  %v2479_v9 = vcombine.low %v2447_v34, %v2462_v2  ;;  %v2480_v4 = vcombine.high %v2447_v34, %v2462_v2 }
 0x61d   : > { %v2638_v35 = vrot.slane %v2631_v26, %v7623_v8  ;;  %v2646_v36 = vrot.slane %v5657_v40, %v7623_v8  ;;  %v2647_v20 = vcombine.low %v2421_v32, %v2428_v3  ;;  %v5658_v27 = vcombine.high %v2421_v32, %v2428_v3 }
 0x61e   : > { %v2487_v41 = vrot.slane %v2479_v9, %v7627_v13  ;;  %v2494_v29 = vrot.slane %v2480_v4, %v7627_v13  ;;  %v2681_v45 = vcombine.low %v2471_v50, %v2478_v59  ;;  %v5659_v39 = vcombine.high %v2471_v50, %v2478_v59 }
 0x61f   : > { %v2654_v11 = vrot.slane %v2647_v20, %v7623_v8  ;;  %v2662_v16 = vrot.slane %v5658_v27, %v7623_v8  ;;  %v2663_v51 = vcombine.low %v2638_v35, %v2646_v36  ;;  %v3322_v54 = vsub.f32 %v7953_v47, %v8031_v53 }
 0x620   : > { %v2688_v38 = vrot.slane %v2681_v45, %v7623_v8  ;;  %v2696_v0 = vrot.slane %v5659_v39, %v7623_v8  ;;  %v2697_v56 = vcombine.low %v2487_v41, %v2494_v29  ;;  %v5660_v44 = vcombine.high %v2487_v41, %v2494_v29 }
 0x621   : > { %v2671_v63 = vcombine.low %v2654_v11, %v2662_v16  ;;  %v2670_v12 = vrot.slane %v2663_v51, %v7627_v13  ;;  %v3324_v3 = vsub.f32 %v7935_v25, %v8014_v42  ;;  %v3344_v40 = vmul.f32 1.442695, %v3322_v54 }
 0x622   : > { %v2704_v2 = vrot.slane %v2697_v56, %v7623_v8  ;;  %v2712_v34 = vrot.slane %v5660_v44, %v7623_v8  ;;  %v2713_v58 = vcombine.low %v2688_v38, %v2696_v0  ;;  %v3327_v25 = vsub.f32 %v7983_v14, %v8045_v33 }
 0x623   : > { %v2678_v32 = vrot.slane %v2671_v63, %v7627_v13  ;;  %v3348_v9 = vmul.f32 1.442695, %v3324_v3  ;;  %6310 = vpow2.f32 %v3344_v40  ;;  %v3323_v45 = vsub.f32 %v7959_v60, %v8025_v46 }
 0x624   : > { %v2721_v26 = vcombine.low %v2704_v2, %v2712_v34  ;;  %v2720_v53 = vrot.slane %v2713_v58, %v7627_v13  ;;  %v3329_v14 = vsub.f32 %v7963_v49, %v8037_v30  ;;  %v3354_v33 = vmul.f32 1.442695, %v3327_v25 }
 0x625   : > { %2329 = vrot.lane.b32.xlu0 %v7583_v48, %s6890_s13  ;;  %v2679_v50 = vcombine.low %v2670_v12, %v2678_v32  ;;  %v8097_v47 = vcombine.high %v2670_v12, %v2678_v32  ;;  %6312 = vpow2.f32 %v3348_v9  ;;  %v3346_v16 = vmul.f32 1.442695, %v3323_v45 }
 0x626   : > { %v2728_v59 = vrot.slane %v2721_v26, %v7627_v13  ;;  %v3325_v51 = vsub.f32 %v7941_v31, %v8016_v22  ;;  %v3358_v38 = vmul.f32 1.442695, %v3329_v14  ;;  %6314 = vpow2.f32 %v3354_v33 }
 0x627   : > { %v2835_v42 = vshrl.u32 %v2679_v50, 16  ;;  %v2843_v36 = vshrl.u32 %v8097_v47, 16  ;;  %6316 = vpow2.f32 %v3346_v16  ;;  %v3326_v49 = vsub.f32 %v7979_v10, %v8049_v17 }
 0x628   : > { %v2729_v4 = vcombine.low %v2720_v53, %v2728_v59  ;;  %v8101_v35 = vcombine.high %v2720_v53, %v2728_v59  ;;  %v3350_v46 = vmul.f32 1.442695, %v3325_v51  ;;  %6318 = vpow2.f32 %v3358_v38 }
 0x629   : > { %v3328_v31 = vsub.f32 %v7973_v62, %v8043_v7  ;;  %v3352_v22 = vmul.f32 1.442695, %v3326_v49  ;;  %v3330_v10 = vsub.f32 %v7991_v15, %v8053_v57  ;;  %v2355_v16 = vshrl.u32 %v7583_v48, 16 }
 0x62a   : > { %v2833_v20 = vpack.i.b16 %v2729_v4, %v2679_v50  ;;  %v2836_v27 = vshrl.u32 %v2729_v4, 16  ;;  %v2841_v41 = vpack.i.b16 %v8101_v35, %v8097_v47  ;;  %v2844_v29 = vshrl.u32 %v8101_v35, 16 }
 0x62b   : > { %6320 = vpow2.f32 %v3350_v46  ;;  %v3356_v17 = vmul.f32 1.442695, %v3328_v31  ;;  %v3360_v62 = vmul.f32 1.442695, %v3330_v10 }
 0x62c   : > { %5951 = vmatpush3.bf16.msra.mxu1 %v2833_v20  ;;  %v2837_v39 = vpack.i.b16 %v2836_v27, %v2835_v42  ;;  %v8111_v11 = vpack.i.b16 %v2844_v29, %v2843_v36  ;;  %6322 = vpow2.f32 %v3352_v22 }
 0x62d   : > { %5962 = vmatprep.subr.bf16.mxu1 %v6893_v61  ;;  %v8119_v60 = vpop.eup %6310  ;;  %6324 = vpow2.f32 %v3356_v17 }
 0x62e   : > { %5957 = vmatpush3.bf16.msra.mxu0 %v2837_v39  ;;  %v3382_v30 = vsel %vm3267_vm3, %v8119_v60, 0.0  ;;  %6326 = vpow2.f32 %v3360_v62 }
 0x62f   : > { %5968 = vmatprep.subr.bf16.mxu0 %v6893_v61  ;;  %v8125_v0 = vpop.eup %6312 }
 0x630   : > { %v3388_v56 = vsel %vm3267_vm3, %v8125_v0, 0.0  ;;  %v8131_v44 = vpop.eup %6314 }
 0x631   : > { %v8135_v54 = vpop.eup %6316  ;;  %v3397_v63 = vsel %vm3267_vm3, %v8131_v44, 0.0 }
 0x632   : > { %v8139_v2 = vpop.eup %6318  ;;  %v3385_v58 = vsel %vm3267_vm3, %v8135_v54, 0.0 }
 0x633   : > { %v3403_v15 = vsel %vm3267_vm3, %v8139_v2, 0.0 }
 0x635   : > { %v8146_v57 = vpop.eup %6320 }
 0x636   : > { %v3391_v32 = vsel %vm3267_vm3, %v8146_v57, 0.0  ;;  %v8150_v3 = vpop.eup %6322 }
 0x637   : > { %v8154_v26 = vpop.eup %6324 }
 0x638   : > { %3383 = vadd.xlane.f32.xlu1 %v3382_v30  ;;  %v8156_v40 = vpop.eup %6326  ;;  %v3400_v50 = vsel %vm3267_vm3, %v8154_v26, 0.0 }
 0x639   : > { %v3406_v9 = vsel %vm3267_vm3, %v8156_v40, 0.0 }
 0x63c   : > { %3389 = vadd.xlane.f32.xlu1 %v3388_v56 }
 0x640   : > { %3398 = vadd.xlane.f32.xlu1 %v3397_v63 }
 0x641   : > { %v3315_v7 = vpop.xlane.xlu1 %3314 }
 0x642   : > { %v3331_v34 = vsub.f32 %v7997_v24, %v3315_v7  ;;  %v3394_v24 = vsel %vm3267_vm3, %v8150_v3, 0.0 }
 0x644   : > { %v3362_v12 = vmul.f32 1.442695, %v3331_v34  ;;  %3386 = vadd.xlane.f32.xlu0 %v3385_v58  ;;  %3404 = vadd.xlane.f32.xlu1 %v3403_v15 }
 0x645   : > { %v2326_v4 = vpop.permute.xlu1 %2325 }
 0x646   : > { %6328 = vpow2.f32 %v3362_v12  ;;  %v2356_v39 = vshrl.u32 %v2326_v4, 16  ;;  %v2353_v51 = vpack.i.b16 %v2326_v4, %v7583_v48 }
 0x648   : > { %3392 = vadd.xlane.f32.xlu0 %v3391_v32  ;;  %v2357_v30 = vpack.i.b16 %v2356_v39, %v2355_v16  ;;  %v2506_v47 = vrot.slane %v2353_v51, %v7623_v8 }
 0x64a   : > { %v2565_v63 = vcombine.high %v2357_v30, %v7619_v5 }
 0x64c   : > { %3395 = vadd.xlane.f32.xlu0 %v3394_v24 }
 0x650   : > { %v8160_v53 = vpop.eup %6328  ;;  %3401 = vadd.xlane.f32.xlu0 %v3400_v50  ;;  %v2572_v50 = vrot.slane %v2357_v30, %v7623_v8 }
 0x651   : > { %v3409_v59 = vsel %vm3267_vm3, %v8160_v53, 0.0 }
 0x652   : > { %3410 = vadd.xlane.f32.xlu1 %v3409_v59 }
 0x654   : > { %3407 = vadd.xlane.f32.xlu0 %v3406_v9 }
 0x68c   : > { %v3366_v25 = vpop.xlane.xlu1 %3365 }
 0x68d   : > { %6330 = vrcp.f32 %v3366_v25 }
 0x68e   : > { %v3369_v42 = vpop.xlane.xlu0 %3368 }
 0x68f   : > { %6332 = vrcp.f32 %v3369_v42 }
 0x690   : > { %v3378_v36 = vpop.xlane.xlu1 %3377 }
 0x692   : > { %v3381_v20 = vpop.xlane.xlu0 %3380 }
 0x693   : > { %6334 = vrcp.f32 %v3381_v20 }
 0x694   : > { %6336 = vrcp.f32 %v3378_v36  ;;  %v2334_v31 = vpop.permute.xlu1 %2333 }
 0x695   : > { %v2364_v56 = vshrl.u32 %v2334_v31, 16 }
 0x696   : > { %v3372_v27 = vpop.xlane.xlu0 %3371 }
 0x697   : > { %v6331_v29 = vpop.eup %6330  ;;  %6338 = vrcp.f32 %v3372_v27 }
 0x698   : > { %v3428_v14 = vmul.f32 %v6331_v29, %v8018_v52  ;;  %v2499_v52 = vcombine.high %v2353_v51, %v7619_v5 }
 0x699   : > { %v6333_v45 = vpop.eup %6332 }
 0x69a   : > { %v3429_v33 = vmul.f32 %v6333_v45, %v8022_v28 }
 0x69c   : > { %v3375_v38 = vpop.xlane.xlu0 %3374  ;;  %v3444_v46 = vpack.c.bf16 %v3429_v33, %v3428_v14 }
 0x69d   : > { %v6335_v49 = vpop.eup %6334  ;;  %6340 = vrcp.f32 %v3375_v38 }
 0x69e   : > { %5953 = vmatmul.mubr.msk.bf16.vlgmr.msra.gmra.mrb[16].mxu1 %vm3267_vm3, %v3444_v46  ;;  %v6337_v22 = vpop.eup %6336  ;;  %v3433_v48 = vmul.f32 %v6335_v49, %v8035_v55  ;;  %v2513_v55 = vrot.slane %v2499_v52, %v7623_v8 }
 0x69f   : > { %5963 = vmatpush3.bf16.msra.mxu1 %v2841_v41  ;;  %5964 = vmatprep.mubr.msk.bf16.mxu1 %vm6894_vm0, %v6893_v61  ;;  %v3432_v62 = vmul.f32 %v6337_v22, %v8029_v1  ;;  %v2579_v1 = vrot.slane %v2565_v63, %v7623_v8 }
 0x6a0   : > { %v2330_v28 = vpop.permute.xlu0 %2329  ;;  %5974 = vmatprep.subr.bf16.mxu1 %v6893_v61 }
 0x6a1   : > { %v2361_v10 = vpack.i.b16 %v2334_v31, %v2330_v28  ;;  %v2363_v17 = vshrl.u32 %v2330_v28, 16  ;;  %v6339_v7 = vpop.eup %6338  ;;  %v3446_v58 = vpack.c.bf16 %v3433_v48, %v3432_v62 }
 0x6a2   : > { %v3430_v59 = vmul.f32 %v6339_v7, %v8041_v6 }
 0x6a3   : > { %v2365_v35 = vpack.i.b16 %v2364_v56, %v2363_v17  ;;  %v2514_v41 = vcombine.high %v2361_v10, %v7619_v5  ;;  %v2521_v34 = vrot.slane %v2361_v10, %v7623_v8 }
 0x6a5   : > { %v2528_v15 = vrot.slane %v2514_v41, %v7623_v8  ;;  %v2529_v12 = vcombine.low %v2506_v47, %v2521_v34  ;;  %v2530_v32 = vcombine.high %v2506_v47, %v2521_v34  ;;  %v2580_v24 = vcombine.high %v2365_v35, %v7619_v5 }
 0x6a6   : > { %v2587_v9 = vrot.slane %v2365_v35, %v7623_v8  ;;  %5965 = vmatmul.mubr.msk.bf16.vlgmr.msra.gmra.mrb[20].mxu1 %vm3267_vm3, %v3446_v58 }
 0x6a7   : > { %v6341_v4 = vpop.eup %6340  ;;  %v2537_v25 = vrot.slane %v2529_v12, %v7627_v13  ;;  %v2544_v42 = vrot.slane %v2530_v32, %v7627_v13  ;;  %v2545_v36 = vcombine.low %v2513_v55, %v2528_v15  ;;  %v2546_v20 = vcombine.high %v2513_v55, %v2528_v15  ;;  %5976 = vmatprep.mubr.msk.bf16.mxu1 %vm6894_vm0, %v6893_v61 }
 0x6a8   : > { %v3431_v27 = vmul.f32 %v6341_v4, %v8051_v37  ;;  %v2594_v29 = vrot.slane %v2580_v24, %v7623_v8  ;;  %v2595_v45 = vcombine.low %v2572_v50, %v2587_v9  ;;  %v2596_v6 = vcombine.high %v2572_v50, %v2587_v9 }
 0x6a9   : > { %v2553_v39 = vrot.slane %v2545_v36, %v7627_v13  ;;  %v2560_v14 = vrot.slane %v2546_v20, %v7627_v13  ;;  %v2731_v33 = vcombine.low %v2537_v25, %v2544_v42  ;;  %v5661_v16 = vcombine.high %v2537_v25, %v2544_v42 }
 0x6aa   : > { %v2603_v51 = vrot.slane %v2595_v45, %v7627_v13  ;;  %v2610_v38 = vrot.slane %v2596_v6, %v7627_v13  ;;  %v2611_v46 = vcombine.low %v2579_v1, %v2594_v29  ;;  %v2612_v49 = vcombine.high %v2579_v1, %v2594_v29 }
 0x6ab   : > { %v2738_v30 = vrot.slane %v2731_v33, %v7623_v8  ;;  %v2746_v37 = vrot.slane %v5661_v16, %v7623_v8  ;;  %v2747_v31 = vcombine.low %v2553_v39, %v2560_v14  ;;  %v5662_v22 = vcombine.high %v2553_v39, %v2560_v14 }
 0x6ac   : > { %v2619_v52 = vrot.slane %v2611_v46, %v7627_v13  ;;  %v2626_v48 = vrot.slane %v2612_v49, %v7627_v13  ;;  %v2781_v28 = vcombine.low %v2603_v51, %v2610_v38  ;;  %v5663_v56 = vcombine.high %v2603_v51, %v2610_v38 }
 0x6ad   : > { %v2754_v10 = vrot.slane %v2747_v31, %v7623_v8  ;;  %v2762_v17 = vrot.slane %v5662_v22, %v7623_v8  ;;  %v3445_v63 = vpack.c.bf16 %v3431_v27, %v3430_v59  ;;  %v2763_v41 = vcombine.low %v2738_v30, %v2746_v37 }
 0x6ae   : > { %v2788_v62 = vrot.slane %v2781_v28, %v7623_v8  ;;  %v2796_v7 = vrot.slane %v5663_v56, %v7623_v8  ;;  %v2797_v47 = vcombine.low %v2619_v52, %v2626_v48  ;;  %v5664_v35 = vcombine.high %v2619_v52, %v2626_v48 }
 0x6af   : > { %5959 = vmatmul.mubr.msk.bf16.vlgmr.msra.gmra.mrb[28].mxu0 %vm3267_vm3, %v3445_v63  ;;  %v2771_v34 = vcombine.low %v2754_v10, %v2762_v17  ;;  %v2770_v24 = vrot.slane %v2763_v41, %v7627_v13 }
 0x6b0   : > { %5969 = vmatpush3.bf16.msra.mxu0 %v8111_v11  ;;  %v2804_v55 = vrot.slane %v2797_v47, %v7623_v8  ;;  %v2812_v58 = vrot.slane %v5664_v35, %v7623_v8  ;;  %v2813_v15 = vcombine.low %v2788_v62, %v2796_v7  ;;  %5970 = vmatprep.mubr.msk.bf16.mxu0 %vm6894_vm0, %v6893_v61 }
 0x6b1   : > { %5980 = vmatprep.subr.bf16.mxu0 %v6893_v61  ;;  %v2778_v12 = vrot.slane %v2771_v34, %v7627_v13 }
 0x6b2   : > { %v2821_v32 = vcombine.low %v2804_v55, %v2812_v58  ;;  %v2820_v50 = vrot.slane %v2813_v15, %v7627_v13 }
 0x6b3   : > { %v2779_v11 = vcombine.low %v2770_v24, %v2778_v12 }
 0x6b4   : > { %v2828_v1 = vrot.slane %v2821_v32, %v7627_v13 }
 0x6b5   : > { %v2851_v46 = vshrl.u32 %v2779_v11, 16 }
 0x6b6   : > { %v2829_v59 = vcombine.low %v2820_v50, %v2828_v1  ;;  %v2830_v37 = vcombine.high %v2820_v50, %v2828_v1 }
 0x6b8   : > { %v2849_v9 = vpack.i.b16 %v2829_v59, %v2779_v11  ;;  %v2852_v14 = vshrl.u32 %v2829_v59, 16  ;;  %v2860_v17 = vshrl.u32 %v2830_v37, 16 }
 0x6ba   : > { %5975 = vmatpush3.bf16.msra.mxu1 %v2849_v9  ;;  %v2853_v52 = vpack.i.b16 %v2852_v14, %v2851_v46 }
 0x6bb   : > { %5986 = vmatprep.subr.bf16.mxu1 %v6893_v61 }
 0x6c5   : > { %v3384_v4 = vpop.xlane.xlu1 %3383 }
 0x6c6   : > { %6342 = vrcp.f32 %v3384_v4 }
 0x6c9   : > { %v3390_v25 = vpop.xlane.xlu1 %3389 }
 0x6cd   : > { %v3399_v36 = vpop.xlane.xlu1 %3398 }
 0x6d0   : > { %v6343_v45 = vpop.eup %6342 }
 0x6d1   : > { %v3387_v42 = vpop.xlane.xlu0 %3386  ;;  %v3405_v27 = vpop.xlane.xlu1 %3404  ;;  %v3434_v16 = vmul.f32 %v6343_v45, %v8119_v60  ;;  %v2780_v60 = vcombine.high %v2770_v24, %v2778_v12  ;;  %v6203_v12 = vld [vmem:[%s7478_s25 + $0x8] sm:$0xff]  }
 0x6d2   : > { %6344 = vrcp.f32 %v3387_v42 }
 0x6d3   : > { %6346 = vrcp.f32 %v3390_v25  ;;  %v2857_v10 = vpack.i.b16 %v2830_v37, %v2780_v60  ;;  %v2859_v7 = vshrl.u32 %v2780_v60, 16 }
 0x6d5   : > { %v3393_v20 = vpop.xlane.xlu0 %3392 }
 0x6d6   : > { %6348 = vrcp.f32 %v3393_v20 }
 0x6d7   : > { %6350 = vrcp.f32 %v3399_v36 }
 0x6d9   : > { %v3396_v29 = vpop.xlane.xlu0 %3395 }
 0x6da   : > { %6352 = vrcp.f32 %v3396_v29 }
 0x6db   : > { %6354 = vrcp.f32 %v3405_v27 }
 0x6dc   : > { %v6345_v6 = vpop.eup %6344 }
 0x6dd   : > { %v3402_v39 = vpop.xlane.xlu0 %3401  ;;  %v6347_v33 = vpop.eup %6346  ;;  %v3435_v51 = vmul.f32 %v6345_v6, %v8135_v54 }
 0x6de   : > { %6356 = vrcp.f32 %v3402_v39  ;;  %v3436_v31 = vmul.f32 %v6347_v33, %v8125_v0 }
 0x6df   : > { %v3411_v38 = vpop.xlane.xlu1 %3410  ;;  %v3447_v30 = vpack.c.bf16 %v3435_v51, %v3434_v16 }
 0x6e0   : > { %v6349_v49 = vpop.eup %6348  ;;  %6358 = vrcp.f32 %v3411_v38 }
 0x6e1   : > { %v3437_v22 = vmul.f32 %v6349_v49, %v8146_v57  ;;  %v3408_v48 = vpop.xlane.xlu0 %3407  ;;  %v6351_v28 = vpop.eup %6350  ;;  %5971 = vmatmul.mubr.msk.bf16.vlgmr.msra.gmra.mrb[32].mxu0 %vm3267_vm3, %v3447_v30 }
 0x6e2   : > { %6360 = vrcp.f32 %v3408_v48  ;;  %5981 = vmatpush3.bf16.msra.mxu0 %v2853_v52  ;;  %5982 = vmatprep.mubr.msk.bf16.mxu0 %vm6894_vm0, %v6893_v61  ;;  %v3439_v0 = vmul.f32 %v6351_v28, %v8131_v44  ;;  %v2861_v44 = vpack.i.b16 %v2860_v17, %v2859_v7 }
 0x6e3   : > { %v3448_v54 = vpack.c.bf16 %v3437_v22, %v3436_v31  ;;  %5992 = vmatprep.subr.bf16.mxu0 %v6893_v61 }
 0x6e4   : > { %v6353_v56 = vpop.eup %6352 }
 0x6e5   : > { %v3438_v57 = vmul.f32 %v6353_v56, %v8150_v3  ;;  %5977 = vmatmul.mubr.msk.bf16.vlgmr.msra.gmra.mrb[24].mxu1 %vm3267_vm3, %v3448_v54  ;;  %v6355_v63 = vpop.eup %6354 }
 0x6e6   : > { %5987 = vmatpush3.bf16.msra.mxu1 %v2857_v10  ;;  %5988 = vmatprep.mubr.msk.bf16.mxu1 %vm6894_vm0, %v6893_v61  ;;  %v3441_v35 = vmul.f32 %v6355_v63, %v8139_v2 }
 0x6e7   : > { %v3449_v62 = vpack.c.bf16 %v3439_v0, %v3438_v57 }
 0x6e8   : > { %v6357_v47 = vpop.eup %6356 }
 0x6e9   : > { %v3440_v41 = vmul.f32 %v6357_v47, %v8154_v26  ;;  %5983 = vmatmul.mubr.msk.bf16.vlgmr.msra.gmra.mrb[36].mxu0 %vm3267_vm3, %v3449_v62  ;;  %v6202_v26 = vld [vmem:[%s7478_s25] sm:$0xff]  }
 0x6ea   : > { %v6359_v34 = vpop.eup %6358  ;;  %5993 = vmatpush3.bf16.msra.mxu0 %v2861_v44  ;;  %5994 = vmatprep.mubr.msk.bf16.mxu0 %vm6894_vm0, %v6893_v61 }
 0x6eb   : > { %v3450_v3 = vpack.c.bf16 %v3441_v35, %v3440_v41  ;;  %v3443_v58 = vmul.f32 %v6359_v34, %v8160_v53  ;;  %5998 = vmatprep.subr.bf16.mxu1 %v6202_v26 }
 0x6ec   : > { %v6361_v55 = vpop.eup %6360 }
 0x6ed   : > { %v3442_v15 = vmul.f32 %v6361_v55, %v8156_v40  ;;  %5989 = vmatmul.mubr.msk.bf16.vlgmr.msra.gmra.mrb[28].mxu1 %vm3267_vm3, %v3450_v3 }
 0x6ee   : > { %5999 = vmatpush3.bf16.msra.mxu1 %v6202_v26 }
 0x6ef   : > { %v3451_v2 = vpack.c.bf16 %v3443_v58, %v3442_v15  ;;  %6000 = vmatprep.subr.bf16.mxu1 %v6203_v12 }
 0x6f1   : > { %5995 = vmatmul.mubr.msk.bf16.vlgmr.msra.gmra.mrb[40].mxu0 %vm3267_vm3, %v3451_v2 }
 0x6f2   : > { %4800 = vmatprep.mubr.bf16.mxu0 %v6889_v43  ;;  %6001 = vmatpush3.bf16.msra.mxu1 %v6203_v12 }
 0x771   : > { %v3489_v32 = vpop.f32.mrb[16].mxu1 }
 0x772   : > { %v5954_v24 = vpop.f32.mrb[17].mxu1 }
 0x773   : > { %v3492_v61 = vpop.f32.mrb[18].mxu1 }
 0x774   : > { %v3804_v50 = vpack.c.bf16 %v3492_v61, %v3489_v32  ;;  %v5955_v1 = vpop.f32.mrb[19].mxu1 }
 0x776   : > { %v3816_v27 = vshrl.u32 %v3804_v50, 16 }
 0x779   : > { %v3577_v53 = vpop.f32.mrb[20].mxu1 }
 0x77a   : > { %v5966_v40 = vpop.f32.mrb[21].mxu1 }
 0x77b   : > { %v3580_v11 = vpop.f32.mrb[22].mxu1 }
 0x77c   : > { %v3806_v59 = vpack.c.bf16 %v3580_v11, %v3577_v53  ;;  %v5967_v9 = vpop.f32.mrb[23].mxu1 }
 0x77e   : > { %v3824_v30 = vshrl.u32 %v3806_v59, 16 }
 0x782   : > { %v3533_v4 = vpop.f32.mrb[28].mxu0 }
 0x783   : > { %v5960_v25 = vpop.f32.mrb[29].mxu0 }
 0x784   : > { %v3536_v42 = vpop.f32.mrb[30].mxu0 }
 0x785   : > { %v3805_v36 = vpack.c.bf16 %v3536_v42, %v3533_v4  ;;  %v5961_v20 = vpop.f32.mrb[31].mxu0 }
 0x787   : > { %v3814_v29 = vpack.i.b16 %v3805_v36, %v3804_v50  ;;  %v3817_v45 = vshrl.u32 %v3805_v36, 16 }
 0x789   : > { %v3818_v6 = vpack.i.b16 %v3817_v45, %v3816_v27  ;;  %v3844_v46 = vcombine.high %v3814_v29, %v7619_v5  ;;  %v3851_v60 = vrot.slane %v3814_v29, %v7623_v8 }
 0x78b   : > { %v3910_v52 = vcombine.high %v3818_v6, %v7619_v5  ;;  %v3858_v0 = vrot.slane %v3844_v46, %v7623_v8  ;;  %v3917_v35 = vrot.slane %v3818_v6, %v7623_v8 }
 0x78d   : > { %v3924_v41 = vrot.slane %v3910_v52, %v7623_v8 }
 0x7b4   : > { %v3621_v39 = vpop.f32.mrb[32].mxu0 }
 0x7b5   : > { %v5972_v14 = vpop.f32.mrb[33].mxu0 }
 0x7b6   : > { %v3624_v33 = vpop.f32.mrb[34].mxu0 }
 0x7b7   : > { %v3807_v16 = vpack.c.bf16 %v3624_v33, %v3621_v39  ;;  %v5973_v51 = vpop.f32.mrb[35].mxu0 }
 0x7b8   : > { %v3665_v38 = vpop.f32.mrb[24].mxu1 }
 0x7b9   : > { %v5978_v49 = vpop.f32.mrb[25].mxu1  ;;  %v3822_v37 = vpack.i.b16 %v3807_v16, %v3806_v59  ;;  %v3825_v31 = vshrl.u32 %v3807_v16, 16 }
 0x7ba   : > { %v3668_v22 = vpop.f32.mrb[26].mxu1 }
 0x7bb   : > { %v3808_v48 = vpack.c.bf16 %v3668_v22, %v3665_v38  ;;  %v5979_v28 = vpop.f32.mrb[27].mxu1  ;;  %v3826_v54 = vpack.i.b16 %v3825_v31, %v3824_v30  ;;  %v3859_v56 = vcombine.high %v3822_v37, %v7619_v5  ;;  %v3866_v10 = vrot.slane %v3822_v37, %v7623_v8 }
 0x7bc   : > { %v3709_v57 = vpop.f32.mrb[36].mxu0 }
 0x7bd   : > { %v3873_v17 = vrot.slane %v3859_v56, %v7623_v8  ;;  %v3874_v63 = vcombine.low %v3851_v60, %v3866_v10  ;;  %v3875_v62 = vcombine.high %v3851_v60, %v3866_v10  ;;  %v3925_v7 = vcombine.high %v3826_v54, %v7619_v5  ;;  %v5984_v47 = vpop.f32.mrb[37].mxu0 }
 0x7be   : > { %v3932_v44 = vrot.slane %v3826_v54, %v7623_v8  ;;  %v3832_v34 = vshrl.u32 %v3808_v48, 16  ;;  %v3712_v3 = vpop.f32.mrb[38].mxu0 }
 0x7bf   : > { %v3882_v55 = vrot.slane %v3874_v63, %v7627_v13  ;;  %v3889_v58 = vrot.slane %v3875_v62, %v7627_v13  ;;  %v3890_v15 = vcombine.low %v3858_v0, %v3873_v17  ;;  %v3891_v2 = vcombine.high %v3858_v0, %v3873_v17  ;;  %v5985_v26 = vpop.f32.mrb[39].mxu0  ;;  %v6204_v63 = vld [vmem:[%s7478_s25 + $0x10] sm:$0xff]  }
 0x7c0   : > { %v3753_v12 = vpop.f32.mrb[28].mxu1  ;;  %v3939_v32 = vrot.slane %v3925_v7, %v7623_v8  ;;  %v3940_v24 = vcombine.low %v3917_v35, %v3932_v44  ;;  %v3941_v61 = vcombine.high %v3917_v35, %v3932_v44  ;;  %v3809_v50 = vpack.c.bf16 %v3712_v3, %v3709_v57  ;;  %6002 = vmatprep.subr.bf16.mxu1 %v6204_v63 }
 0x7c1   : > { %v5990_v1 = vpop.f32.mrb[29].mxu1  ;;  %v3898_v53 = vrot.slane %v3890_v15, %v7627_v13  ;;  %v3905_v40 = vrot.slane %v3891_v2, %v7627_v13  ;;  %v4108_v11 = vcombine.low %v3882_v55, %v3889_v58  ;;  %v5681_v59 = vcombine.high %v3882_v55, %v3889_v58  ;;  %6003 = vmatpush3.bf16.msra.mxu1 %v6204_v63 }
 0x7c2   : > { %v3756_v9 = vpop.f32.mrb[30].mxu1  ;;  %v3948_v4 = vrot.slane %v3940_v24, %v7627_v13  ;;  %v3955_v25 = vrot.slane %v3941_v61, %v7627_v13  ;;  %v3956_v42 = vcombine.low %v3924_v41, %v3939_v32  ;;  %v3957_v36 = vcombine.high %v3924_v41, %v3939_v32 }
 0x7c3   : > { %v5991_v20 = vpop.f32.mrb[31].mxu1  ;;  %v4124_v27 = vcombine.low %v3898_v53, %v3905_v40  ;;  %v5682_v29 = vcombine.high %v3898_v53, %v3905_v40  ;;  %v3830_v45 = vpack.i.b16 %v3809_v50, %v3808_v48  ;;  %v3833_v6 = vshrl.u32 %v3809_v50, 16  ;;  %v6205_v40 = vld [vmem:[%s7478_s25 + $0x18] sm:$0xff]  }
 0x7c4   : > { %v3964_v39 = vrot.slane %v3956_v42, %v7627_v13  ;;  %v4158_v14 = vcombine.low %v3948_v4, %v3955_v25  ;;  %v5683_v33 = vcombine.high %v3948_v4, %v3955_v25  ;;  %v3797_v16 = vpop.f32.mrb[40].mxu0  ;;  %v3971_v51 = vrot.slane %v3957_v36, %v7627_v13  ;;  %6004 = vmatprep.subr.bf16.mxu1 %v6205_v40 }
 0x7c5   : > { %v3834_v38 = vpack.i.b16 %v3833_v6, %v3832_v34  ;;  %v3976_v46 = vcombine.high %v3830_v45, %v7619_v5  ;;  %v3810_v49 = vpack.c.bf16 %v3756_v9, %v3753_v12  ;;  %v5996_v30 = vpop.f32.mrb[41].mxu0  ;;  %v4115_v31 = vrot.slane %v4108_v11, %v7623_v8  ;;  %6005 = vmatpush3.bf16.msra.mxu1 %v6205_v40  ;;  %v6209_v40 = vld [vmem:[%s7478_s25 + $0x38] sm:$0xff]  }
 0x7c6   : > { %v3800_v37 = vpop.f32.mrb[42].mxu0  ;;  %v4123_v22 = vrot.slane %v5681_v59, %v7623_v8  ;;  %v4131_v52 = vrot.slane %v4124_v27, %v7623_v8  ;;  %v4139_v48 = vrot.slane %v5682_v29, %v7623_v8  ;;  %v3983_v28 = vrot.slane %v3830_v45, %v7623_v8  ;;  %v6207_v30 = vld [vmem:[%s7478_s25 + $0x28] sm:$0xff]  }
 0x7c7   : > { %v3990_v60 = vrot.slane %v3976_v46, %v7623_v8  ;;  %v4042_v54 = vcombine.high %v3834_v38, %v7619_v5  ;;  %v5997_v56 = vpop.f32.mrb[43].mxu0  ;;  %v3811_v10 = vpack.c.bf16 %v3800_v37, %v3797_v16  ;;  %v4165_v17 = vrot.slane %v4158_v14, %v7623_v8 }
 0x7c8   : > { %v4140_v0 = vcombine.low %v4115_v31, %v4123_v22  ;;  %v4148_v57 = vcombine.low %v4131_v52, %v4139_v48  ;;  %v3840_v62 = vshrl.u32 %v3810_v49, 16  ;;  %v4173_v7 = vrot.slane %v5683_v33, %v7623_v8 }
 0x7c9   : > { %v4174_v47 = vcombine.low %v3964_v39, %v3971_v51  ;;  %v5684_v35 = vcombine.high %v3964_v39, %v3971_v51  ;;  %v3838_v41 = vpack.i.b16 %v3811_v10, %v3810_v49  ;;  %v3841_v44 = vshrl.u32 %v3811_v10, 16  ;;  %v6206_v49 = vld [vmem:[%s7478_s25 + $0x20] sm:$0xff]  }
 0x7ca   : > { %v4147_v34 = vrot.slane %v4140_v0, %v7627_v13  ;;  %v4155_v3 = vrot.slane %v4148_v57, %v7627_v13  ;;  %v4049_v55 = vrot.slane %v3834_v38, %v7623_v8  ;;  %v4190_v2 = vcombine.low %v4165_v17, %v4173_v7  ;;  %6006 = vmatprep.subr.bf16.mxu1 %v6206_v49 }
 0x7cb   : > { %v4181_v58 = vrot.slane %v4174_v47, %v7623_v8  ;;  %v4189_v15 = vrot.slane %v5684_v35, %v7623_v8  ;;  %v3842_v26 = vpack.i.b16 %v3841_v44, %v3840_v62  ;;  %v3991_v12 = vcombine.high %v3838_v41, %v7619_v5  ;;  %6007 = vmatpush3.bf16.msra.mxu1 %v6206_v49 }
 0x7cc   : > { %v3998_v32 = vrot.slane %v3838_v41, %v7623_v8  ;;  %v4157_v24 = vcombine.high %v4147_v34, %v4155_v3  ;;  %v4056_v61 = vrot.slane %v4042_v54, %v7623_v8  ;;  %v4197_v50 = vrot.slane %v4190_v2, %v7627_v13  ;;  %6008 = vmatprep.subr.bf16.mxu1 %v6207_v30 }
 0x7cd   : > { %v4198_v1 = vcombine.low %v4181_v58, %v4189_v15  ;;  %v8287_v53 = vcombine.low %v4147_v34, %v4155_v3  ;;  %v4005_v11 = vrot.slane %v3991_v12, %v7623_v8  ;;  %v4057_v4 = vcombine.high %v3842_v26, %v7619_v5  ;;  %v6208_v34 = vld [vmem:[%s7478_s25 + $0x30] sm:$0xff]  }
 0x7ce   : > { %v4006_v59 = vcombine.low %v3983_v28, %v3998_v32  ;;  %v4007_v9 = vcombine.high %v3983_v28, %v3998_v32  ;;  %v4064_v25 = vrot.slane %v3842_v26, %v7623_v8  ;;  %v4317_v20 = vshrl.u32 %v4157_v24, 16 }
 0x7cf   : > { %v4205_v42 = vrot.slane %v4198_v1, %v7627_v13  ;;  %v4311_v36 = vshrl.u32 %v8287_v53, 16  ;;  %v4022_v45 = vcombine.low %v3990_v60, %v4005_v11  ;;  %v4023_v6 = vcombine.high %v3990_v60, %v4005_v11  ;;  %6009 = vmatpush3.bf16.msra.mxu1 %v6207_v30 }
 0x7d0   : > { %v4014_v27 = vrot.slane %v4006_v59, %v7627_v13  ;;  %v4021_v29 = vrot.slane %v4007_v9, %v7627_v13  ;;  %v4071_v39 = vrot.slane %v4057_v4, %v7623_v8  ;;  %v4072_v5 = vcombine.low %v4049_v55, %v4064_v25  ;;  %6010 = vmatprep.subr.bf16.mxu1 %v6208_v34 }
 0x7d1   : > { %v4073_v14 = vcombine.high %v4049_v55, %v4064_v25  ;;  %v4207_v33 = vcombine.high %v4197_v50, %v4205_v42  ;;  %v4030_v16 = vrot.slane %v4022_v45, %v7627_v13  ;;  %v4037_v51 = vrot.slane %v4023_v6, %v7627_v13 }
 0x7d2   : > { %v4208_v38 = vcombine.low %v4014_v27, %v4021_v29  ;;  %v5685_v46 = vcombine.high %v4014_v27, %v4021_v29  ;;  %v4080_v37 = vrot.slane %v4072_v5, %v7627_v13  ;;  %v4088_v22 = vcombine.low %v4056_v61, %v4071_v39 }
 0x7d3   : > { %v4087_v31 = vrot.slane %v4073_v14, %v7627_v13  ;;  %v4089_v52 = vcombine.high %v4056_v61, %v4071_v39  ;;  %v4224_v48 = vcombine.low %v4030_v16, %v4037_v51  ;;  %v5686_v28 = vcombine.high %v4030_v16, %v4037_v51  ;;  %6011 = vmatpush3.bf16.msra.mxu1 %v6208_v34  ;;  %v6212_v34 = vld [vmem:[%s7494_s16 + $0x4] ss:$16 sps:$4 sm:$0xff]  }
 0x7d4   : > { %v4316_v60 = vpack.i.b16 %v4207_v33, %v4157_v24  ;;  %v4206_v54 = vcombine.low %v4197_v50, %v4205_v42  ;;  %v4096_v56 = vrot.slane %v4088_v22, %v7627_v13  ;;  %v4318_v63 = vshrl.u32 %v4207_v33, 16  ;;  %6012 = vmatprep.subr.bf16.mxu1 %v6209_v40  ;;  %v5689_v22 = vld [vmem:[%s732_s18] ss:$0 sm:$0xff]  ;;  %4768 = vmatprep.subr.bf16.mxu0 %v6212_v34 }
 0x7d5   : > { %v4103_v10 = vrot.slane %v4089_v52, %v7627_v13  ;;  %v4258_v0 = vcombine.low %v4080_v37, %v4087_v31  ;;  %v5687_v57 = vcombine.high %v4080_v37, %v4087_v31  ;;  %v4215_v62 = vrot.slane %v4208_v38, %v7623_v8 }
 0x7d6   : > { %4336 = vrot.lane.b32.xlu1 %v4316_v60, %s6890_s13  ;;  %v4312_v17 = vshrl.u32 %v4206_v54, 16  ;;  %v4223_v7 = vrot.slane %v5685_v46, %v7623_v8  ;;  %v4231_v47 = vrot.slane %v4224_v48, %v7623_v8  ;;  %v4239_v35 = vrot.slane %v5686_v28, %v7623_v8 }
 0x7d7   : > { %v4265_v41 = vrot.slane %v4258_v0, %v7623_v8  ;;  %v4273_v44 = vrot.slane %v5687_v57, %v7623_v8  ;;  %v4319_v55 = vpack.i.b16 %v4318_v63, %v4317_v20  ;;  %v4274_v15 = vcombine.low %v4096_v56, %v4103_v10  ;;  %6013 = vmatpush3.bf16.msra.mxu1 %v6209_v40 }
 0x7d8   : > { %v4313_v3 = vpack.i.b16 %v4312_v17, %v4311_v36  ;;  %v4240_v58 = vcombine.low %v4215_v62, %v4223_v7  ;;  %v4248_v2 = vcombine.low %v4231_v47, %v4239_v35  ;;  %v5688_v26 = vcombine.high %v4096_v56, %v4103_v10  ;;  %v6370_v10 = vld [vmem:[#allocation2] sm:$0xff]  ;;  %v6371_v17 = vld [vmem:[#allocation2 + $0x8] sm:$0xff]  ;;  %v6372_v62 = vld [vmem:[#allocation2 + $0x10] sm:$0xff] }
 0x7d9   : > { %v4290_v12 = vcombine.low %v4265_v41, %v4273_v44  ;;  %v4310_v32 = vpack.i.b16 %v4206_v54, %v8287_v53  ;;  %v4281_v24 = vrot.slane %v4274_v15, %v7623_v8  ;;  %v6373_v35 = vld [vmem:[#allocation2 + $0x18] sm:$0xff]  ;;  %v6210_v44 = vld [vmem:[%s7494_s16] ss:$16 sps:$4 sm:$0xff]  }
 0x7da   : > { %4332 = vrot.lane.b32.xlu0 %v4313_v3, %s6892_s15  ;;  %v4247_v61 = vrot.slane %v4240_v58, %v7627_v13  ;;  %v4255_v50 = vrot.slane %v4248_v2, %v7627_v13  ;;  %v4289_v1 = vrot.slane %v5688_v26, %v7623_v8  ;;  %v6213_v3 = vld [vmem:[%s7494_s16 + $0x8] ss:$16 sps:$4 sm:$0xff]   ;;  %v6218_v58 = vld [vmem:[%s7494_s16 + $0x24] ss:$16 sps:$4 sm:$0xff]   ;;  %v6221_v15 = vld [vmem:[%s7494_s16 + $0x2c] ss:$16 sps:$4 sm:$0xff]   ;;  %4769 = vmatpush1.bf16.msra.mxu0 %v6210_v44 }
 0x7db   : > { %v4297_v53 = vrot.slane %v4290_v12, %v7627_v13  ;;  %v6216_v2 = vld [vmem:[%s7494_s16 + $0x20] ss:$16 sps:$4 sm:$0xff]   ;;  %4770 = vmatprep.subr.bf16.mxu0 %v6218_v58  ;;  %v6219_v26 = vld [vmem:[%s7494_s16 + $0x28] ss:$16 sps:$4 sm:$0xff]  }
 0x7dc   : > { %v4257_v11 = vcombine.high %v4247_v61, %v4255_v50  ;;  %v4298_v59 = vcombine.low %v4281_v24, %v4289_v1  ;;  %v4256_v9 = vcombine.low %v4247_v61, %v4255_v50 }
 0x7de   : > { %4340 = vrot.lane.b32.xlu0 %v4319_v55, %s6891_s21  ;;  %v4305_v4 = vrot.slane %v4298_v59, %v7627_v13  ;;  %v4323_v36 = vshrl.u32 %v4256_v9, 16  ;;  %v4329_v20 = vshrl.u32 %v4257_v11, 16  ;;  %v6215_v55 = vld [vmem:[%s7494_s16 + $0xc] ss:$16 sps:$4 sm:$0xff]   ;;  %4771 = vmatpush1.bf16.msra.mxu0 %v6216_v2 }
 0x7df   : > { %4821 = vmatprep.subr.bf16.mxu1 %v6215_v55 }
 0x7e0   : > { %v4307_v25 = vcombine.high %v4297_v53, %v4305_v4  ;;  %v4306_v42 = vcombine.low %v4297_v53, %v4305_v4 }
 0x7e2   : > { %v4328_v27 = vpack.i.b16 %v4307_v25, %v4257_v11  ;;  %v4324_v29 = vshrl.u32 %v4306_v42, 16  ;;  %v4330_v8 = vshrl.u32 %v4307_v25, 16  ;;  %v4322_v45 = vpack.i.b16 %v4306_v42, %v4256_v9 }
 0x7e4   : > { %4338 = vrot.lane.b32.xlu1 %v4328_v27, %s6890_s13  ;;  %v4325_v6 = vpack.i.b16 %v4324_v29, %v4323_v36  ;;  %v4331_v39 = vpack.i.b16 %v4330_v8, %v4329_v20  ;;  %v6224_v27 = vld [vmem:[%s7494_s16 + $0x44] ss:$16 sps:$4 sm:$0xff]   ;;  %v6227_v29 = vld [vmem:[%s7494_s16 + $0x4c] ss:$16 sps:$4 sm:$0xff]   ;;  %v6222_v8 = vld [vmem:[%s7494_s16 + $0x40] ss:$16 sps:$4 sm:$0xff]  }
 0x7e5   : > { %4772 = vmatprep.subr.bf16.mxu0 %v6224_v27 }
 0x7e6   : > { %4773 = vmatpush1.bf16.msra.mxu0 %v6222_v8  ;;  %v6261_v8 = vld [vmem:[%s7504_s23 + $0x80] sm:$0xff]  }
 0x7e8   : > { %4334 = vrot.lane.b32.xlu1 %v4325_v6, %s6892_s15  ;;  %v6230_v6 = vld [vmem:[%s7494_s16 + $0x64] ss:$16 sps:$4 sm:$0xff]  }
 0x7e9   : > { %4774 = vmatprep.subr.bf16.mxu0 %v6230_v6 }
 0x7ec   : > { %4342 = vrot.lane.b32.xlu1 %v4331_v39, %s6891_s21  ;;  %v6233_v39 = vld [vmem:[%s7494_s16 + $0x6c] ss:$16 sps:$4 sm:$0xff]  }
 0x848   : > { %v4337_v14 = vpop.permute.xlu1 %4336 }
 0x84c   : > { %v4333_v5 = vpop.permute.xlu0 %4332 }
 0x84d   : > { %v4346_v13 = vsel %vm2870_vm1, %v4310_v32, %v4333_v5  ;;  %v6228_v5 = vld [vmem:[%s7494_s16 + $0x60] ss:$16 sps:$4 sm:$0xff]  }
 0x84e   : > { %v4352_v16 = vsel %vm4350_vm5, %v4346_v13, %v4337_v14  ;;  %v6231_v13 = vld [vmem:[%s7494_s16 + $0x68] ss:$16 sps:$4 sm:$0xff]   ;;  %4775 = vmatpush1.bf16.msra.mxu0 %v6228_v5  ;;  %v6236_v14 = vld [vmem:[%s7494_s16 + $0x84] ss:$16 sps:$4 sm:$0xff]  }
 0x84f   : > { %4776 = vmatprep.subr.bf16.mxu0 %v6236_v14  ;;  %v6265_v5 = vld [vmem:[%s7504_s23 + $0x88] sm:$0xff]   ;;  %v6267_v14 = vld [vmem:[%s7504_s23 + $0xd0] sm:$0xff]  }
 0x850   : > { %v4341_v33 = vpop.permute.xlu0 %4340 }
 0x851   : > { %v4357_v51 = vsel %vm4355_vm6, %v4352_v16, %v4341_v33  ;;  %v6239_v33 = vld [vmem:[%s7494_s16 + $0x8c] ss:$16 sps:$4 sm:$0xff]   ;;  %v6234_v16 = vld [vmem:[%s7494_s16 + $0x80] ss:$16 sps:$4 sm:$0xff]  }
 0x852   : > { %6014 = vmatprep.mubr.bf16.mxu1 %v4357_v51  ;;  %v6237_v51 = vld [vmem:[%s7494_s16 + $0x88] ss:$16 sps:$4 sm:$0xff]   ;;  %4777 = vmatpush1.bf16.msra.mxu0 %v6234_v16 }
 0x856   : > { %v4339_v38 = vpop.permute.xlu1 %4338 }
 0x85a   : > { %v4335_v46 = vpop.permute.xlu1 %4334 }
 0x85b   : > { %v4349_v49 = vsel %vm2870_vm1, %v4322_v45, %v4335_v46  ;;  %v6225_v45 = vld [vmem:[%s7494_s16 + $0x48] ss:$16 sps:$4 sm:$0xff]   ;;  %v6242_v46 = vld [vmem:[%s7494_s16 + $0xa4] ss:$16 sps:$4 sm:$0xff]  }
 0x85c   : > { %v4354_v37 = vsel %vm4350_vm5, %v4349_v49, %v4339_v38  ;;  %v6240_v38 = vld [vmem:[%s7494_s16 + $0xa0] ss:$16 sps:$4 sm:$0xff]   ;;  %v6243_v49 = vld [vmem:[%s7494_s16 + $0xa8] ss:$16 sps:$4 sm:$0xff]   ;;  %4778 = vmatprep.subr.bf16.mxu0 %v6242_v46 }
 0x85d   : > { %4779 = vmatpush1.bf16.msra.mxu0 %v6240_v38  ;;  %v6270_v38 = vld [vmem:[%s7504_s23 + $0x58] sm:$0xff]  }
 0x85e   : > { %v4343_v30 = vpop.permute.xlu1 %4342  ;;  %v6271_v46 = vld [vmem:[%s7504_s23 + $0xd8] sm:$0xff]  }
 0x85f   : > { %v4360_v31 = vsel %vm4355_vm6, %v4354_v37, %v4343_v30  ;;  %v6245_v30 = vld [vmem:[%s7494_s16 + $0xac] ss:$16 sps:$4 sm:$0xff]   ;;  %v6248_v37 = vld [vmem:[%s7494_s16 + $0xc4] ss:$16 sps:$4 sm:$0xff]  }
 0x860   : > { %6015 = vmatmul.mubr.bf16.vlgmr.msra.gmra.mrb[32].mxu1 %v4360_v31  ;;  %v6251_v31 = vld [vmem:[%s7494_s16 + $0xcc] ss:$16 sps:$4 sm:$0xff]   ;;  %4780 = vmatprep.subr.bf16.mxu0 %v6248_v37 }
 0x861   : > { %4853 = vmatprep.mubr.bf16.mxu1 %v6889_v43  ;;  %4822 = vmatpush1.bf16.msra.mxu1 %v6213_v3  ;;  %v6274_v37 = vld [vmem:[%s7504_s23 + $0x60] sm:$0xff]  }
 0x862   : > { %4823 = vmatprep.subr.bf16.mxu1 %v6221_v15 }
 0x865   : > { %4824 = vmatpush1.bf16.msra.mxu1 %v6219_v26 }
 0x866   : > { %4825 = vmatprep.subr.bf16.mxu1 %v6227_v29 }
 0x869   : > { %4826 = vmatpush1.bf16.msra.mxu1 %v6225_v45  ;;  %v6262_v45 = vld [vmem:[%s7504_s23 + $0x48] sm:$0xff]  }
 0x86a   : > { %4827 = vmatprep.subr.bf16.mxu1 %v6233_v39 }
 0x86d   : > { %4828 = vmatpush1.bf16.msra.mxu1 %v6231_v13  ;;  %v6266_v13 = vld [vmem:[%s7504_s23 + $0x50] sm:$0xff]  }
 0x86e   : > { %4829 = vmatprep.subr.bf16.mxu1 %v6239_v33 }
 0x871   : > { %4830 = vmatpush1.bf16.msra.mxu1 %v6237_v51  ;;  %v6269_v51 = vld [vmem:[%s7504_s23 + $0x90] sm:$0xff]  }
 0x872   : > { %4831 = vmatprep.subr.bf16.mxu1 %v6245_v30  ;;  %v6273_v30 = vld [vmem:[%s7504_s23 + $0x98] sm:$0xff]  }
 0x875   : > { %4832 = vmatpush1.bf16.msra.mxu1 %v6243_v49  ;;  %v6272_v49 = vld [vmem:[%s7504_s23 + $0x18] sm:$0xff]  }
 0x876   : > { %4833 = vmatprep.subr.bf16.mxu1 %v6251_v31  ;;  %v6275_v31 = vld [vmem:[%s7504_s23 + $0xe0] sm:$0xff]  }
 0x933   : > { %v6016_v52 = vpop.f32.mrb[32].mxu1 }
 0x934   : > { %v4467_v48 = vpop.f32.mrb[33].mxu1  ;;  %v4476_v56 = vadd.f32 %v6016_v52, %v5689_v22  ;;  %v6249_v52 = vld [vmem:[%s7494_s16 + $0xc8] ss:$16 sps:$4 sm:$0xff]  }
 0x935   : > { %v4468_v28 = vadd.f32 %v5689_v22, %v4467_v48  ;;  %v6017_v60 = vpop.f32.mrb[34].mxu1  ;;  %v6254_v48 = vld [vmem:[%s7494_s16 + $0xe4] ss:$16 sps:$4 sm:$0xff]   ;;  %4834 = vmatpush1.bf16.msra.mxu1 %v6249_v52  ;;  %v6277_v52 = vld [vmem:[%s7504_s23 + $0xa0] sm:$0xff]  }
 0x936   : > { %v4470_v54 = vpop.f32.mrb[35].mxu1  ;;  %v8337_v7 = vadd.f32 %v6372_v62, %v4476_v56  ;;  %v4479_v47 = vadd.f32 %v6017_v60, %v5689_v22  ;;  %v6252_v60 = vld [vmem:[%s7494_s16 + $0xe0] ss:$16 sps:$4 sm:$0xff]   ;;  %v6258_v56 = vld [vmem:[%s7504_s23 + $0x40] sm:$0xff]  }
 0x937   : > { %v8332_v0 = vadd.f32 %v6370_v10, %v4468_v28  ;;  %v4471_v57 = vadd.f32 %v5689_v22, %v4470_v54  ;;  %v6246_v22 = vld [vmem:[%s7494_s16 + $0xc0] ss:$16 sps:$4 sm:$0xff]   ;;  %v6257_v28 = vld [vmem:[%s7494_s16 + $0xec] ss:$16 sps:$4 sm:$0xff]   ;;  %v6255_v54 = vld [vmem:[%s7494_s16 + $0xe8] ss:$16 sps:$4 sm:$0xff]  }
 0x938   : > { %v8341_v41 = vadd.f32 %v6373_v35, %v4479_v47  ;;  %4781 = vmatpush1.bf16.msra.mxu0 %v6246_v22  ;;  %4835 = vmatprep.subr.bf16.mxu1 %v6257_v28  ;;  %v6259_v10 = vld [vmem:[%s7504_s23 + $0xc0] sm:$0xff]   ;;  %v6279_v28 = vld [vmem:[%s7504_s23 + $0xe8] sm:$0xff]  }
 0x939   : > { %v8334_v63 = vadd.f32 %v6371_v17, %v4471_v57  ;;  %4488 = vadd.xlane.f32.xlu0 %v8332_v0  ;;  %4782 = vmatprep.subr.bf16.mxu0 %v6254_v48  ;;  %v6276_v22 = vld [vmem:[%s7504_s23 + $0x20] sm:$0xff]   ;;  %v6278_v48 = vld [vmem:[%s7504_s23 + $0x68] sm:$0xff]  }
 0x93a   : > { %4836 = vmatpush1.bf16.msra.mxu1 %v6255_v54  ;;  %v6281_v54 = vld [vmem:[%s7504_s23 + $0xa8] sm:$0xff]  }
 0x93b   : > { %4490 = vadd.xlane.f32.xlu1 %v8334_v63  ;;  %5854 = vmatprep.subr.bf16.mxu1 %v6259_v10  ;;  %v6283_v10 = vld [vmem:[%s7504_s23 + $0xf0] sm:$0xff]  }
 0x93c   : > { %4783 = vmatpush1.bf16.msra.mxu0 %v6252_v60  ;;  %v6280_v60 = vld [vmem:[%s7504_s23 + $0x28] sm:$0xff]  }
 0x93d   : > { %4492 = vadd.xlane.f32.xlu0 %v8337_v7  ;;  %5826 = vmatprep.subr.bf16.mxu0 %v6258_v56  ;;  %v6282_v56 = vld [vmem:[%s7504_s23 + $0x70] sm:$0xff]  }
 0x941   : > { %4494 = vadd.xlane.f32.xlu0 %v8341_v41 }
 0x9c6   : > { %v4489_v12 = vpop.xlane.xlu0 %4488 }
 0x9c7   : > { %v4496_v32 = vmul.f32 0.0078125, %v4489_v12  ;;  %v5698_v12 = vld [vmem:[%s740_s0] ss:$0 sm:$0xff] }
 0x9c8   : > { %v4491_v24 = vpop.xlane.xlu1 %4490 }
 0x9c9   : > { %v8353_v61 = vsub.f32 %v8332_v0, %v4496_v32  ;;  %v4497_v50 = vmul.f32 0.0078125, %v4491_v24 }
 0x9ca   : > { %v4493_v1 = vpop.xlane.xlu0 %4492 }
 0x9cb   : > { %v8356_v40 = vsub.f32 %v8334_v63, %v4497_v50  ;;  %v4498_v11 = vmul.f32 0.0078125, %v4493_v1  ;;  %v4504_v59 = vmul.f32 %v8353_v61, %v8353_v61 }
 0x9cd   : > { %v8361_v9 = vsub.f32 %v8337_v7, %v4498_v11  ;;  %4508 = vadd.xlane.f32.xlu0 %v4504_v59  ;;  %v4505_v53 = vmul.f32 %v8356_v40, %v8356_v40  ;;  %v5699_v59 = vld [vmem:[%s8584_s20] ss:$0 sm:$0xff] }
 0x9ce   : > { %v4495_v4 = vpop.xlane.xlu0 %4494 }
 0x9cf   : > { %v4499_v25 = vmul.f32 0.0078125, %v4495_v4  ;;  %4510 = vadd.xlane.f32.xlu1 %v4505_v53  ;;  %v4506_v42 = vmul.f32 %v8361_v9, %v8361_v9 }
 0x9d1   : > { %v8368_v36 = vsub.f32 %v8341_v41, %v4499_v25  ;;  %4512 = vadd.xlane.f32.xlu0 %v4506_v42 }
 0x9d3   : > { %v4507_v20 = vmul.f32 %v8368_v36, %v8368_v36 }
 0x9d5   : > { %4514 = vadd.xlane.f32.xlu1 %v4507_v20 }
 0xa5a   : > { %v4509_v57 = vpop.xlane.xlu0 %4508 }
 0xa5b   : > { %v4516_v17 = vmul.f32 0.0078125, %v4509_v57  ;;  %v6284_v57 = vld [vmem:[%s7504_s23 + $0x30] sm:$0xff]  }
 0xa5c   : > { %v4511_v62 = vpop.xlane.xlu1 %4510 }
 0xa5d   : > { %v4520_v47 = vadd.f32 1e-05, %v4516_v17  ;;  %v4517_v35 = vmul.f32 0.0078125, %v4511_v62  ;;  %v6285_v17 = vld [vmem:[%s7504_s23 + $0xb0] sm:$0xff]   ;;  %v6286_v62 = vld [vmem:[%s7504_s23 + $0x78] sm:$0xff]  }
 0xa5e   : > { %v4513_v44 = vpop.xlane.xlu0 %4512 }
 0xa5f   : > { %6362 = vrsqrt.f32 %v4520_v47  ;;  %v4521_v34 = vadd.f32 1e-05, %v4517_v35  ;;  %v4518_v3 = vmul.f32 0.0078125, %v4513_v44  ;;  %v6287_v47 = vld [vmem:[%s7504_s23 + $0xf8] sm:$0xff]  }
 0xa60   : > { %v6288_v35 = vld [vmem:[%s7504_s23 + $0x38] sm:$0xff]  }
 0xa61   : > { %6364 = vrsqrt.f32 %v4521_v34  ;;  %v4522_v55 = vadd.f32 1e-05, %v4518_v3  ;;  %v6289_v44 = vld [vmem:[%s7504_s23 + $0xb8] sm:$0xff]   ;;  %v4602_v3 = vsub.s32 3, %v7563_v18 }
 0xa62   : > { %v4515_v58 = vpop.xlane.xlu1 %4514  ;;  %v4586_v34 = vld [vmem:[%s7501_s22] sm:$0xf] }
 0xa63   : > { %6366 = vrsqrt.f32 %v4522_v55  ;;  %v4519_v15 = vmul.f32 0.0078125, %v4515_v58  ;;  %v4591_v55 = vrot.slane %v4586_v34, %v994_v19  ;;  %v4599_v58 = vrot.slane %v4586_v34, %v1002_v23 }
 0xa65   : > { %v4523_v2 = vadd.f32 1e-05, %v4519_v15  ;;  %v4595_v15 = vrot.slane %v4586_v34, %v998_v21 }
 0xa67   : > { %6368 = vrsqrt.f32 %v4523_v2  ;;  %v4603_v2 = vrot.slane %v4586_v34, %v4602_v3 }
 0xa69   : > { %v6363_v26 = vpop.eup %6362 }
 0xa6a   : > { %v4528_v32 = vmul.f32 %v6363_v26, %v8353_v61  ;;  %v6260_v61 = vld [vmem:[%s7504_s23] sm:$0xff]  }
 0xa6b   : > { %v6365_v24 = vpop.eup %6364 }
 0xa6c   : > { %v4529_v50 = vmul.f32 %v6365_v24, %v8356_v40  ;;  %v4538_v1 = vmul.f32 %v5698_v12, %v4528_v32  ;;  %v6263_v40 = vld [vmem:[%s7504_s23 + $0xc8] sm:$0xff]  }
 0xa6d   : > { %v6367_v11 = vpop.eup %6366 }
 0xa6e   : > { %v4539_v53 = vmul.f32 %v5698_v12, %v4529_v50  ;;  %v4548_v4 = vadd.f32 %v5699_v59, %v4538_v1  ;;  %v4530_v42 = vmul.f32 %v6367_v11, %v8361_v9 }
 0xa70   : > { %v4549_v25 = vadd.f32 %v5699_v59, %v4539_v53  ;;  %v4540_v6 = vmul.f32 %v5698_v12, %v4530_v42 }
 0xa71   : > { %v6369_v20 = vpop.eup %6368 }
 0xa72   : > { %v4552_v27 = vpack.c.bf16 %v4549_v25, %v4548_v4  ;;  %v4531_v29 = vmul.f32 %v6369_v20, %v8368_v36  ;;  %v6264_v36 = vld [vmem:[%s7504_s23 + $0x8] sm:$0xff]   ;;  %v4550_v33 = vadd.f32 %v5699_v59, %v4540_v6 }
 0xa74   : > { %4801 = vmatmul.mubr.bf16.vlgmr.msra.gmra.mrb[44].mxu0 %v4552_v27  ;;  %4854 = vmatmul.mubr.bf16.vlgmr.msra.gmra.mrb[36].mxu1 %v4552_v27  ;;  %v4541_v39 = vmul.f32 %v5698_v12, %v4531_v29 }
 0xa75   : > { %4810 = vmatprep.mubr.bf16.mxu0 %v6889_v43  ;;  %4863 = vmatprep.mubr.bf16.mxu1 %v6889_v43  ;;  %v6268_v43 = vld [vmem:[%s7504_s23 + $0x10] sm:$0xff]  }
 0xa76   : > { %v4551_v9 = vadd.f32 %v5699_v59, %v4541_v39  ;;  %5827 = vmatpush3.bf16.msra.mxu0 %v6260_v61  ;;  %5855 = vmatpush3.bf16.msra.mxu1 %v6261_v8 }
 0xa77   : > { %5828 = vmatprep.subr.bf16.mxu0 %v6262_v45  ;;  %5856 = vmatprep.subr.bf16.mxu1 %v6263_v40 }
 0xa78   : > { %v4553_v16 = vpack.c.bf16 %v4551_v9, %v4550_v33 }
 0xa7a   : > { %5829 = vmatpush3.bf16.msra.mxu0 %v6264_v36  ;;  %5857 = vmatpush3.bf16.msra.mxu1 %v6265_v5 }
 0xa7b   : > { %5830 = vmatprep.subr.bf16.mxu0 %v6266_v13  ;;  %5858 = vmatprep.subr.bf16.mxu1 %v6267_v14 }
 0xa7c   : > { %4811 = vmatmul.mubr.bf16.gmra.mrb[48].mxu0 %v4553_v16  ;;  %4864 = vmatmul.mubr.bf16.gmra.mrb[40].mxu1 %v4553_v16 }
 0xa7e   : > { %5831 = vmatpush3.bf16.msra.mxu0 %v6268_v43  ;;  %5859 = vmatpush3.bf16.msra.mxu1 %v6269_v51 }
 0xa7f   : > { %5832 = vmatprep.subr.bf16.mxu0 %v6270_v38  ;;  %5860 = vmatprep.subr.bf16.mxu1 %v6271_v46 }
 0xa82   : > { %5833 = vmatpush3.bf16.msra.mxu0 %v6272_v49  ;;  %5861 = vmatpush3.bf16.msra.mxu1 %v6273_v30 }
 0xa83   : > { %5834 = vmatprep.subr.bf16.mxu0 %v6274_v37  ;;  %5862 = vmatprep.subr.bf16.mxu1 %v6275_v31 }
 0xa86   : > { %5835 = vmatpush3.bf16.msra.mxu0 %v6276_v22  ;;  %5863 = vmatpush3.bf16.msra.mxu1 %v6277_v52 }
 0xa87   : > { %5836 = vmatprep.subr.bf16.mxu0 %v6278_v48  ;;  %5864 = vmatprep.subr.bf16.mxu1 %v6279_v28 }
 0xa8a   : > { %5837 = vmatpush3.bf16.msra.mxu0 %v6280_v60  ;;  %5865 = vmatpush3.bf16.msra.mxu1 %v6281_v54 }
 0xa8b   : > { %5838 = vmatprep.subr.bf16.mxu0 %v6282_v56  ;;  %5866 = vmatprep.subr.bf16.mxu1 %v6283_v10 }
 0xa8e   : > { %5839 = vmatpush3.bf16.msra.mxu0 %v6284_v57  ;;  %5867 = vmatpush3.bf16.msra.mxu1 %v6285_v17 }
 0xa8f   : > { %5840 = vmatprep.subr.bf16.mxu0 %v6286_v62  ;;  %5868 = vmatprep.subr.bf16.mxu1 %v6287_v47 }
 0xa92   : > { %5841 = vmatpush3.bf16.msra.mxu0 %v6288_v35  ;;  %5869 = vmatpush3.bf16.msra.mxu1 %v6289_v44 }
 0xb47   : > { %v4802_v26 = vpop.f32.mrb[44].mxu0  ;;  %v4855_v12 = vpop.f32.mrb[36].mxu1 }
 0xb48   : > { %v4803_v32 = vadd.f32 %v4802_v26, %v4591_v55  ;;  %v4856_v24 = vadd.f32 %v4855_v12, %v4599_v58  ;;  %v4804_v50 = vpop.f32.mrb[45].mxu0  ;;  %v4857_v1 = vpop.f32.mrb[37].mxu1 }
 0xb49   : > { %v4805_v11 = vadd.f32 %v4804_v50, %v4595_v15  ;;  %v4858_v59 = vadd.f32 %v4857_v1, %v4603_v2  ;;  %v4806_v53 = vpop.f32.mrb[46].mxu0  ;;  %v4859_v4 = vpop.f32.mrb[38].mxu1 }
 0xb4a   : > { %v4807_v25 = vadd.f32 %v4806_v53, %v4591_v55  ;;  %v4860_v42 = vadd.f32 %v4859_v4, %v4599_v58  ;;  %v4808_v19 = vpop.f32.mrb[47].mxu0  ;;  %v4861_v20 = vpop.f32.mrb[39].mxu1  ;;  %v4874_v29 = vmax.f32 %v4803_v32, 0.0  ;;  %v4876_v18 = vmax.f32 %v4856_v24, 0.0 }
 0xb4b   : > { %v4809_v27 = vadd.f32 %v4808_v19, %v4595_v15  ;;  %v4862_v23 = vadd.f32 %v4861_v20, %v4603_v2  ;;  %v4875_v8 = vmax.f32 %v4805_v11, 0.0  ;;  %v4877_v45 = vmax.f32 %v4858_v59, 0.0 }
 0xb4c   : > { %v4878_v21 = vmax.f32 %v4807_v25, 0.0  ;;  %v4880_v61 = vmax.f32 %v4860_v42, 0.0 }
 0xb4d   : > { %v4879_v40 = vmax.f32 %v4809_v27, 0.0  ;;  %v4881_v6 = vmax.f32 %v4862_v23, 0.0 }
 0xb4e   : > { %v4890_v39 = vpack.c.bf16 %v4878_v21, %v4874_v29  ;;  %v4892_v9 = vpack.c.bf16 %v4880_v61, %v4876_v18 }
 0xb4f   : > { %v4891_v36 = vpack.c.bf16 %v4879_v40, %v4875_v8  ;;  %v4893_v5 = vpack.c.bf16 %v4881_v6, %v4877_v45  ;;  %v4812_v13 = vpop.f32.mrb[48].mxu0  ;;  %v4865_v14 = vpop.f32.mrb[40].mxu1 }
 0xb50   : > { %v4813_v33 = vadd.f32 %v4812_v13, %v4591_v55  ;;  %v4866_v16 = vadd.f32 %v4865_v14, %v4599_v58  ;;  %v4814_v43 = vpop.f32.mrb[49].mxu0  ;;  %v4867_v51 = vpop.f32.mrb[41].mxu1 }
 0xb51   : > { %v4815_v38 = vadd.f32 %v4814_v43, %v4595_v15  ;;  %v4868_v46 = vadd.f32 %v4867_v51, %v4603_v2  ;;  %v4816_v49 = vpop.f32.mrb[50].mxu0  ;;  %v4869_v30 = vpop.f32.mrb[42].mxu1  ;;  %5193 = vmatprep.mubr.bf16.mxu0 %v4891_v36  ;;  %5242 = vmatprep.mubr.bf16.mxu1 %v4893_v5 }
 0xb52   : > { %v4817_v37 = vadd.f32 %v4816_v49, %v4591_v55  ;;  %v4870_v31 = vadd.f32 %v4869_v30, %v4599_v58  ;;  %v4818_v22 = vpop.f32.mrb[51].mxu0  ;;  %v4871_v52 = vpop.f32.mrb[43].mxu1  ;;  %5194 = vmatmul.mubr.bf16.vlgmr.msra.gmra.mrb[52].mxu0 %v4890_v39  ;;  %5243 = vmatmul.mubr.bf16.vlgmr.msra.gmra.mrb[44].mxu1 %v4892_v9  ;;  %v4882_v60 = vmax.f32 %v4813_v33, 0.0  ;;  %v4884_v54 = vmax.f32 %v4866_v16, 0.0 }
 0xb53   : > { %v4819_v48 = vadd.f32 %v4818_v22, %v4595_v15  ;;  %v4872_v28 = vadd.f32 %v4871_v52, %v4603_v2  ;;  %v4883_v57 = vmax.f32 %v4815_v38, 0.0  ;;  %v4885_v17 = vmax.f32 %v4868_v46, 0.0  ;;  %v5732_v15 = vld [vmem:[%s783_s19] ss:$0 sm:$0xff] }
 0xb54   : > { %v4886_v56 = vmax.f32 %v4817_v37, 0.0  ;;  %v4888_v10 = vmax.f32 %v4870_v31, 0.0 }
 0xb55   : > { %v4887_v62 = vmax.f32 %v4819_v48, 0.0  ;;  %v4889_v47 = vmax.f32 %v4872_v28, 0.0 }
 0xb56   : > { %v4894_v35 = vpack.c.bf16 %v4886_v56, %v4882_v60  ;;  %v4896_v44 = vpack.c.bf16 %v4888_v10, %v4884_v54 }
 0xb57   : > { %v4895_v34 = vpack.c.bf16 %v4887_v62, %v4883_v57  ;;  %v4897_v3 = vpack.c.bf16 %v4889_v47, %v4885_v17 }
 0xb59   : > { %5201 = vmatprep.mubr.bf16.mxu0 %v4895_v34  ;;  %5250 = vmatprep.mubr.bf16.mxu1 %v4897_v3 }
 0xb5a   : > { %5202 = vmatmul.mubr.bf16.gmra.mrb[56].mxu0 %v4894_v35  ;;  %5251 = vmatmul.mubr.bf16.gmra.mrb[48].mxu1 %v4896_v44 }
 0xc25   : > { %v5842_v55 = vpop.f32.mrb[52].mxu0  ;;  %v5870_v58 = vpop.f32.mrb[44].mxu1 }
 0xc26   : > { %v5843_v2 = vpop.f32.mrb[53].mxu0  ;;  %v5871_v26 = vpop.f32.mrb[45].mxu1 }
 0xc27   : > { %v5844_v12 = vadd.f32 %v5843_v2, %v5842_v55  ;;  %v5872_v32 = vadd.f32 %v5871_v26, %v5870_v58  ;;  %v5845_v24 = vpop.f32.mrb[54].mxu0  ;;  %v5873_v50 = vpop.f32.mrb[46].mxu1 }
 0xc28   : > { %v5846_v1 = vpop.f32.mrb[55].mxu0  ;;  %v5874_v11 = vpop.f32.mrb[47].mxu1 }
 0xc29   : > { %v5196_v59 = vadd.f32 %v5844_v12, %v5732_v15  ;;  %v5847_v53 = vadd.f32 %v5846_v1, %v5845_v24  ;;  %v5875_v4 = vadd.f32 %v5874_v11, %v5873_v50 }
 0xc2b   : > { %v5245_v25 = vadd.f32 %v5872_v32, %v5196_v59  ;;  %v5199_v42 = vadd.f32 %v5847_v53, %v5732_v15 }
 0xc2d   : > { %v5259_v19 = vadd.f32 %v5245_v25, %v8332_v0  ;;  %v5248_v20 = vadd.f32 %v5875_v4, %v5199_v42  ;;  %v5848_v27 = vpop.f32.mrb[56].mxu0  ;;  %v5876_v23 = vpop.f32.mrb[48].mxu1 }
 0xc2e   : > { %v5849_v29 = vpop.f32.mrb[57].mxu0  ;;  %v5877_v18 = vpop.f32.mrb[49].mxu1 }
 0xc2f   : > { %5263 = vst [vmem:[#allocation2] sm:$0xff] %v5259_v19  ;;  %v5260_v21 = vadd.f32 %v5248_v20, %v8334_v63  ;;  %v5850_v61 = vadd.f32 %v5849_v29, %v5848_v27  ;;  %v5878_v8 = vadd.f32 %v5877_v18, %v5876_v23  ;;  %v5851_v45 = vpop.f32.mrb[58].mxu0  ;;  %v5879_v40 = vpop.f32.mrb[50].mxu1 }
 0xc30   : > { %v5852_v6 = vpop.f32.mrb[59].mxu0  ;;  %v5880_v39 = vpop.f32.mrb[51].mxu1 }
 0xc31   : > { %5264 = vst [vmem:[#allocation2 + $0x8] sm:$0xff] %v5260_v21  ;;  %v5204_v9 = vadd.f32 %v5850_v61, %v5732_v15  ;;  %v5853_v36 = vadd.f32 %v5852_v6, %v5851_v45  ;;  %v5881_v5 = vadd.f32 %v5880_v39, %v5879_v40 }
 0xc33   : > { %v5253_v13 = vadd.f32 %v5878_v8, %v5204_v9  ;;  %v5207_v0 = vadd.f32 %v5853_v36, %v5732_v15  ;;  %5270 = sbr.rel (%p5765_p2) target bundleno = 3138 (0xc42), region = 132 }
 0xc35   : > { %v5261_v14 = vadd.f32 %v5253_v13, %v8337_v7  ;;  %v5256_v33 = vadd.f32 %v5881_v5, %v5207_v0 }
 0xc36   : > { %v5271_v63 = vld [vmem:[#allocation2] sm:$0xff] (!%p5765_p2) }
 0xc37   : > { %5265 = vst [vmem:[#allocation2 + $0x10] sm:$0xff] %v5261_v14  ;;  %v5262_v16 = vadd.f32 %v5256_v33, %v8341_v41  ;;  %5275 = vst [vmem:[#allocation24] sm:$0xff] (!%p5765_p2), %v5271_v63 }
 0xc38   : > { %v5272_v43 = vld [vmem:[#allocation2 + $0x8] sm:$0xff] (!%p5765_p2) }
 0xc39   : > { %5266 = vst [vmem:[#allocation2 + $0x18] sm:$0xff] %v5262_v16  ;;  %5276 = vst [vmem:[#allocation24 + $0x8] sm:$0xff] (!%p5765_p2), %v5272_v43 }
 0xc3e   : > { %v5273_v51 = vld [vmem:[#allocation2 + $0x10] sm:$0xff] }
 0xc3f   : > { %5277 = vst [vmem:[#allocation24 + $0x10] sm:$0xff] %v5273_v51 }
 0xc40   : > { %v5274_v38 = vld [vmem:[#allocation2 + $0x18] sm:$0xff] }
 0xc41   : > { %5278 = vst [vmem:[#allocation24 + $0x18] sm:$0xff] %v5274_v38 }
 0xc42 PF: > { %p6100_p6 = scmp.eq.s32.totalorder %s7239_s10, 1  ;;  %s6897_s27 = smov [#allocation24]  }
 0xc43   : > { %s5289_s24 = sshll.u32 %s6897_s27, 4  ;;  %s5290_s24 = int_to_ptr.vmem [resolvable:$true] %s5289_s24 }
 0xc44   : > { %s6762_s25 = scalar_lea.vmem %s5290_s24, 512  ;;  %p6769_p13 = scmp.lt.s32.totalorder %s5290_s24, %s5290_s24 }
 0xc45   : > { %p6763_p10 = scmp.ne.s32.totalorder %s5290_s24, %s6762_s25  ;;  %p6770_p8 = scmp.lt.s32.totalorder %s6762_s25, %s6762_s25 }
 0xc47   : > { %p6764_p1 = pnand %p6763_p10, %p6100_p6  ;;  %p6771_p5 = por %p6770_p8, %p6769_p13 }
 0xc49   : > { %p6765_p4 = pneg %p6764_p1 }
 0xc4b   : > { %p6772_p12 = pnand %p6771_p5, %p6765_p4 }
 0xc4d   : > { %6775 = shalt.err (!%p6772_p12)
}
 0xc4e   : > { %s8586_s1 = sld [smem:[#allocation45_spill]] }
 0xc54   : > { %s6776_s7 = scalar_lea.hbm %s8586_s1, 512 }
 0xc55   : > { %p6777_p3 = scmp.ne.s32.totalorder %s8586_s1, %s6776_s7  ;;  %p6782_p11 = scmp.lt.u32.totalorder %s6776_s7, %s8586_s1 }
 0xc57   : > { %p6778_p0 = pnand %p6777_p3, %p6100_p6 }
 0xc59   : > { %p6779_p9 = pneg %p6778_p0 }
 0xc5b   : > { %p6784_p7 = pnand %p6782_p11, %p6779_p9 }
 0xc5d   : > { %6787 = shalt.err (!%p6784_p7)
}
 0xc5e   : > { %s6898_s3 = smov 128   ;;  %s6899_s23 = smov 8  }
 0xc5f   : > { %6053 = dma.vmem_to_hbm [thread:$0]  (%p6100_p6), %s5290_s24, 512, %s8586_s1, [#allocation5], %s6898_s3, %s6898_s3, %s6899_s23  }
 0xc60   : > { %6841 = dma.done.wait (%p6100_p6), [#allocation5], 512  }
 0xc61   : > { %6843 = vsyncadd (%p6100_p6), [#allocation5], 4294966784 }
 0xc62 PF: > { %s43_s30 = sadd.s32 1, %s6866_s30   ;;  %s8587_s21 = sld [smem:[#allocation33_spill]] }
 0xc63   : > { %p40_p2 = scmp.ge.s32.totalorder %s43_s30, 4   ;;  %s8588_s27 = sld [smem:[#allocation36_spill]] }
 0xc64   : > { %s8589_s15 = sld [smem:[#allocation35_spill]]  ;;  %s8590_s25 = smov %s6850_s26 }
 0xc65   : > { %s8592_s28 = smov %s6862_s29  ;;  %42 = sbr.rel (!%p40_p2) target bundleno = 26 (0x1a), region = 255 }
 0xc68   : > { %s8591_s26 = smov %s8587_s21 }
 0xc6a   : > { %s8593_s29 = smov %s8589_s15 }
 0xc6c   :  { %5305 = vsyncpa [#allocation4], 1 }
 0xc6d   :  { %5307 = vsyncpa [#allocation4 + $0x1], 1 }
 0xc6e   :  { %5308 = vsyncpa [#allocation7], 1 }
 0xc6f   :  { %5310 = vsyncpa [#allocation7 + $0x1], 1 }
 0xc70   :  { %5311 = vsyncpa [#allocation10], 1 }
 0xc71   :  { %5313 = vsyncpa [#allocation10 + $0x1], 1 }
 0xc72   :  { %5314 = vsyncpa [#allocation13], 1 }
 0xc73   :  { %5316 = vsyncpa [#allocation13 + $0x1], 1 }
 0xc74   :  { %5317 = vsyncpa [#allocation16], 1 }
 0xc75   :  { %5319 = vsyncpa [#allocation16 + $0x1], 1 }
 0xc76   :  { %5320 = vsyncpa [#allocation19], 1 }
 0xc77   :  { %5322 = vsyncpa [#allocation19 + $0x1], 1 }
 0xc78   :  { %5323 = vsyncpa [#allocation22], 1 }
 0xc79   :  { %5325 = vsyncpa [#allocation22 + $0x1], 1 }
 0xc7a   :  { %5326 = vsyncpa [#allocation5], 1 }
 0xc7b   :  { %5328 = vsyncpa [#allocation5 + $0x1], 1 }

</bundles_post_ra>
